<compile_context>
chip_gen: v7x
topology: tpu7x:2x2x1
jax: 0.10.0
libtpu: 0.0.40
codegen_flags: <defaults>
</compile_context>

<pallas_src>
import functools

import jax
import jax.numpy as jnp
from jax.experimental import pallas as pl
from jax.experimental.pallas import tpu as pltpu

EPS = 1e-5          # InstanceNorm3d eps
NEG_SLOPE = 0.01    # nn.LeakyReLU default negative_slope

# Set to jnp.bfloat16 on v6e/v7x for ~2x MXU rate and half the patch-scratch VMEM
# (accumulation stays f32); kept f32 here so the numerical self-check stays tight.
MATMUL_DTYPE = jnp.float32

# Explicit scoped-VMEM budget (defaults are only 16-32 MiB).
try:
    _VMEM_CAP = int(pltpu.get_tpu_info().vmem_capacity_bytes)
except Exception:
    _VMEM_CAP = 64 * 1024 * 1024
_VMEM_LIMIT = int(min(_VMEM_CAP * 3 // 4, 96 * 1024 * 1024))


def _conv_in_lrelu(patch_ref, mask_ref, x_cr, w_ref, g_ref, bt_ref, D, H, W):
    """One stage: 3x3x3 SAME conv + InstanceNorm(affine) + LeakyReLU, channel-major.

    patch_ref: VMEM (27*C, R) im2col patch, rows tap-major / cin-minor.
    mask_ref : (27, R) f32 in-bounds masks (zero-padding), shared by both stages.
    x_cr     : (C, R) f32 activation, R = D*H*W on lanes.
    w_ref    : (Cout, 27*C) weights, columns tap-major / cin-minor (pre-cast in wrapper).
    g_ref/bt_ref: (Cout, 1) InstanceNorm gamma / beta.
    Returns (Cout, R) f32.
    """
    C, R = x_cr.shape
    HW = H * W

    # im2col via static lane-rolls + masks.  Wrapped / out-of-volume sources are
    # zeroed by the mask, so each rolled row is exactly a zero-padded conv tap.
    # Every patch write is a full R-wide (lane-dense) row block.
    for kd in range(3):
        for kh in range(3):
            for kw in range(3):
                t = (kd * 3 + kh) * 3 + kw
                s = (kd - 1) * HW + (kh - 1) * W + (kw - 1)        # flat source shift
                shifted = x_cr if s == 0 else pltpu.roll(x_cr, shift=(-s) % R, axis=1)
                m = mask_ref[t:t + 1, :]                           # (1, R)
                patch_ref[t * C:(t + 1) * C, :] = (shifted * m).astype(patch_ref.dtype)

    # Single K = 27*C MXU matmul producing the channel-major activation directly.
    acc = jnp.dot(w_ref[...], patch_ref[...],
                  preferred_element_type=jnp.float32)              # (Cout, R)
    # Conv bias omitted on purpose: a per-channel constant cancels exactly in the
    # InstanceNorm mean subtraction below (breaks if the norm is ever removed).

    # Two-pass InstanceNorm (biased variance) per channel over the R voxels (lanes).
    mean = jnp.mean(acc, axis=1, keepdims=True)                    # (Cout, 1)
    cen = acc - mean
    var = jnp.mean(cen * cen, axis=1, keepdims=True)
    scale = g_ref[...] * jax.lax.rsqrt(var + EPS)                  # (Cout, 1)
    y = cen * scale + bt_ref[...]                                  # (Cout, R)
    return jnp.where(y >= 0, y, NEG_SLOPE * y)                     # LeakyReLU


def conv_block3d_kernel(x_ref, mask_ref, w1_ref, g1_ref, bt1_ref,
                        w2_ref, g2_ref, bt2_ref, out_ref,
                        patch1_ref, patch2_ref, *, D, H, W):
    x_cr = x_ref[0].astype(jnp.float32)                            # (Cin, R) - no transpose
    y1 = _conv_in_lrelu(patch1_ref, mask_ref, x_cr, w1_ref, g1_ref, bt1_ref, D, H, W)
    y2 = _conv_in_lrelu(patch2_ref, mask_ref, y1, w2_ref, g2_ref, bt2_ref, D, H, W)
    out_ref[0] = y2.astype(out_ref.dtype)                          # (Cout, R) lane-dense store


def _tap_masks(D, H, W):
    """(27, R) f32: 1 where the tap's source voxel is inside the volume."""
    r = jnp.arange(D * H * W, dtype=jnp.int32)
    d, h, w = r // (H * W), (r // W) % H, r % W
    rows = []
    for kd in range(3):
        for kh in range(3):
            for kw in range(3):
                dz, dy, dx = kd - 1, kh - 1, kw - 1
                ok = ((d + dz >= 0) & (d + dz < D) &
                      (h + dy >= 0) & (h + dy < H) &
                      (w + dx >= 0) & (w + dx < W))
                rows.append(ok)
    return jnp.stack(rows, axis=0).astype(jnp.float32)


@jax.jit
def conv_block_3d_forward(x_ncdhw, params):
    """Pallas equivalent of ConvBlock3D.forward.

    x: NCDHW.  Conv weights in PyTorch layout (Cout, Cin, kd, kh, kw).
    """
    N, Cin, D, H, W = x_ncdhw.shape
    Cout = params["w1"].shape[0]
    R = D * H * W

    x_flat = x_ncdhw.reshape(N, Cin, R)             # free reshape (no transpose)
    # (Cout, Cin, 3,3,3) -> (Cout, 27*Cin): columns tap-major / cin-minor, matching
    # the in-kernel patch row order.  Done (and cast) once, outside the kernel.
    w1m = jnp.transpose(params["w1"], (0, 2, 3, 4, 1)).reshape(Cout, 27 * Cin).astype(MATMUL_DTYPE)
    w2m = jnp.transpose(params["w2"], (0, 2, 3, 4, 1)).reshape(Cout, 27 * Cout).astype(MATMUL_DTYPE)
    g1 = params["g1"].reshape(Cout, 1).astype(jnp.float32)
    bt1 = params["bt1"].reshape(Cout, 1).astype(jnp.float32)
    g2 = params["g2"].reshape(Cout, 1).astype(jnp.float32)
    bt2 = params["bt2"].reshape(Cout, 1).astype(jnp.float32)
    masks = _tap_masks(D, H, W)
    # NOTE: conv biases params["b1"]/params["b2"] are intentionally NOT passed:
    # a per-channel constant cancels exactly under InstanceNorm's mean subtraction.

    kernel = functools.partial(conv_block3d_kernel, D=D, H=H, W=W)
    out_flat = pl.pallas_call(
        kernel,
        out_shape=jax.ShapeDtypeStruct((N, Cout, R), x_ncdhw.dtype),
        grid=(N,),
        in_specs=[
            pl.BlockSpec((1, Cin, R), lambda n: (n, 0, 0)),
            pl.BlockSpec((27, R), lambda n: (0, 0)),
            pl.BlockSpec((Cout, 27 * Cin), lambda n: (0, 0)),
            pl.BlockSpec((Cout, 1), lambda n: (0, 0)),
            pl.BlockSpec((Cout, 1), lambda n: (0, 0)),
            pl.BlockSpec((Cout, 27 * Cout), lambda n: (0, 0)),
            pl.BlockSpec((Cout, 1), lambda n: (0, 0)),
            pl.BlockSpec((Cout, 1), lambda n: (0, 0)),
        ],
        out_specs=pl.BlockSpec((1, Cout, R), lambda n: (n, 0, 0)),
        scratch_shapes=[
            pltpu.VMEM((27 * Cin, R), MATMUL_DTYPE),    # stage-1 im2col patch
            pltpu.VMEM((27 * Cout, R), MATMUL_DTYPE),   # stage-2 im2col patch
        ],
        compiler_params=pltpu.CompilerParams(
            dimension_semantics=("parallel",),          # v7x: batch over both TCs
            vmem_limit_bytes=_VMEM_LIMIT),
    )(x_flat, masks, w1m, g1, bt1, w2m, g2, bt2)

    # TODO(synk): for large volumes / channel counts (e.g. 64^3 x 64ch on v7x's 64 MiB
    # VMEM) add a D-slab grid axis with halo'd taps and partial-sum InstanceNorm stats,
    # group taps by kd (3 accumulating K=9*C matmuls) instead of the full 27*C patch,
    # and make the slab axis (not N) the "parallel" axis when N == 1.
    return out_flat.reshape(N, Cout, D, H, W)


# ---------------- pure-JAX reference (sanity check, includes conv bias) -------
def _ref_stage(x_ndhwc, w_oidhw, b, gamma, beta):
    w_dhwio = jnp.transpose(w_oidhw, (2, 3, 4, 1, 0))
    y = jax.lax.conv_general_dilated(
        x_ndhwc, w_dhwio, (1, 1, 1), "SAME",
        dimension_numbers=("NDHWC", "DHWIO", "NDHWC"),
        precision=jax.lax.Precision.HIGHEST)
    y = y + b[None, None, None, None, :]
    mean = y.mean(axis=(1, 2, 3), keepdims=True)
    var = ((y - mean) ** 2).mean(axis=(1, 2, 3), keepdims=True)
    y = (y - mean) / jnp.sqrt(var + EPS)
    y = y * gamma + beta
    return jnp.where(y >= 0, y, NEG_SLOPE * y)


def _ref_forward(x_ncdhw, params):
    x = jnp.transpose(x_ncdhw, (0, 2, 3, 4, 1))
    y = _ref_stage(x, params["w1"], params["b1"], params["g1"], params["bt1"])
    y = _ref_stage(y, params["w2"], params["b2"], params["g2"], params["bt2"])
    return jnp.transpose(y, (0, 4, 1, 2, 3))


if __name__ == "__main__":
    # Small, ConvBlock3D-consistent shapes: batch=2, in_ch=4, out_ch=8, D=H=W=8.
    N, Cin, Cout, D, H, W = 2, 4, 8, 8, 8, 8

    key = jax.random.PRNGKey(0)
    kx, kw1, kb1, kg1, kt1, kw2, kb2, kg2, kt2 = jax.random.split(key, 9)

    x = jax.random.normal(kx, (N, Cin, D, H, W), jnp.float32)   # NCDHW input

    # Conv weights in PyTorch layout (Cout, Cin, kd, kh, kw), deterministic init.
    params = {
        "w1": 0.1 * jax.random.normal(kw1, (Cout, Cin, 3, 3, 3), jnp.float32),
        "b1": 0.1 * jax.random.normal(kb1, (Cout,), jnp.float32),
        "g1": 1.0 + 0.1 * jax.random.normal(kg1, (Cout,), jnp.float32),
        "bt1": 0.1 * jax.random.normal(kt1, (Cout,), jnp.float32),
        "w2": 0.1 * jax.random.normal(kw2, (Cout, Cout, 3, 3, 3), jnp.float32),
        "b2": 0.1 * jax.random.normal(kb2, (Cout,), jnp.float32),
        "g2": 1.0 + 0.1 * jax.random.normal(kg2, (Cout,), jnp.float32),
        "bt2": 0.1 * jax.random.normal(kt2, (Cout,), jnp.float32),
    }

    out = conv_block_3d_forward(x, params)
    out = jax.block_until_ready(out)
    assert out.shape == (N, Cout, D, H, W), out.shape

    ref = jax.block_until_ready(_ref_forward(x, params))
    max_err = float(jnp.max(jnp.abs(out - ref)))
    assert max_err < 1e-2, f"mismatch vs reference: max_err={max_err}"

    print("KERNEL_OK")
</pallas_src>

<mosaic_0001>
module attributes {stable_mosaic.version = 11 : i64} {
  func.func @conv_block3d_kernel(%arg0: i32, %arg1: memref<1x4x512xf32, #tpu.memory_space<vmem>>, %arg2: memref<27x512xf32, #tpu.memory_space<vmem>>, %arg3: memref<8x108xf32, #tpu.memory_space<vmem>>, %arg4: memref<8x1xf32, #tpu.memory_space<vmem>>, %arg5: memref<8x1xf32, #tpu.memory_space<vmem>>, %arg6: memref<8x216xf32, #tpu.memory_space<vmem>>, %arg7: memref<8x1xf32, #tpu.memory_space<vmem>>, %arg8: memref<8x1xf32, #tpu.memory_space<vmem>>, %arg9: memref<1x8x512xf32, #tpu.memory_space<vmem>>, %arg10: memref<108x512xf32, #tpu.memory_space<vmem>>, %arg11: memref<216x512xf32, #tpu.memory_space<vmem>>) attributes {dimension_semantics = [#tpu.dimension_semantics<parallel>], iteration_bounds = array<i64: 2>, scalar_prefetch = 0 : i64, scratch_operands = 2 : i64, tpu.core_type = #tpu.core_type<tc>, window_params = [{transform_indices = @transform_0, window_bounds = array<i64: 1, 4, 512>}, {pipeline_mode = #tpu.pipeline_mode<synchronous>, transform_indices = @transform_1, window_bounds = array<i64: 27, 512>}, {pipeline_mode = #tpu.pipeline_mode<synchronous>, transform_indices = @transform_2, window_bounds = array<i64: 8, 108>}, {pipeline_mode = #tpu.pipeline_mode<synchronous>, transform_indices = @transform_3, window_bounds = array<i64: 8, 1>}, {pipeline_mode = #tpu.pipeline_mode<synchronous>, transform_indices = @transform_4, window_bounds = array<i64: 8, 1>}, {pipeline_mode = #tpu.pipeline_mode<synchronous>, transform_indices = @transform_5, window_bounds = array<i64: 8, 216>}, {pipeline_mode = #tpu.pipeline_mode<synchronous>, transform_indices = @transform_6, window_bounds = array<i64: 8, 1>}, {pipeline_mode = #tpu.pipeline_mode<synchronous>, transform_indices = @transform_7, window_bounds = array<i64: 8, 1>}, {transform_indices = @transform_8, window_bounds = array<i64: 1, 8, 512>}]} {
    %c0 = arith.constant 0 : index
    %c0_0 = arith.constant 0 : index
    %c0_1 = arith.constant 0 : index
    %0 = vector.load %arg1[%c0, %c0_0, %c0_1] : memref<1x4x512xf32, #tpu.memory_space<vmem>>, vector<1x4x512xf32>
    %1 = vector.shape_cast %0 : vector<1x4x512xf32> to vector<4x512xf32>
    %c73_i32 = arith.constant 73 : i32
    %2 = tpu.dynamic_rotate %1 by %c73_i32 dim 1 : vector<4x512xf32>, i32 -> vector<4x512xf32>
    %c0_2 = arith.constant 0 : index
    %c0_3 = arith.constant 0 : index
    %3 = vector.load %arg2[%c0_2, %c0_3] : memref<27x512xf32, #tpu.memory_space<vmem>>, vector<1x512xf32>
    %4 = vector.broadcast %3 : vector<1x512xf32> to vector<4x512xf32>
    %5 = arith.mulf %2, %4 : vector<4x512xf32>
    %c0_4 = arith.constant 0 : index
    %c0_5 = arith.constant 0 : index
    %6 = vector.load %arg10[%c0_4, %c0_5] : memref<108x512xf32, #tpu.memory_space<vmem>>, vector<4x512xf32>
    tpu.vector_store %arg10[%c0_4, %c0_5], %5 {strides = array<i32>} : memref<108x512xf32, #tpu.memory_space<vmem>>, vector<4x512xf32>,
    %c72_i32 = arith.constant 72 : i32
    %7 = tpu.dynamic_rotate %1 by %c72_i32 dim 1 : vector<4x512xf32>, i32 -> vector<4x512xf32>
    %c1 = arith.constant 1 : index
    %c0_6 = arith.constant 0 : index
    %8 = vector.load %arg2[%c1, %c0_6] : memref<27x512xf32, #tpu.memory_space<vmem>>, vector<1x512xf32>
    %9 = vector.broadcast %8 : vector<1x512xf32> to vector<4x512xf32>
    %10 = arith.mulf %7, %9 : vector<4x512xf32>
    %c4 = arith.constant 4 : index
    %c0_7 = arith.constant 0 : index
    %11 = vector.load %arg10[%c4, %c0_7] : memref<108x512xf32, #tpu.memory_space<vmem>>, vector<4x512xf32>
    tpu.vector_store %arg10[%c4, %c0_7], %10 {strides = array<i32>} : memref<108x512xf32, #tpu.memory_space<vmem>>, vector<4x512xf32>,
    %c71_i32 = arith.constant 71 : i32
    %12 = tpu.dynamic_rotate %1 by %c71_i32 dim 1 : vector<4x512xf32>, i32 -> vector<4x512xf32>
    %c2 = arith.constant 2 : index
    %c0_8 = arith.constant 0 : index
    %13 = vector.load %arg2[%c2, %c0_8] : memref<27x512xf32, #tpu.memory_space<vmem>>, vector<1x512xf32>
    %14 = vector.broadcast %13 : vector<1x512xf32> to vector<4x512xf32>
    %15 = arith.mulf %12, %14 : vector<4x512xf32>
    %c8 = arith.constant 8 : index
    %c0_9 = arith.constant 0 : index
    %16 = vector.load %arg10[%c8, %c0_9] : memref<108x512xf32, #tpu.memory_space<vmem>>, vector<4x512xf32>
    tpu.vector_store %arg10[%c8, %c0_9], %15 {strides = array<i32>} : memref<108x512xf32, #tpu.memory_space<vmem>>, vector<4x512xf32>,
    %c65_i32 = arith.constant 65 : i32
    %17 = tpu.dynamic_rotate %1 by %c65_i32 dim 1 : vector<4x512xf32>, i32 -> vector<4x512xf32>
    %c3 = arith.constant 3 : index
    %c0_10 = arith.constant 0 : index
    %18 = vector.load %arg2[%c3, %c0_10] : memref<27x512xf32, #tpu.memory_space<vmem>>, vector<1x512xf32>
    %19 = vector.broadcast %18 : vector<1x512xf32> to vector<4x512xf32>
    %20 = arith.mulf %17, %19 : vector<4x512xf32>
    %c12 = arith.constant 12 : index
    %c0_11 = arith.constant 0 : index
    %21 = vector.load %arg10[%c12, %c0_11] : memref<108x512xf32, #tpu.memory_space<vmem>>, vector<4x512xf32>
    tpu.vector_store %arg10[%c12, %c0_11], %20 {strides = array<i32>} : memref<108x512xf32, #tpu.memory_space<vmem>>, vector<4x512xf32>,
    %c64_i32 = arith.constant 64 : i32
    %22 = tpu.dynamic_rotate %1 by %c64_i32 dim 1 : vector<4x512xf32>, i32 -> vector<4x512xf32>
    %c4_12 = arith.constant 4 : index
    %c0_13 = arith.constant 0 : index
    %23 = vector.load %arg2[%c4_12, %c0_13] : memref<27x512xf32, #tpu.memory_space<vmem>>, vector<1x512xf32>
    %24 = vector.broadcast %23 : vector<1x512xf32> to vector<4x512xf32>
    %25 = arith.mulf %22, %24 : vector<4x512xf32>
    %c16 = arith.constant 16 : index
    %c0_14 = arith.constant 0 : index
    %26 = vector.load %arg10[%c16, %c0_14] : memref<108x512xf32, #tpu.memory_space<vmem>>, vector<4x512xf32>
    tpu.vector_store %arg10[%c16, %c0_14], %25 {strides = array<i32>} : memref<108x512xf32, #tpu.memory_space<vmem>>, vector<4x512xf32>,
    %c63_i32 = arith.constant 63 : i32
    %27 = tpu.dynamic_rotate %1 by %c63_i32 dim 1 : vector<4x512xf32>, i32 -> vector<4x512xf32>
    %c5 = arith.constant 5 : index
    %c0_15 = arith.constant 0 : index
    %28 = vector.load %arg2[%c5, %c0_15] : memref<27x512xf32, #tpu.memory_space<vmem>>, vector<1x512xf32>
    %29 = vector.broadcast %28 : vector<1x512xf32> to vector<4x512xf32>
    %30 = arith.mulf %27, %29 : vector<4x512xf32>
    %c20 = arith.constant 20 : index
    %c0_16 = arith.constant 0 : index
    %31 = vector.load %arg10[%c20, %c0_16] : memref<108x512xf32, #tpu.memory_space<vmem>>, vector<4x512xf32>
    tpu.vector_store %arg10[%c20, %c0_16], %30 {strides = array<i32>} : memref<108x512xf32, #tpu.memory_space<vmem>>, vector<4x512xf32>,
    %c57_i32 = arith.constant 57 : i32
    %32 = tpu.dynamic_rotate %1 by %c57_i32 dim 1 : vector<4x512xf32>, i32 -> vector<4x512xf32>
    %c6 = arith.constant 6 : index
    %c0_17 = arith.constant 0 : index
    %33 = vector.load %arg2[%c6, %c0_17] : memref<27x512xf32, #tpu.memory_space<vmem>>, vector<1x512xf32>
    %34 = vector.broadcast %33 : vector<1x512xf32> to vector<4x512xf32>
    %35 = arith.mulf %32, %34 : vector<4x512xf32>
    %c24 = arith.constant 24 : index
    %c0_18 = arith.constant 0 : index
    %36 = vector.load %arg10[%c24, %c0_18] : memref<108x512xf32, #tpu.memory_space<vmem>>, vector<4x512xf32>
    tpu.vector_store %arg10[%c24, %c0_18], %35 {strides = array<i32>} : memref<108x512xf32, #tpu.memory_space<vmem>>, vector<4x512xf32>,
    %c56_i32 = arith.constant 56 : i32
    %37 = tpu.dynamic_rotate %1 by %c56_i32 dim 1 : vector<4x512xf32>, i32 -> vector<4x512xf32>
    %c7 = arith.constant 7 : index
    %c0_19 = arith.constant 0 : index
    %38 = vector.load %arg2[%c7, %c0_19] : memref<27x512xf32, #tpu.memory_space<vmem>>, vector<1x512xf32>
    %39 = vector.broadcast %38 : vector<1x512xf32> to vector<4x512xf32>
    %40 = arith.mulf %37, %39 : vector<4x512xf32>
    %c28 = arith.constant 28 : index
    %c0_20 = arith.constant 0 : index
    %41 = vector.load %arg10[%c28, %c0_20] : memref<108x512xf32, #tpu.memory_space<vmem>>, vector<4x512xf32>
    tpu.vector_store %arg10[%c28, %c0_20], %40 {strides = array<i32>} : memref<108x512xf32, #tpu.memory_space<vmem>>, vector<4x512xf32>,
    %c55_i32 = arith.constant 55 : i32
    %42 = tpu.dynamic_rotate %1 by %c55_i32 dim 1 : vector<4x512xf32>, i32 -> vector<4x512xf32>
    %c8_21 = arith.constant 8 : index
    %c0_22 = arith.constant 0 : index
    %43 = vector.load %arg2[%c8_21, %c0_22] : memref<27x512xf32, #tpu.memory_space<vmem>>, vector<1x512xf32>
    %44 = vector.broadcast %43 : vector<1x512xf32> to vector<4x512xf32>
    %45 = arith.mulf %42, %44 : vector<4x512xf32>
    %c32 = arith.constant 32 : index
    %c0_23 = arith.constant 0 : index
    %46 = vector.load %arg10[%c32, %c0_23] : memref<108x512xf32, #tpu.memory_space<vmem>>, vector<4x512xf32>
    tpu.vector_store %arg10[%c32, %c0_23], %45 {strides = array<i32>} : memref<108x512xf32, #tpu.memory_space<vmem>>, vector<4x512xf32>,
    %c9_i32 = arith.constant 9 : i32
    %47 = tpu.dynamic_rotate %1 by %c9_i32 dim 1 : vector<4x512xf32>, i32 -> vector<4x512xf32>
    %c9 = arith.constant 9 : index
    %c0_24 = arith.constant 0 : index
    %48 = vector.load %arg2[%c9, %c0_24] : memref<27x512xf32, #tpu.memory_space<vmem>>, vector<1x512xf32>
    %49 = vector.broadcast %48 : vector<1x512xf32> to vector<4x512xf32>
    %50 = arith.mulf %47, %49 : vector<4x512xf32>
    %c36 = arith.constant 36 : index
    %c0_25 = arith.constant 0 : index
    %51 = vector.load %arg10[%c36, %c0_25] : memref<108x512xf32, #tpu.memory_space<vmem>>, vector<4x512xf32>
    tpu.vector_store %arg10[%c36, %c0_25], %50 {strides = array<i32>} : memref<108x512xf32, #tpu.memory_space<vmem>>, vector<4x512xf32>,
    %c8_i32 = arith.constant 8 : i32
    %52 = tpu.dynamic_rotate %1 by %c8_i32 dim 1 : vector<4x512xf32>, i32 -> vector<4x512xf32>
    %c10 = arith.constant 10 : index
    %c0_26 = arith.constant 0 : index
    %53 = vector.load %arg2[%c10, %c0_26] : memref<27x512xf32, #tpu.memory_space<vmem>>, vector<1x512xf32>
    %54 = vector.broadcast %53 : vector<1x512xf32> to vector<4x512xf32>
    %55 = arith.mulf %52, %54 : vector<4x512xf32>
    %c40 = arith.constant 40 : index
    %c0_27 = arith.constant 0 : index
    %56 = vector.load %arg10[%c40, %c0_27] : memref<108x512xf32, #tpu.memory_space<vmem>>, vector<4x512xf32>
    tpu.vector_store %arg10[%c40, %c0_27], %55 {strides = array<i32>} : memref<108x512xf32, #tpu.memory_space<vmem>>, vector<4x512xf32>,
    %c7_i32 = arith.constant 7 : i32
    %57 = tpu.dynamic_rotate %1 by %c7_i32 dim 1 : vector<4x512xf32>, i32 -> vector<4x512xf32>
    %c11 = arith.constant 11 : index
    %c0_28 = arith.constant 0 : index
    %58 = vector.load %arg2[%c11, %c0_28] : memref<27x512xf32, #tpu.memory_space<vmem>>, vector<1x512xf32>
    %59 = vector.broadcast %58 : vector<1x512xf32> to vector<4x512xf32>
    %60 = arith.mulf %57, %59 : vector<4x512xf32>
    %c44 = arith.constant 44 : index
    %c0_29 = arith.constant 0 : index
    %61 = vector.load %arg10[%c44, %c0_29] : memref<108x512xf32, #tpu.memory_space<vmem>>, vector<4x512xf32>
    tpu.vector_store %arg10[%c44, %c0_29], %60 {strides = array<i32>} : memref<108x512xf32, #tpu.memory_space<vmem>>, vector<4x512xf32>,
    %c1_i32 = arith.constant 1 : i32
    %62 = tpu.dynamic_rotate %1 by %c1_i32 dim 1 : vector<4x512xf32>, i32 -> vector<4x512xf32>
    %c12_30 = arith.constant 12 : index
    %c0_31 = arith.constant 0 : index
    %63 = vector.load %arg2[%c12_30, %c0_31] : memref<27x512xf32, #tpu.memory_space<vmem>>, vector<1x512xf32>
    %64 = vector.broadcast %63 : vector<1x512xf32> to vector<4x512xf32>
    %65 = arith.mulf %62, %64 : vector<4x512xf32>
    %c48 = arith.constant 48 : index
    %c0_32 = arith.constant 0 : index
    %66 = vector.load %arg10[%c48, %c0_32] : memref<108x512xf32, #tpu.memory_space<vmem>>, vector<4x512xf32>
    tpu.vector_store %arg10[%c48, %c0_32], %65 {strides = array<i32>} : memref<108x512xf32, #tpu.memory_space<vmem>>, vector<4x512xf32>,
    %c13 = arith.constant 13 : index
    %c0_33 = arith.constant 0 : index
    %67 = vector.load %arg2[%c13, %c0_33] : memref<27x512xf32, #tpu.memory_space<vmem>>, vector<1x512xf32>
    %68 = vector.broadcast %67 : vector<1x512xf32> to vector<4x512xf32>
    %69 = arith.mulf %1, %68 : vector<4x512xf32>
    %c52 = arith.constant 52 : index
    %c0_34 = arith.constant 0 : index
    %70 = vector.load %arg10[%c52, %c0_34] : memref<108x512xf32, #tpu.memory_space<vmem>>, vector<4x512xf32>
    tpu.vector_store %arg10[%c52, %c0_34], %69 {strides = array<i32>} : memref<108x512xf32, #tpu.memory_space<vmem>>, vector<4x512xf32>,
    %c511_i32 = arith.constant 511 : i32
    %71 = tpu.dynamic_rotate %1 by %c511_i32 dim 1 : vector<4x512xf32>, i32 -> vector<4x512xf32>
    %c14 = arith.constant 14 : index
    %c0_35 = arith.constant 0 : index
    %72 = vector.load %arg2[%c14, %c0_35] : memref<27x512xf32, #tpu.memory_space<vmem>>, vector<1x512xf32>
    %73 = vector.broadcast %72 : vector<1x512xf32> to vector<4x512xf32>
    %74 = arith.mulf %71, %73 : vector<4x512xf32>
    %c56 = arith.constant 56 : index
    %c0_36 = arith.constant 0 : index
    %75 = vector.load %arg10[%c56, %c0_36] : memref<108x512xf32, #tpu.memory_space<vmem>>, vector<4x512xf32>
    tpu.vector_store %arg10[%c56, %c0_36], %74 {strides = array<i32>} : memref<108x512xf32, #tpu.memory_space<vmem>>, vector<4x512xf32>,
    %c505_i32 = arith.constant 505 : i32
    %76 = tpu.dynamic_rotate %1 by %c505_i32 dim 1 : vector<4x512xf32>, i32 -> vector<4x512xf32>
    %c15 = arith.constant 15 : index
    %c0_37 = arith.constant 0 : index
    %77 = vector.load %arg2[%c15, %c0_37] : memref<27x512xf32, #tpu.memory_space<vmem>>, vector<1x512xf32>
    %78 = vector.broadcast %77 : vector<1x512xf32> to vector<4x512xf32>
    %79 = arith.mulf %76, %78 : vector<4x512xf32>
    %c60 = arith.constant 60 : index
    %c0_38 = arith.constant 0 : index
    %80 = vector.load %arg10[%c60, %c0_38] : memref<108x512xf32, #tpu.memory_space<vmem>>, vector<4x512xf32>
    tpu.vector_store %arg10[%c60, %c0_38], %79 {strides = array<i32>} : memref<108x512xf32, #tpu.memory_space<vmem>>, vector<4x512xf32>,
    %c504_i32 = arith.constant 504 : i32
    %81 = tpu.dynamic_rotate %1 by %c504_i32 dim 1 : vector<4x512xf32>, i32 -> vector<4x512xf32>
    %c16_39 = arith.constant 16 : index
    %c0_40 = arith.constant 0 : index
    %82 = vector.load %arg2[%c16_39, %c0_40] : memref<27x512xf32, #tpu.memory_space<vmem>>, vector<1x512xf32>
    %83 = vector.broadcast %82 : vector<1x512xf32> to vector<4x512xf32>
    %84 = arith.mulf %81, %83 : vector<4x512xf32>
    %c64 = arith.constant 64 : index
    %c0_41 = arith.constant 0 : index
    %85 = vector.load %arg10[%c64, %c0_41] : memref<108x512xf32, #tpu.memory_space<vmem>>, vector<4x512xf32>
    tpu.vector_store %arg10[%c64, %c0_41], %84 {strides = array<i32>} : memref<108x512xf32, #tpu.memory_space<vmem>>, vector<4x512xf32>,
    %c503_i32 = arith.constant 503 : i32
    %86 = tpu.dynamic_rotate %1 by %c503_i32 dim 1 : vector<4x512xf32>, i32 -> vector<4x512xf32>
    %c17 = arith.constant 17 : index
    %c0_42 = arith.constant 0 : index
    %87 = vector.load %arg2[%c17, %c0_42] : memref<27x512xf32, #tpu.memory_space<vmem>>, vector<1x512xf32>
    %88 = vector.broadcast %87 : vector<1x512xf32> to vector<4x512xf32>
    %89 = arith.mulf %86, %88 : vector<4x512xf32>
    %c68 = arith.constant 68 : index
    %c0_43 = arith.constant 0 : index
    %90 = vector.load %arg10[%c68, %c0_43] : memref<108x512xf32, #tpu.memory_space<vmem>>, vector<4x512xf32>
    tpu.vector_store %arg10[%c68, %c0_43], %89 {strides = array<i32>} : memref<108x512xf32, #tpu.memory_space<vmem>>, vector<4x512xf32>,
    %c457_i32 = arith.constant 457 : i32
    %91 = tpu.dynamic_rotate %1 by %c457_i32 dim 1 : vector<4x512xf32>, i32 -> vector<4x512xf32>
    %c18 = arith.constant 18 : index
    %c0_44 = arith.constant 0 : index
    %92 = vector.load %arg2[%c18, %c0_44] : memref<27x512xf32, #tpu.memory_space<vmem>>, vector<1x512xf32>
    %93 = vector.broadcast %92 : vector<1x512xf32> to vector<4x512xf32>
    %94 = arith.mulf %91, %93 : vector<4x512xf32>
    %c72 = arith.constant 72 : index
    %c0_45 = arith.constant 0 : index
    %95 = vector.load %arg10[%c72, %c0_45] : memref<108x512xf32, #tpu.memory_space<vmem>>, vector<4x512xf32>
    tpu.vector_store %arg10[%c72, %c0_45], %94 {strides = array<i32>} : memref<108x512xf32, #tpu.memory_space<vmem>>, vector<4x512xf32>,
    %c456_i32 = arith.constant 456 : i32
    %96 = tpu.dynamic_rotate %1 by %c456_i32 dim 1 : vector<4x512xf32>, i32 -> vector<4x512xf32>
    %c19 = arith.constant 19 : index
    %c0_46 = arith.constant 0 : index
    %97 = vector.load %arg2[%c19, %c0_46] : memref<27x512xf32, #tpu.memory_space<vmem>>, vector<1x512xf32>
    %98 = vector.broadcast %97 : vector<1x512xf32> to vector<4x512xf32>
    %99 = arith.mulf %96, %98 : vector<4x512xf32>
    %c76 = arith.constant 76 : index
    %c0_47 = arith.constant 0 : index
    %100 = vector.load %arg10[%c76, %c0_47] : memref<108x512xf32, #tpu.memory_space<vmem>>, vector<4x512xf32>
    tpu.vector_store %arg10[%c76, %c0_47], %99 {strides = array<i32>} : memref<108x512xf32, #tpu.memory_space<vmem>>, vector<4x512xf32>,
    %c455_i32 = arith.constant 455 : i32
    %101 = tpu.dynamic_rotate %1 by %c455_i32 dim 1 : vector<4x512xf32>, i32 -> vector<4x512xf32>
    %c20_48 = arith.constant 20 : index
    %c0_49 = arith.constant 0 : index
    %102 = vector.load %arg2[%c20_48, %c0_49] : memref<27x512xf32, #tpu.memory_space<vmem>>, vector<1x512xf32>
    %103 = vector.broadcast %102 : vector<1x512xf32> to vector<4x512xf32>
    %104 = arith.mulf %101, %103 : vector<4x512xf32>
    %c80 = arith.constant 80 : index
    %c0_50 = arith.constant 0 : index
    %105 = vector.load %arg10[%c80, %c0_50] : memref<108x512xf32, #tpu.memory_space<vmem>>, vector<4x512xf32>
    tpu.vector_store %arg10[%c80, %c0_50], %104 {strides = array<i32>} : memref<108x512xf32, #tpu.memory_space<vmem>>, vector<4x512xf32>,
    %c449_i32 = arith.constant 449 : i32
    %106 = tpu.dynamic_rotate %1 by %c449_i32 dim 1 : vector<4x512xf32>, i32 -> vector<4x512xf32>
    %c21 = arith.constant 21 : index
    %c0_51 = arith.constant 0 : index
    %107 = vector.load %arg2[%c21, %c0_51] : memref<27x512xf32, #tpu.memory_space<vmem>>, vector<1x512xf32>
    %108 = vector.broadcast %107 : vector<1x512xf32> to vector<4x512xf32>
    %109 = arith.mulf %106, %108 : vector<4x512xf32>
    %c84 = arith.constant 84 : index
    %c0_52 = arith.constant 0 : index
    %110 = vector.load %arg10[%c84, %c0_52] : memref<108x512xf32, #tpu.memory_space<vmem>>, vector<4x512xf32>
    tpu.vector_store %arg10[%c84, %c0_52], %109 {strides = array<i32>} : memref<108x512xf32, #tpu.memory_space<vmem>>, vector<4x512xf32>,
    %c448_i32 = arith.constant 448 : i32
    %111 = tpu.dynamic_rotate %1 by %c448_i32 dim 1 : vector<4x512xf32>, i32 -> vector<4x512xf32>
    %c22 = arith.constant 22 : index
    %c0_53 = arith.constant 0 : index
    %112 = vector.load %arg2[%c22, %c0_53] : memref<27x512xf32, #tpu.memory_space<vmem>>, vector<1x512xf32>
    %113 = vector.broadcast %112 : vector<1x512xf32> to vector<4x512xf32>
    %114 = arith.mulf %111, %113 : vector<4x512xf32>
    %c88 = arith.constant 88 : index
    %c0_54 = arith.constant 0 : index
    %115 = vector.load %arg10[%c88, %c0_54] : memref<108x512xf32, #tpu.memory_space<vmem>>, vector<4x512xf32>
    tpu.vector_store %arg10[%c88, %c0_54], %114 {strides = array<i32>} : memref<108x512xf32, #tpu.memory_space<vmem>>, vector<4x512xf32>,
    %c447_i32 = arith.constant 447 : i32
    %116 = tpu.dynamic_rotate %1 by %c447_i32 dim 1 : vector<4x512xf32>, i32 -> vector<4x512xf32>
    %c23 = arith.constant 23 : index
    %c0_55 = arith.constant 0 : index
    %117 = vector.load %arg2[%c23, %c0_55] : memref<27x512xf32, #tpu.memory_space<vmem>>, vector<1x512xf32>
    %118 = vector.broadcast %117 : vector<1x512xf32> to vector<4x512xf32>
    %119 = arith.mulf %116, %118 : vector<4x512xf32>
    %c92 = arith.constant 92 : index
    %c0_56 = arith.constant 0 : index
    %120 = vector.load %arg10[%c92, %c0_56] : memref<108x512xf32, #tpu.memory_space<vmem>>, vector<4x512xf32>
    tpu.vector_store %arg10[%c92, %c0_56], %119 {strides = array<i32>} : memref<108x512xf32, #tpu.memory_space<vmem>>, vector<4x512xf32>,
    %c441_i32 = arith.constant 441 : i32
    %121 = tpu.dynamic_rotate %1 by %c441_i32 dim 1 : vector<4x512xf32>, i32 -> vector<4x512xf32>
    %c24_57 = arith.constant 24 : index
    %c0_58 = arith.constant 0 : index
    %122 = vector.load %arg2[%c24_57, %c0_58] : memref<27x512xf32, #tpu.memory_space<vmem>>, vector<1x512xf32>
    %123 = vector.broadcast %122 : vector<1x512xf32> to vector<4x512xf32>
    %124 = arith.mulf %121, %123 : vector<4x512xf32>
    %c96 = arith.constant 96 : index
    %c0_59 = arith.constant 0 : index
    %125 = vector.load %arg10[%c96, %c0_59] : memref<108x512xf32, #tpu.memory_space<vmem>>, vector<4x512xf32>
    tpu.vector_store %arg10[%c96, %c0_59], %124 {strides = array<i32>} : memref<108x512xf32, #tpu.memory_space<vmem>>, vector<4x512xf32>,
    %c440_i32 = arith.constant 440 : i32
    %126 = tpu.dynamic_rotate %1 by %c440_i32 dim 1 : vector<4x512xf32>, i32 -> vector<4x512xf32>
    %c25 = arith.constant 25 : index
    %c0_60 = arith.constant 0 : index
    %127 = vector.load %arg2[%c25, %c0_60] : memref<27x512xf32, #tpu.memory_space<vmem>>, vector<1x512xf32>
    %128 = vector.broadcast %127 : vector<1x512xf32> to vector<4x512xf32>
    %129 = arith.mulf %126, %128 : vector<4x512xf32>
    %c100 = arith.constant 100 : index
    %c0_61 = arith.constant 0 : index
    %130 = vector.load %arg10[%c100, %c0_61] : memref<108x512xf32, #tpu.memory_space<vmem>>, vector<4x512xf32>
    tpu.vector_store %arg10[%c100, %c0_61], %129 {strides = array<i32>} : memref<108x512xf32, #tpu.memory_space<vmem>>, vector<4x512xf32>,
    %c439_i32 = arith.constant 439 : i32
    %131 = tpu.dynamic_rotate %1 by %c439_i32 dim 1 : vector<4x512xf32>, i32 -> vector<4x512xf32>
    %c26 = arith.constant 26 : index
    %c0_62 = arith.constant 0 : index
    %132 = vector.load %arg2[%c26, %c0_62] : memref<27x512xf32, #tpu.memory_space<vmem>>, vector<1x512xf32>
    %133 = vector.broadcast %132 : vector<1x512xf32> to vector<4x512xf32>
    %134 = arith.mulf %131, %133 : vector<4x512xf32>
    %c104 = arith.constant 104 : index
    %c0_63 = arith.constant 0 : index
    %135 = vector.load %arg10[%c104, %c0_63] : memref<108x512xf32, #tpu.memory_space<vmem>>, vector<4x512xf32>
    tpu.vector_store %arg10[%c104, %c0_63], %134 {strides = array<i32>} : memref<108x512xf32, #tpu.memory_space<vmem>>, vector<4x512xf32>,
    %c0_64 = arith.constant 0 : index
    %c0_65 = arith.constant 0 : index
    %136 = vector.load %arg3[%c0_64, %c0_65] : memref<8x108xf32, #tpu.memory_space<vmem>>, vector<8x108xf32>
    %c0_66 = arith.constant 0 : index
    %c0_67 = arith.constant 0 : index
    %137 = vector.load %arg10[%c0_66, %c0_67] : memref<108x512xf32, #tpu.memory_space<vmem>>, vector<108x512xf32>
    %cst = arith.constant dense<0.000000e+00> : vector<8x512xf32>
    %138 = tpu.matmul %136, %137, %cst {dimension_numbers = #tpu.dot_dimension_numbers<[1], [0], [0], [1], [0, 0, 1, 1], [], []>} : vector<8x108xf32>, vector<108x512xf32>, vector<8x512xf32> -> vector<8x512xf32>
    %cst_68 = arith.constant dense<0.000000e+00> : vector<8xf32>
    %139 = vector.multi_reduction <add>, %138, %cst_68 [1] : vector<8x512xf32> to vector<8xf32>
    %140 = vector.shape_cast %139 : vector<8xf32> to vector<8x1xf32>
    %cst_69 = arith.constant 5.120000e+02 : f32
    %141 = vector.broadcast %cst_69 : f32 to vector<8x1xf32>
    %142 = arith.divf %140, %141 : vector<8x1xf32>
    %143 = vector.broadcast %142 : vector<8x1xf32> to vector<8x512xf32>
    %144 = arith.subf %138, %143 : vector<8x512xf32>
    %145 = arith.mulf %144, %144 : vector<8x512xf32>
    %cst_70 = arith.constant dense<0.000000e+00> : vector<8xf32>
    %146 = vector.multi_reduction <add>, %145, %cst_70 [1] : vector<8x512xf32> to vector<8xf32>
    %147 = vector.shape_cast %146 : vector<8xf32> to vector<8x1xf32>
    %cst_71 = arith.constant 5.120000e+02 : f32
    %148 = vector.broadcast %cst_71 : f32 to vector<8x1xf32>
    %149 = arith.divf %147, %148 : vector<8x1xf32>
    %c0_72 = arith.constant 0 : index
    %c0_73 = arith.constant 0 : index
    %150 = vector.load %arg4[%c0_72, %c0_73] : memref<8x1xf32, #tpu.memory_space<vmem>>, vector<8x1xf32>
    %cst_74 = arith.constant 9.99999974E-6 : f32
    %151 = vector.broadcast %cst_74 : f32 to vector<8x1xf32>
    %152 = arith.addf %149, %151 : vector<8x1xf32>
    %153 = math.rsqrt %152 : vector<8x1xf32>
    %154 = arith.mulf %150, %153 : vector<8x1xf32>
    %155 = vector.broadcast %154 : vector<8x1xf32> to vector<8x512xf32>
    %156 = arith.mulf %144, %155 : vector<8x512xf32>
    %c0_75 = arith.constant 0 : index
    %c0_76 = arith.constant 0 : index
    %157 = vector.load %arg5[%c0_75, %c0_76] : memref<8x1xf32, #tpu.memory_space<vmem>>, vector<8x1xf32>
    %158 = vector.broadcast %157 : vector<8x1xf32> to vector<8x512xf32>
    %159 = arith.addf %156, %158 : vector<8x512xf32>
    %cst_77 = arith.constant 0.000000e+00 : f32
    %160 = vector.broadcast %cst_77 : f32 to vector<8x512xf32>
    %161 = arith.cmpf oge, %159, %160 : vector<8x512xf32>
    %cst_78 = arith.constant 0.00999999977 : f32
    %162 = vector.broadcast %cst_78 : f32 to vector<8x512xf32>
    %163 = arith.mulf %162, %159 : vector<8x512xf32>
    %164 = arith.select %161, %159, %163 : vector<8x512xi1>, vector<8x512xf32>
    %c73_i32_79 = arith.constant 73 : i32
    %165 = tpu.dynamic_rotate %164 by %c73_i32_79 dim 1 : vector<8x512xf32>, i32 -> vector<8x512xf32>
    %c0_80 = arith.constant 0 : index
    %c0_81 = arith.constant 0 : index
    %166 = vector.load %arg2[%c0_80, %c0_81] : memref<27x512xf32, #tpu.memory_space<vmem>>, vector<1x512xf32>
    %167 = vector.broadcast %166 : vector<1x512xf32> to vector<8x512xf32>
    %168 = arith.mulf %165, %167 : vector<8x512xf32>
    %c0_82 = arith.constant 0 : index
    %c0_83 = arith.constant 0 : index
    %169 = vector.load %arg11[%c0_82, %c0_83] : memref<216x512xf32, #tpu.memory_space<vmem>>, vector<8x512xf32>
    tpu.vector_store %arg11[%c0_82, %c0_83], %168 {strides = array<i32>} : memref<216x512xf32, #tpu.memory_space<vmem>>, vector<8x512xf32>,
    %c72_i32_84 = arith.constant 72 : i32
    %170 = tpu.dynamic_rotate %164 by %c72_i32_84 dim 1 : vector<8x512xf32>, i32 -> vector<8x512xf32>
    %c1_85 = arith.constant 1 : index
    %c0_86 = arith.constant 0 : index
    %171 = vector.load %arg2[%c1_85, %c0_86] : memref<27x512xf32, #tpu.memory_space<vmem>>, vector<1x512xf32>
    %172 = vector.broadcast %171 : vector<1x512xf32> to vector<8x512xf32>
    %173 = arith.mulf %170, %172 : vector<8x512xf32>
    %c8_87 = arith.constant 8 : index
    %c0_88 = arith.constant 0 : index
    %174 = vector.load %arg11[%c8_87, %c0_88] : memref<216x512xf32, #tpu.memory_space<vmem>>, vector<8x512xf32>
    tpu.vector_store %arg11[%c8_87, %c0_88], %173 {strides = array<i32>} : memref<216x512xf32, #tpu.memory_space<vmem>>, vector<8x512xf32>,
    %c71_i32_89 = arith.constant 71 : i32
    %175 = tpu.dynamic_rotate %164 by %c71_i32_89 dim 1 : vector<8x512xf32>, i32 -> vector<8x512xf32>
    %c2_90 = arith.constant 2 : index
    %c0_91 = arith.constant 0 : index
    %176 = vector.load %arg2[%c2_90, %c0_91] : memref<27x512xf32, #tpu.memory_space<vmem>>, vector<1x512xf32>
    %177 = vector.broadcast %176 : vector<1x512xf32> to vector<8x512xf32>
    %178 = arith.mulf %175, %177 : vector<8x512xf32>
    %c16_92 = arith.constant 16 : index
    %c0_93 = arith.constant 0 : index
    %179 = vector.load %arg11[%c16_92, %c0_93] : memref<216x512xf32, #tpu.memory_space<vmem>>, vector<8x512xf32>
    tpu.vector_store %arg11[%c16_92, %c0_93], %178 {strides = array<i32>} : memref<216x512xf32, #tpu.memory_space<vmem>>, vector<8x512xf32>,
    %c65_i32_94 = arith.constant 65 : i32
    %180 = tpu.dynamic_rotate %164 by %c65_i32_94 dim 1 : vector<8x512xf32>, i32 -> vector<8x512xf32>
    %c3_95 = arith.constant 3 : index
    %c0_96 = arith.constant 0 : index
    %181 = vector.load %arg2[%c3_95, %c0_96] : memref<27x512xf32, #tpu.memory_space<vmem>>, vector<1x512xf32>
    %182 = vector.broadcast %181 : vector<1x512xf32> to vector<8x512xf32>
    %183 = arith.mulf %180, %182 : vector<8x512xf32>
    %c24_97 = arith.constant 24 : index
    %c0_98 = arith.constant 0 : index
    %184 = vector.load %arg11[%c24_97, %c0_98] : memref<216x512xf32, #tpu.memory_space<vmem>>, vector<8x512xf32>
    tpu.vector_store %arg11[%c24_97, %c0_98], %183 {strides = array<i32>} : memref<216x512xf32, #tpu.memory_space<vmem>>, vector<8x512xf32>,
    %c64_i32_99 = arith.constant 64 : i32
    %185 = tpu.dynamic_rotate %164 by %c64_i32_99 dim 1 : vector<8x512xf32>, i32 -> vector<8x512xf32>
    %c4_100 = arith.constant 4 : index
    %c0_101 = arith.constant 0 : index
    %186 = vector.load %arg2[%c4_100, %c0_101] : memref<27x512xf32, #tpu.memory_space<vmem>>, vector<1x512xf32>
    %187 = vector.broadcast %186 : vector<1x512xf32> to vector<8x512xf32>
    %188 = arith.mulf %185, %187 : vector<8x512xf32>
    %c32_102 = arith.constant 32 : index
    %c0_103 = arith.constant 0 : index
    %189 = vector.load %arg11[%c32_102, %c0_103] : memref<216x512xf32, #tpu.memory_space<vmem>>, vector<8x512xf32>
    tpu.vector_store %arg11[%c32_102, %c0_103], %188 {strides = array<i32>} : memref<216x512xf32, #tpu.memory_space<vmem>>, vector<8x512xf32>,
    %c63_i32_104 = arith.constant 63 : i32
    %190 = tpu.dynamic_rotate %164 by %c63_i32_104 dim 1 : vector<8x512xf32>, i32 -> vector<8x512xf32>
    %c5_105 = arith.constant 5 : index
    %c0_106 = arith.constant 0 : index
    %191 = vector.load %arg2[%c5_105, %c0_106] : memref<27x512xf32, #tpu.memory_space<vmem>>, vector<1x512xf32>
    %192 = vector.broadcast %191 : vector<1x512xf32> to vector<8x512xf32>
    %193 = arith.mulf %190, %192 : vector<8x512xf32>
    %c40_107 = arith.constant 40 : index
    %c0_108 = arith.constant 0 : index
    %194 = vector.load %arg11[%c40_107, %c0_108] : memref<216x512xf32, #tpu.memory_space<vmem>>, vector<8x512xf32>
    tpu.vector_store %arg11[%c40_107, %c0_108], %193 {strides = array<i32>} : memref<216x512xf32, #tpu.memory_space<vmem>>, vector<8x512xf32>,
    %c57_i32_109 = arith.constant 57 : i32
    %195 = tpu.dynamic_rotate %164 by %c57_i32_109 dim 1 : vector<8x512xf32>, i32 -> vector<8x512xf32>
    %c6_110 = arith.constant 6 : index
    %c0_111 = arith.constant 0 : index
    %196 = vector.load %arg2[%c6_110, %c0_111] : memref<27x512xf32, #tpu.memory_space<vmem>>, vector<1x512xf32>
    %197 = vector.broadcast %196 : vector<1x512xf32> to vector<8x512xf32>
    %198 = arith.mulf %195, %197 : vector<8x512xf32>
    %c48_112 = arith.constant 48 : index
    %c0_113 = arith.constant 0 : index
    %199 = vector.load %arg11[%c48_112, %c0_113] : memref<216x512xf32, #tpu.memory_space<vmem>>, vector<8x512xf32>
    tpu.vector_store %arg11[%c48_112, %c0_113], %198 {strides = array<i32>} : memref<216x512xf32, #tpu.memory_space<vmem>>, vector<8x512xf32>,
    %c56_i32_114 = arith.constant 56 : i32
    %200 = tpu.dynamic_rotate %164 by %c56_i32_114 dim 1 : vector<8x512xf32>, i32 -> vector<8x512xf32>
    %c7_115 = arith.constant 7 : index
    %c0_116 = arith.constant 0 : index
    %201 = vector.load %arg2[%c7_115, %c0_116] : memref<27x512xf32, #tpu.memory_space<vmem>>, vector<1x512xf32>
    %202 = vector.broadcast %201 : vector<1x512xf32> to vector<8x512xf32>
    %203 = arith.mulf %200, %202 : vector<8x512xf32>
    %c56_117 = arith.constant 56 : index
    %c0_118 = arith.constant 0 : index
    %204 = vector.load %arg11[%c56_117, %c0_118] : memref<216x512xf32, #tpu.memory_space<vmem>>, vector<8x512xf32>
    tpu.vector_store %arg11[%c56_117, %c0_118], %203 {strides = array<i32>} : memref<216x512xf32, #tpu.memory_space<vmem>>, vector<8x512xf32>,
    %c55_i32_119 = arith.constant 55 : i32
    %205 = tpu.dynamic_rotate %164 by %c55_i32_119 dim 1 : vector<8x512xf32>, i32 -> vector<8x512xf32>
    %c8_120 = arith.constant 8 : index
    %c0_121 = arith.constant 0 : index
    %206 = vector.load %arg2[%c8_120, %c0_121] : memref<27x512xf32, #tpu.memory_space<vmem>>, vector<1x512xf32>
    %207 = vector.broadcast %206 : vector<1x512xf32> to vector<8x512xf32>
    %208 = arith.mulf %205, %207 : vector<8x512xf32>
    %c64_122 = arith.constant 64 : index
    %c0_123 = arith.constant 0 : index
    %209 = vector.load %arg11[%c64_122, %c0_123] : memref<216x512xf32, #tpu.memory_space<vmem>>, vector<8x512xf32>
    tpu.vector_store %arg11[%c64_122, %c0_123], %208 {strides = array<i32>} : memref<216x512xf32, #tpu.memory_space<vmem>>, vector<8x512xf32>,
    %c9_i32_124 = arith.constant 9 : i32
    %210 = tpu.dynamic_rotate %164 by %c9_i32_124 dim 1 : vector<8x512xf32>, i32 -> vector<8x512xf32>
    %c9_125 = arith.constant 9 : index
    %c0_126 = arith.constant 0 : index
    %211 = vector.load %arg2[%c9_125, %c0_126] : memref<27x512xf32, #tpu.memory_space<vmem>>, vector<1x512xf32>
    %212 = vector.broadcast %211 : vector<1x512xf32> to vector<8x512xf32>
    %213 = arith.mulf %210, %212 : vector<8x512xf32>
    %c72_127 = arith.constant 72 : index
    %c0_128 = arith.constant 0 : index
    %214 = vector.load %arg11[%c72_127, %c0_128] : memref<216x512xf32, #tpu.memory_space<vmem>>, vector<8x512xf32>
    tpu.vector_store %arg11[%c72_127, %c0_128], %213 {strides = array<i32>} : memref<216x512xf32, #tpu.memory_space<vmem>>, vector<8x512xf32>,
    %c8_i32_129 = arith.constant 8 : i32
    %215 = tpu.dynamic_rotate %164 by %c8_i32_129 dim 1 : vector<8x512xf32>, i32 -> vector<8x512xf32>
    %c10_130 = arith.constant 10 : index
    %c0_131 = arith.constant 0 : index
    %216 = vector.load %arg2[%c10_130, %c0_131] : memref<27x512xf32, #tpu.memory_space<vmem>>, vector<1x512xf32>
    %217 = vector.broadcast %216 : vector<1x512xf32> to vector<8x512xf32>
    %218 = arith.mulf %215, %217 : vector<8x512xf32>
    %c80_132 = arith.constant 80 : index
    %c0_133 = arith.constant 0 : index
    %219 = vector.load %arg11[%c80_132, %c0_133] : memref<216x512xf32, #tpu.memory_space<vmem>>, vector<8x512xf32>
    tpu.vector_store %arg11[%c80_132, %c0_133], %218 {strides = array<i32>} : memref<216x512xf32, #tpu.memory_space<vmem>>, vector<8x512xf32>,
    %c7_i32_134 = arith.constant 7 : i32
    %220 = tpu.dynamic_rotate %164 by %c7_i32_134 dim 1 : vector<8x512xf32>, i32 -> vector<8x512xf32>
    %c11_135 = arith.constant 11 : index
    %c0_136 = arith.constant 0 : index
    %221 = vector.load %arg2[%c11_135, %c0_136] : memref<27x512xf32, #tpu.memory_space<vmem>>, vector<1x512xf32>
    %222 = vector.broadcast %221 : vector<1x512xf32> to vector<8x512xf32>
    %223 = arith.mulf %220, %222 : vector<8x512xf32>
    %c88_137 = arith.constant 88 : index
    %c0_138 = arith.constant 0 : index
    %224 = vector.load %arg11[%c88_137, %c0_138] : memref<216x512xf32, #tpu.memory_space<vmem>>, vector<8x512xf32>
    tpu.vector_store %arg11[%c88_137, %c0_138], %223 {strides = array<i32>} : memref<216x512xf32, #tpu.memory_space<vmem>>, vector<8x512xf32>,
    %c1_i32_139 = arith.constant 1 : i32
    %225 = tpu.dynamic_rotate %164 by %c1_i32_139 dim 1 : vector<8x512xf32>, i32 -> vector<8x512xf32>
    %c12_140 = arith.constant 12 : index
    %c0_141 = arith.constant 0 : index
    %226 = vector.load %arg2[%c12_140, %c0_141] : memref<27x512xf32, #tpu.memory_space<vmem>>, vector<1x512xf32>
    %227 = vector.broadcast %226 : vector<1x512xf32> to vector<8x512xf32>
    %228 = arith.mulf %225, %227 : vector<8x512xf32>
    %c96_142 = arith.constant 96 : index
    %c0_143 = arith.constant 0 : index
    %229 = vector.load %arg11[%c96_142, %c0_143] : memref<216x512xf32, #tpu.memory_space<vmem>>, vector<8x512xf32>
    tpu.vector_store %arg11[%c96_142, %c0_143], %228 {strides = array<i32>} : memref<216x512xf32, #tpu.memory_space<vmem>>, vector<8x512xf32>,
    %c13_144 = arith.constant 13 : index
    %c0_145 = arith.constant 0 : index
    %230 = vector.load %arg2[%c13_144, %c0_145] : memref<27x512xf32, #tpu.memory_space<vmem>>, vector<1x512xf32>
    %231 = vector.broadcast %230 : vector<1x512xf32> to vector<8x512xf32>
    %232 = arith.mulf %164, %231 : vector<8x512xf32>
    %c104_146 = arith.constant 104 : index
    %c0_147 = arith.constant 0 : index
    %233 = vector.load %arg11[%c104_146, %c0_147] : memref<216x512xf32, #tpu.memory_space<vmem>>, vector<8x512xf32>
    tpu.vector_store %arg11[%c104_146, %c0_147], %232 {strides = array<i32>} : memref<216x512xf32, #tpu.memory_space<vmem>>, vector<8x512xf32>,
    %c511_i32_148 = arith.constant 511 : i32
    %234 = tpu.dynamic_rotate %164 by %c511_i32_148 dim 1 : vector<8x512xf32>, i32 -> vector<8x512xf32>
    %c14_149 = arith.constant 14 : index
    %c0_150 = arith.constant 0 : index
    %235 = vector.load %arg2[%c14_149, %c0_150] : memref<27x512xf32, #tpu.memory_space<vmem>>, vector<1x512xf32>
    %236 = vector.broadcast %235 : vector<1x512xf32> to vector<8x512xf32>
    %237 = arith.mulf %234, %236 : vector<8x512xf32>
    %c112 = arith.constant 112 : index
    %c0_151 = arith.constant 0 : index
    %238 = vector.load %arg11[%c112, %c0_151] : memref<216x512xf32, #tpu.memory_space<vmem>>, vector<8x512xf32>
    tpu.vector_store %arg11[%c112, %c0_151], %237 {strides = array<i32>} : memref<216x512xf32, #tpu.memory_space<vmem>>, vector<8x512xf32>,
    %c505_i32_152 = arith.constant 505 : i32
    %239 = tpu.dynamic_rotate %164 by %c505_i32_152 dim 1 : vector<8x512xf32>, i32 -> vector<8x512xf32>
    %c15_153 = arith.constant 15 : index
    %c0_154 = arith.constant 0 : index
    %240 = vector.load %arg2[%c15_153, %c0_154] : memref<27x512xf32, #tpu.memory_space<vmem>>, vector<1x512xf32>
    %241 = vector.broadcast %240 : vector<1x512xf32> to vector<8x512xf32>
    %242 = arith.mulf %239, %241 : vector<8x512xf32>
    %c120 = arith.constant 120 : index
    %c0_155 = arith.constant 0 : index
    %243 = vector.load %arg11[%c120, %c0_155] : memref<216x512xf32, #tpu.memory_space<vmem>>, vector<8x512xf32>
    tpu.vector_store %arg11[%c120, %c0_155], %242 {strides = array<i32>} : memref<216x512xf32, #tpu.memory_space<vmem>>, vector<8x512xf32>,
    %c504_i32_156 = arith.constant 504 : i32
    %244 = tpu.dynamic_rotate %164 by %c504_i32_156 dim 1 : vector<8x512xf32>, i32 -> vector<8x512xf32>
    %c16_157 = arith.constant 16 : index
    %c0_158 = arith.constant 0 : index
    %245 = vector.load %arg2[%c16_157, %c0_158] : memref<27x512xf32, #tpu.memory_space<vmem>>, vector<1x512xf32>
    %246 = vector.broadcast %245 : vector<1x512xf32> to vector<8x512xf32>
    %247 = arith.mulf %244, %246 : vector<8x512xf32>
    %c128 = arith.constant 128 : index
    %c0_159 = arith.constant 0 : index
    %248 = vector.load %arg11[%c128, %c0_159] : memref<216x512xf32, #tpu.memory_space<vmem>>, vector<8x512xf32>
    tpu.vector_store %arg11[%c128, %c0_159], %247 {strides = array<i32>} : memref<216x512xf32, #tpu.memory_space<vmem>>, vector<8x512xf32>,
    %c503_i32_160 = arith.constant 503 : i32
    %249 = tpu.dynamic_rotate %164 by %c503_i32_160 dim 1 : vector<8x512xf32>, i32 -> vector<8x512xf32>
    %c17_161 = arith.constant 17 : index
    %c0_162 = arith.constant 0 : index
    %250 = vector.load %arg2[%c17_161, %c0_162] : memref<27x512xf32, #tpu.memory_space<vmem>>, vector<1x512xf32>
    %251 = vector.broadcast %250 : vector<1x512xf32> to vector<8x512xf32>
    %252 = arith.mulf %249, %251 : vector<8x512xf32>
    %c136 = arith.constant 136 : index
    %c0_163 = arith.constant 0 : index
    %253 = vector.load %arg11[%c136, %c0_163] : memref<216x512xf32, #tpu.memory_space<vmem>>, vector<8x512xf32>
    tpu.vector_store %arg11[%c136, %c0_163], %252 {strides = array<i32>} : memref<216x512xf32, #tpu.memory_space<vmem>>, vector<8x512xf32>,
    %c457_i32_164 = arith.constant 457 : i32
    %254 = tpu.dynamic_rotate %164 by %c457_i32_164 dim 1 : vector<8x512xf32>, i32 -> vector<8x512xf32>
    %c18_165 = arith.constant 18 : index
    %c0_166 = arith.constant 0 : index
    %255 = vector.load %arg2[%c18_165, %c0_166] : memref<27x512xf32, #tpu.memory_space<vmem>>, vector<1x512xf32>
    %256 = vector.broadcast %255 : vector<1x512xf32> to vector<8x512xf32>
    %257 = arith.mulf %254, %256 : vector<8x512xf32>
    %c144 = arith.constant 144 : index
    %c0_167 = arith.constant 0 : index
    %258 = vector.load %arg11[%c144, %c0_167] : memref<216x512xf32, #tpu.memory_space<vmem>>, vector<8x512xf32>
    tpu.vector_store %arg11[%c144, %c0_167], %257 {strides = array<i32>} : memref<216x512xf32, #tpu.memory_space<vmem>>, vector<8x512xf32>,
    %c456_i32_168 = arith.constant 456 : i32
    %259 = tpu.dynamic_rotate %164 by %c456_i32_168 dim 1 : vector<8x512xf32>, i32 -> vector<8x512xf32>
    %c19_169 = arith.constant 19 : index
    %c0_170 = arith.constant 0 : index
    %260 = vector.load %arg2[%c19_169, %c0_170] : memref<27x512xf32, #tpu.memory_space<vmem>>, vector<1x512xf32>
    %261 = vector.broadcast %260 : vector<1x512xf32> to vector<8x512xf32>
    %262 = arith.mulf %259, %261 : vector<8x512xf32>
    %c152 = arith.constant 152 : index
    %c0_171 = arith.constant 0 : index
    %263 = vector.load %arg11[%c152, %c0_171] : memref<216x512xf32, #tpu.memory_space<vmem>>, vector<8x512xf32>
    tpu.vector_store %arg11[%c152, %c0_171], %262 {strides = array<i32>} : memref<216x512xf32, #tpu.memory_space<vmem>>, vector<8x512xf32>,
    %c455_i32_172 = arith.constant 455 : i32
    %264 = tpu.dynamic_rotate %164 by %c455_i32_172 dim 1 : vector<8x512xf32>, i32 -> vector<8x512xf32>
    %c20_173 = arith.constant 20 : index
    %c0_174 = arith.constant 0 : index
    %265 = vector.load %arg2[%c20_173, %c0_174] : memref<27x512xf32, #tpu.memory_space<vmem>>, vector<1x512xf32>
    %266 = vector.broadcast %265 : vector<1x512xf32> to vector<8x512xf32>
    %267 = arith.mulf %264, %266 : vector<8x512xf32>
    %c160 = arith.constant 160 : index
    %c0_175 = arith.constant 0 : index
    %268 = vector.load %arg11[%c160, %c0_175] : memref<216x512xf32, #tpu.memory_space<vmem>>, vector<8x512xf32>
    tpu.vector_store %arg11[%c160, %c0_175], %267 {strides = array<i32>} : memref<216x512xf32, #tpu.memory_space<vmem>>, vector<8x512xf32>,
    %c449_i32_176 = arith.constant 449 : i32
    %269 = tpu.dynamic_rotate %164 by %c449_i32_176 dim 1 : vector<8x512xf32>, i32 -> vector<8x512xf32>
    %c21_177 = arith.constant 21 : index
    %c0_178 = arith.constant 0 : index
    %270 = vector.load %arg2[%c21_177, %c0_178] : memref<27x512xf32, #tpu.memory_space<vmem>>, vector<1x512xf32>
    %271 = vector.broadcast %270 : vector<1x512xf32> to vector<8x512xf32>
    %272 = arith.mulf %269, %271 : vector<8x512xf32>
    %c168 = arith.constant 168 : index
    %c0_179 = arith.constant 0 : index
    %273 = vector.load %arg11[%c168, %c0_179] : memref<216x512xf32, #tpu.memory_space<vmem>>, vector<8x512xf32>
    tpu.vector_store %arg11[%c168, %c0_179], %272 {strides = array<i32>} : memref<216x512xf32, #tpu.memory_space<vmem>>, vector<8x512xf32>,
    %c448_i32_180 = arith.constant 448 : i32
    %274 = tpu.dynamic_rotate %164 by %c448_i32_180 dim 1 : vector<8x512xf32>, i32 -> vector<8x512xf32>
    %c22_181 = arith.constant 22 : index
    %c0_182 = arith.constant 0 : index
    %275 = vector.load %arg2[%c22_181, %c0_182] : memref<27x512xf32, #tpu.memory_space<vmem>>, vector<1x512xf32>
    %276 = vector.broadcast %275 : vector<1x512xf32> to vector<8x512xf32>
    %277 = arith.mulf %274, %276 : vector<8x512xf32>
    %c176 = arith.constant 176 : index
    %c0_183 = arith.constant 0 : index
    %278 = vector.load %arg11[%c176, %c0_183] : memref<216x512xf32, #tpu.memory_space<vmem>>, vector<8x512xf32>
    tpu.vector_store %arg11[%c176, %c0_183], %277 {strides = array<i32>} : memref<216x512xf32, #tpu.memory_space<vmem>>, vector<8x512xf32>,
    %c447_i32_184 = arith.constant 447 : i32
    %279 = tpu.dynamic_rotate %164 by %c447_i32_184 dim 1 : vector<8x512xf32>, i32 -> vector<8x512xf32>
    %c23_185 = arith.constant 23 : index
    %c0_186 = arith.constant 0 : index
    %280 = vector.load %arg2[%c23_185, %c0_186] : memref<27x512xf32, #tpu.memory_space<vmem>>, vector<1x512xf32>
    %281 = vector.broadcast %280 : vector<1x512xf32> to vector<8x512xf32>
    %282 = arith.mulf %279, %281 : vector<8x512xf32>
    %c184 = arith.constant 184 : index
    %c0_187 = arith.constant 0 : index
    %283 = vector.load %arg11[%c184, %c0_187] : memref<216x512xf32, #tpu.memory_space<vmem>>, vector<8x512xf32>
    tpu.vector_store %arg11[%c184, %c0_187], %282 {strides = array<i32>} : memref<216x512xf32, #tpu.memory_space<vmem>>, vector<8x512xf32>,
    %c441_i32_188 = arith.constant 441 : i32
    %284 = tpu.dynamic_rotate %164 by %c441_i32_188 dim 1 : vector<8x512xf32>, i32 -> vector<8x512xf32>
    %c24_189 = arith.constant 24 : index
    %c0_190 = arith.constant 0 : index
    %285 = vector.load %arg2[%c24_189, %c0_190] : memref<27x512xf32, #tpu.memory_space<vmem>>, vector<1x512xf32>
    %286 = vector.broadcast %285 : vector<1x512xf32> to vector<8x512xf32>
    %287 = arith.mulf %284, %286 : vector<8x512xf32>
    %c192 = arith.constant 192 : index
    %c0_191 = arith.constant 0 : index
    %288 = vector.load %arg11[%c192, %c0_191] : memref<216x512xf32, #tpu.memory_space<vmem>>, vector<8x512xf32>
    tpu.vector_store %arg11[%c192, %c0_191], %287 {strides = array<i32>} : memref<216x512xf32, #tpu.memory_space<vmem>>, vector<8x512xf32>,
    %c440_i32_192 = arith.constant 440 : i32
    %289 = tpu.dynamic_rotate %164 by %c440_i32_192 dim 1 : vector<8x512xf32>, i32 -> vector<8x512xf32>
    %c25_193 = arith.constant 25 : index
    %c0_194 = arith.constant 0 : index
    %290 = vector.load %arg2[%c25_193, %c0_194] : memref<27x512xf32, #tpu.memory_space<vmem>>, vector<1x512xf32>
    %291 = vector.broadcast %290 : vector<1x512xf32> to vector<8x512xf32>
    %292 = arith.mulf %289, %291 : vector<8x512xf32>
    %c200 = arith.constant 200 : index
    %c0_195 = arith.constant 0 : index
    %293 = vector.load %arg11[%c200, %c0_195] : memref<216x512xf32, #tpu.memory_space<vmem>>, vector<8x512xf32>
    tpu.vector_store %arg11[%c200, %c0_195], %292 {strides = array<i32>} : memref<216x512xf32, #tpu.memory_space<vmem>>, vector<8x512xf32>,
    %c439_i32_196 = arith.constant 439 : i32
    %294 = tpu.dynamic_rotate %164 by %c439_i32_196 dim 1 : vector<8x512xf32>, i32 -> vector<8x512xf32>
    %c26_197 = arith.constant 26 : index
    %c0_198 = arith.constant 0 : index
    %295 = vector.load %arg2[%c26_197, %c0_198] : memref<27x512xf32, #tpu.memory_space<vmem>>, vector<1x512xf32>
    %296 = vector.broadcast %295 : vector<1x512xf32> to vector<8x512xf32>
    %297 = arith.mulf %294, %296 : vector<8x512xf32>
    %c208 = arith.constant 208 : index
    %c0_199 = arith.constant 0 : index
    %298 = vector.load %arg11[%c208, %c0_199] : memref<216x512xf32, #tpu.memory_space<vmem>>, vector<8x512xf32>
    tpu.vector_store %arg11[%c208, %c0_199], %297 {strides = array<i32>} : memref<216x512xf32, #tpu.memory_space<vmem>>, vector<8x512xf32>,
    %c0_200 = arith.constant 0 : index
    %c0_201 = arith.constant 0 : index
    %299 = vector.load %arg6[%c0_200, %c0_201] : memref<8x216xf32, #tpu.memory_space<vmem>>, vector<8x216xf32>
    %c0_202 = arith.constant 0 : index
    %c0_203 = arith.constant 0 : index
    %300 = vector.load %arg11[%c0_202, %c0_203] : memref<216x512xf32, #tpu.memory_space<vmem>>, vector<216x512xf32>
    %cst_204 = arith.constant dense<0.000000e+00> : vector<8x512xf32>
    %301 = tpu.matmul %299, %300, %cst_204 {dimension_numbers = #tpu.dot_dimension_numbers<[1], [0], [0], [1], [0, 0, 1, 1], [], []>} : vector<8x216xf32>, vector<216x512xf32>, vector<8x512xf32> -> vector<8x512xf32>
    %cst_205 = arith.constant dense<0.000000e+00> : vector<8xf32>
    %302 = vector.multi_reduction <add>, %301, %cst_205 [1] : vector<8x512xf32> to vector<8xf32>
    %303 = vector.shape_cast %302 : vector<8xf32> to vector<8x1xf32>
    %cst_206 = arith.constant 5.120000e+02 : f32
    %304 = vector.broadcast %cst_206 : f32 to vector<8x1xf32>
    %305 = arith.divf %303, %304 : vector<8x1xf32>
    %306 = vector.broadcast %305 : vector<8x1xf32> to vector<8x512xf32>
    %307 = arith.subf %301, %306 : vector<8x512xf32>
    %308 = arith.mulf %307, %307 : vector<8x512xf32>
    %cst_207 = arith.constant dense<0.000000e+00> : vector<8xf32>
    %309 = vector.multi_reduction <add>, %308, %cst_207 [1] : vector<8x512xf32> to vector<8xf32>
    %310 = vector.shape_cast %309 : vector<8xf32> to vector<8x1xf32>
    %cst_208 = arith.constant 5.120000e+02 : f32
    %311 = vector.broadcast %cst_208 : f32 to vector<8x1xf32>
    %312 = arith.divf %310, %311 : vector<8x1xf32>
    %c0_209 = arith.constant 0 : index
    %c0_210 = arith.constant 0 : index
    %313 = vector.load %arg7[%c0_209, %c0_210] : memref<8x1xf32, #tpu.memory_space<vmem>>, vector<8x1xf32>
    %cst_211 = arith.constant 9.99999974E-6 : f32
    %314 = vector.broadcast %cst_211 : f32 to vector<8x1xf32>
    %315 = arith.addf %312, %314 : vector<8x1xf32>
    %316 = math.rsqrt %315 : vector<8x1xf32>
    %317 = arith.mulf %313, %316 : vector<8x1xf32>
    %318 = vector.broadcast %317 : vector<8x1xf32> to vector<8x512xf32>
    %319 = arith.mulf %307, %318 : vector<8x512xf32>
    %c0_212 = arith.constant 0 : index
    %c0_213 = arith.constant 0 : index
    %320 = vector.load %arg8[%c0_212, %c0_213] : memref<8x1xf32, #tpu.memory_space<vmem>>, vector<8x1xf32>
    %321 = vector.broadcast %320 : vector<8x1xf32> to vector<8x512xf32>
    %322 = arith.addf %319, %321 : vector<8x512xf32>
    %cst_214 = arith.constant 0.000000e+00 : f32
    %323 = vector.broadcast %cst_214 : f32 to vector<8x512xf32>
    %324 = arith.cmpf oge, %322, %323 : vector<8x512xf32>
    %cst_215 = arith.constant 0.00999999977 : f32
    %325 = vector.broadcast %cst_215 : f32 to vector<8x512xf32>
    %326 = arith.mulf %325, %322 : vector<8x512xf32>
    %327 = arith.select %324, %322, %326 : vector<8x512xi1>, vector<8x512xf32>
    %c0_216 = arith.constant 0 : index
    %c0_217 = arith.constant 0 : index
    %c0_218 = arith.constant 0 : index
    %328 = vector.load %arg9[%c0_216, %c0_217, %c0_218] : memref<1x8x512xf32, #tpu.memory_space<vmem>>, vector<1x8x512xf32>
    %329 = vector.shape_cast %328 : vector<1x8x512xf32> to vector<8x512xf32>
    %330 = vector.shape_cast %327 : vector<8x512xf32> to vector<1x8x512xf32>
    tpu.vector_store %arg9[%c0_216, %c0_217, %c0_218], %330 {strides = array<i32>} : memref<1x8x512xf32, #tpu.memory_space<vmem>>, vector<1x8x512xf32>,
    return
  }
  func.func @transform_0(%arg0: i32) -> (i32, i32, i32) {
    %c0_i32 = arith.constant 0 : i32
    %c0_i32_0 = arith.constant 0 : i32
    %c0_i32_1 = arith.constant 0 : i32
    return %arg0, %c0_i32, %c0_i32_0 : i32, i32, i32
  }
  func.func @transform_1(%arg0: i32) -> (i32, i32) {
    %c0_i32 = arith.constant 0 : i32
    %c0_i32_0 = arith.constant 0 : i32
    %c0_i32_1 = arith.constant 0 : i32
    return %c0_i32, %c0_i32_0 : i32, i32
  }
  func.func @transform_2(%arg0: i32) -> (i32, i32) {
    %c0_i32 = arith.constant 0 : i32
    %c0_i32_0 = arith.constant 0 : i32
    %c0_i32_1 = arith.constant 0 : i32
    return %c0_i32, %c0_i32_0 : i32, i32
  }
  func.func @transform_3(%arg0: i32) -> (i32, i32) {
    %c0_i32 = arith.constant 0 : i32
    %c0_i32_0 = arith.constant 0 : i32
    %c0_i32_1 = arith.constant 0 : i32
    return %c0_i32, %c0_i32_0 : i32, i32
  }
  func.func @transform_4(%arg0: i32) -> (i32, i32) {
    %c0_i32 = arith.constant 0 : i32
    %c0_i32_0 = arith.constant 0 : i32
    %c0_i32_1 = arith.constant 0 : i32
    return %c0_i32, %c0_i32_0 : i32, i32
  }
  func.func @transform_5(%arg0: i32) -> (i32, i32) {
    %c0_i32 = arith.constant 0 : i32
    %c0_i32_0 = arith.constant 0 : i32
    %c0_i32_1 = arith.constant 0 : i32
    return %c0_i32, %c0_i32_0 : i32, i32
  }
  func.func @transform_6(%arg0: i32) -> (i32, i32) {
    %c0_i32 = arith.constant 0 : i32
    %c0_i32_0 = arith.constant 0 : i32
    %c0_i32_1 = arith.constant 0 : i32
    return %c0_i32, %c0_i32_0 : i32, i32
  }
  func.func @transform_7(%arg0: i32) -> (i32, i32) {
    %c0_i32 = arith.constant 0 : i32
    %c0_i32_0 = arith.constant 0 : i32
    %c0_i32_1 = arith.constant 0 : i32
    return %c0_i32, %c0_i32_0 : i32, i32
  }
  func.func @transform_8(%arg0: i32) -> (i32, i32, i32) {
    %c0_i32 = arith.constant 0 : i32
    %c0_i32_0 = arith.constant 0 : i32
    %c0_i32_1 = arith.constant 0 : i32
    return %arg0, %c0_i32, %c0_i32_0 : i32, i32, i32
  }
}

</mosaic_0001>

<bundles_post_ra>
// kernel: conv_block_3d_forward.1
= control target key start
LH: loop header
LB: loop body
LE: loop exit
PB: predicated region body
PF: predicated region fallthrough
CT: control target
= control target key end

     0   :  { %s3523_s27 = smov 0   ;;  %s5054_s0 = inlined_call_operand.vmem [shape: f32[2,4,512], index: 0, kind: input, shape index: {}]   ;;  %s5055_s1 = inlined_call_operand.vmem [shape: f32[27,512], index: 1, kind: input, shape index: {}]   ;;  %s5056_s2 = inlined_call_operand.vmem [shape: f32[8,108], index: 2, kind: input, shape index: {}]   ;;  %s5057_s3 = inlined_call_operand.vmem [shape: f32[8,1], index: 3, kind: input, shape index: {}]   ;;  %s5058_s4 = inlined_call_operand.vmem [shape: f32[8,1], index: 4, kind: input, shape index: {}]   ;;  %s5059_s5 = inlined_call_operand.vmem [shape: f32[8,216], index: 5, kind: input, shape index: {}]   ;;  %s5060_s6 = inlined_call_operand.vmem [shape: f32[8,1], index: 6, kind: input, shape index: {}]   ;;  %s5061_s7 = inlined_call_operand.vmem [shape: f32[8,1], index: 7, kind: input, shape index: {}]   ;;  %s5062_s8 = inlined_call_operand.vmem [shape: f32[2,8,512], index: 8, kind: output, shape index: {}]  }
   0x1 LB: > { %s3177_s28 = sadd.s32 4294967295, %s3456_s27   ;;  %p3181_p0 = scmp.ge.s32.totalorder %s3456_s27, 1  ;;  %s3456_s27 = sphi %s3523_s27, %s18_s27  }
   0x2   : > { %p262_p1 = scmp.lt.s32.totalorder %s3456_s27, 3 }
   0x4   : > { %p263_p2 = pnand %p3181_p0, %p262_p1 }
   0x6   : > { %266 = sbr.rel (%p263_p2) target bundleno = 1912 (0x778), region = 52 }
   0xd   : > { %p296_p3 = scmp.lt.s32.totalorder %s3177_s28, 1  ;;  %s3458_s11 = smov 65   ;;  %v322_v4 = vlaneseq  ;;  %v3198_v8 = vld [vmem:[%s5055_s1 + $0x25] ss:$8 sm:$0xf] }
   0xe   : > { %s3459_s12 = smov 72   ;;  %s3460_s13 = smov 73   ;;  %v3683_v21 = vld [vmem:[%s5055_s1 + $0x3] ss:$8 sm:$0xf] }
   0xf   : > { %s5138_s28 = smov (!%p296_p3, %s3177_s28), 1  ;;  %s3461_s14 = smov 71   ;;  %v332_v5 = vshrl.u32 %v322_v4, 7  ;;  %v3678_v20 = vand.u32 127, %v322_v4 }
  0x10   : > { %s3248_s29 = sshll.u32 %s5138_s28, 4  ;;  %s3462_s15 = smov 63   ;;  %v3692_v22 = vld [vmem:[%s5055_s1 + $0x45] ss:$8 sm:$0xf] }
  0x11   : > { %s300_s10 = scalar_lea.vmem %s5054_s0, %s3248_s29  ;;  %s3463_s16 = smov 56   ;;  %v3641_v6 = vsub.s32 0, %v332_v5  ;;  %v3643_v7 = vsub.s32 1, %v332_v5  ;;  %v3667_v14 = vsub.s32 3, %v332_v5  ;;  %v3669_v15 = vsub.s32 2, %v332_v5 }
  0x12   : > { %v3537_v0 = vld [vmem:[%s300_s10] sm:$0xff]  ;;  %v3547_v2 = vld [vmem:[%s300_s10 + $0x8] sm:$0xff]  ;;  %s3464_s17 = smov 64   ;;  %s3465_s18 = smov 57   ;;  %vm467_vm0 = vcmp.lt.s32.totalorder %v3678_v20, 65  ;;  %vm367_vm1 = vcmp.lt.s32.totalorder %v3678_v20, 72 }
  0x13   : > { %459 = vrot.lane.b32.xlu1 %v3537_v0, %s3458_s11  ;;  %359 = vrot.lane.b32.xlu0 %v3537_v0, %s3459_s12  ;;  %v3545_v1 = vcombine.high %v3537_v0, %v3537_v0  ;;  %v3555_v3 = vcombine.high %v3547_v2, %v3547_v2  ;;  %s3466_s19 = smov 9   ;;  %s5063_s20 = smov 7   ;;  %v965_v9 = vrot.slane %v3198_v8, %v3641_v6  ;;  %v3697_v23 = vld [vmem:[%s5055_s1 + $0x1] ss:$8 sm:$0xf]  ;;  %vm324_vm2 = vcmp.lt.s32.totalorder %v3678_v20, 73 }
  0x14   : > { %s3468_s21 = smov 55   ;;  %s3469_s22 = smov 8   ;;  %v969_v10 = vrot.slane %v3198_v8, %v3643_v7  ;;  %v973_v16 = vrot.slane %v3198_v8, %v3669_v15  ;;  %v977_v17 = vrot.slane %v3198_v8, %v3667_v14  ;;  %v3702_v25 = vld [vmem:[%s5055_s1 + $0x43] ss:$8 sm:$0xf]  ;;  %v482_v28 = vrot.slane %v3683_v21, %v3643_v7 }
  0x15   : > { %s3470_s25 = smov 121   ;;  %s3471_s26 = smov 1   ;;  %v1305_v29 = vrot.slane %v3692_v22, %v3641_v6  ;;  %v382_v30 = vrot.slane %v3697_v23, %v3643_v7  ;;  %v1231_v31 = vrot.slane %v3702_v25, %v3641_v6  ;;  %v478_v34 = vrot.slane %v3683_v21, %v3641_v6  ;;  %v3741_v44 = vld [vmem:[%s5055_s1] ss:$8 sm:$0xf] }
  0x16   : > { %v978_v11 = vcombine.low %v965_v9, %v969_v10  ;;  %s3472_s29 = smov 127   ;;  %v979_v18 = vcombine.low %v973_v16, %v977_v17  ;;  %s3473_s10 = smov 119   ;;  %v1317_v35 = vrot.slane %v3692_v22, %v3667_v14  ;;  %v378_v38 = vrot.slane %v3697_v23, %v3641_v6  ;;  %v3746_v45 = vld [vmem:[%s5055_s1 + $0x42] ss:$8 sm:$0xf] }
  0x17   : > { %461 = vrot.lane.b32.xlu1 %v3545_v1, %s3458_s11  ;;  %361 = vrot.lane.b32.xlu0 %v3545_v1, %s3459_s12  ;;  %v1243_v39 = vrot.slane %v3702_v25, %v3667_v14  ;;  %v338_v54 = vrot.slane %v3741_v44, %v3643_v7  ;;  %v1200_v55 = vrot.slane %v3746_v45, %v3641_v6  ;;  %s3474_s9 = smov 120   ;;  %v3769_v60 = vld [vmem:[%s5055_s1 + $0x2] ss:$8 sm:$0xf]  ;;  %vm423_vm3 = vcmp.lt.s32.totalorder %v3678_v20, 71 }
  0x18   : > { %v982_v12 = vmul.f32 %v978_v11, %v3537_v0  ;;  %v983_v19 = vmul.f32 %v979_v18, %v3547_v2  ;;  %v3774_v61 = vld [vmem:[%s5055_s1 + $0x44] ss:$8 sm:$0xf]  ;;  %vm567_vm4 = vcmp.lt.s32.totalorder %v3678_v20, 63  ;;  %vm667_vm5 = vcmp.lt.s32.totalorder %v3678_v20, 56 }
  0x19   : > { %vm523_vm6 = vcmp.lt.s32.totalorder %v3678_v20, 64  ;;  %vm623_vm7 = vcmp.lt.s32.totalorder %v3678_v20, 57  ;;  %vm767_vm8 = vcmp.lt.s32.totalorder %v3678_v20, 9  ;;  %vm867_vm9 = vcmp.lt.s32.totalorder %v3678_v20, 7 }
  0x1a   : > { %991 = vst [vmem:[#allocation2 + $0xc8] sm:$0xf0] %v982_v12  ;;  %v986_v13 = vcombine.low %v982_v12, %v982_v12  ;;  %993 = vst [vmem:[#allocation2 + $0xd8] sm:$0xf0] %v983_v19  ;;  %v987_v24 = vcombine.low %v983_v19, %v983_v19  ;;  %v438_v12 = vrot.slane %v3769_v60, %v3643_v7  ;;  %vm723_vm10 = vcmp.lt.s32.totalorder %v3678_v20, 55 }
  0x1b   : > { %465 = vrot.lane.b32.xlu1 %v3555_v3, %s3458_s11  ;;  %365 = vrot.lane.b32.xlu0 %v3555_v3, %s3459_s12  ;;  %v1235_v19 = vrot.slane %v3702_v25, %v3643_v7  ;;  %vm823_vm11 = vcmp.lt.s32.totalorder %v3678_v20, 8  ;;  %vm5065_vm12 = vcmp.lt.s32.totalorder %v3678_v20, 121  ;;  %vm923_vm13 = vcmp.lt.s32.totalorder %v3678_v20, 1 }
  0x1c   : > { %990 = vst [vmem:[#allocation2 + $0xc0] sm:$0xf0] %v986_v13  ;;  %992 = vst [vmem:[#allocation2 + $0xd0] sm:$0xf0] %v987_v24  ;;  %v1274_v13 = vrot.slane %v3774_v61, %v3641_v6  ;;  %vm5068_vm14 = vcmp.lt.s32.totalorder %v3678_v20, 127  ;;  %vm5067_vm15 = vcmp.lt.s32.totalorder %v3678_v20, 119 }
  0x1f   : > { %316 = vrot.lane.b32.xlu1 %v3545_v1, %s3460_s13  ;;  %314 = vrot.lane.b32.xlu0 %v3537_v0, %s3460_s13 }
  0x23   : > { %417 = vrot.lane.b32.xlu1 %v3545_v1, %s3461_s14  ;;  %415 = vrot.lane.b32.xlu0 %v3537_v0, %s3461_s14 }
  0x27   : > { %363 = vrot.lane.b32.xlu1 %v3547_v2, %s3459_s12  ;;  %320 = vrot.lane.b32.xlu0 %v3555_v3, %s3460_s13 }
  0x2b   : > { %463 = vrot.lane.b32.xlu1 %v3547_v2, %s3458_s11  ;;  %421 = vrot.lane.b32.xlu0 %v3555_v3, %s3461_s14 }
  0x2f   : > { %561 = vrot.lane.b32.xlu1 %v3545_v1, %s3462_s15  ;;  %559 = vrot.lane.b32.xlu0 %v3537_v0, %s3462_s15 }
  0x33   : > { %661 = vrot.lane.b32.xlu1 %v3545_v1, %s3463_s16  ;;  %659 = vrot.lane.b32.xlu0 %v3537_v0, %s3463_s16 }
  0x37   : > { %419 = vrot.lane.b32.xlu1 %v3547_v2, %s3461_s14  ;;  %318 = vrot.lane.b32.xlu0 %v3547_v2, %s3460_s13 }
  0x3b   : > { %665 = vrot.lane.b32.xlu1 %v3555_v3, %s3463_s16  ;;  %565 = vrot.lane.b32.xlu0 %v3555_v3, %s3462_s15 }
  0x3f   : > { %517 = vrot.lane.b32.xlu1 %v3545_v1, %s3464_s17  ;;  %515 = vrot.lane.b32.xlu0 %v3537_v0, %s3464_s17 }
  0x43   : > { %617 = vrot.lane.b32.xlu1 %v3545_v1, %s3465_s18  ;;  %615 = vrot.lane.b32.xlu0 %v3537_v0, %s3465_s18 }
  0x47   : > { %563 = vrot.lane.b32.xlu1 %v3547_v2, %s3462_s15  ;;  %521 = vrot.lane.b32.xlu0 %v3555_v3, %s3464_s17 }
  0x4b   : > { %663 = vrot.lane.b32.xlu1 %v3547_v2, %s3463_s16  ;;  %621 = vrot.lane.b32.xlu0 %v3555_v3, %s3465_s18 }
  0x4f   : > { %761 = vrot.lane.b32.xlu1 %v3545_v1, %s3466_s19  ;;  %759 = vrot.lane.b32.xlu0 %v3537_v0, %s3466_s19 }
  0x53   : > { %861 = vrot.lane.b32.xlu1 %v3545_v1, %s5063_s20  ;;  %859 = vrot.lane.b32.xlu0 %v3537_v0, %s5063_s20 }
  0x57   : > { %619 = vrot.lane.b32.xlu1 %v3547_v2, %s3465_s18  ;;  %519 = vrot.lane.b32.xlu0 %v3547_v2, %s3464_s17 }
  0x5b   : > { %865 = vrot.lane.b32.xlu1 %v3555_v3, %s5063_s20  ;;  %765 = vrot.lane.b32.xlu0 %v3555_v3, %s3466_s19 }
  0x5f   : > { %717 = vrot.lane.b32.xlu1 %v3545_v1, %s3468_s21  ;;  %715 = vrot.lane.b32.xlu0 %v3537_v0, %s3468_s21 }
  0x63   : > { %817 = vrot.lane.b32.xlu1 %v3545_v1, %s3469_s22  ;;  %815 = vrot.lane.b32.xlu0 %v3537_v0, %s3469_s22 }
  0x67   : > { %763 = vrot.lane.b32.xlu1 %v3547_v2, %s3466_s19  ;;  %721 = vrot.lane.b32.xlu0 %v3555_v3, %s3468_s21 }
  0x6b   : > { %863 = vrot.lane.b32.xlu1 %v3547_v2, %s5063_s20  ;;  %821 = vrot.lane.b32.xlu0 %v3555_v3, %s3469_s22 }
  0x6f   : > { %1042 = vrot.lane.b32.xlu1 %v3547_v2, %s3470_s25  ;;  %1040 = vrot.lane.b32.xlu0 %v3545_v1, %s3470_s25 }
  0x73   : > { %819 = vrot.lane.b32.xlu1 %v3547_v2, %s3469_s22  ;;  %719 = vrot.lane.b32.xlu0 %v3547_v2, %s3468_s21 }
  0x77   : > { %915 = vrot.lane.b32.xlu1 %v3537_v0, %s3471_s26  ;;  %1038 = vrot.lane.b32.xlu0 %v3537_v0, %s3470_s25 }
  0x7b   : > { %996 = vrot.lane.b32.xlu1 %v3545_v1, %s3472_s29  ;;  %917 = vrot.lane.b32.xlu0 %v3545_v1, %s3471_s26 }
  0x7f   : > { %921 = vrot.lane.b32.xlu1 %v3555_v3, %s3471_s26  ;;  %998 = vrot.lane.b32.xlu0 %v3547_v2, %s3472_s29 }
  0x83   : > { %1044 = vrot.lane.b32.xlu1 %v3555_v3, %s3470_s25  ;;  %994 = vrot.lane.b32.xlu0 %v3537_v0, %s3472_s29 }
  0x85   : > { %v460_v26 = vpop.permute.xlu1 %459  ;;  %v360_v27 = vpop.permute.xlu0 %359 }
  0x87   : > { %1142 = vrot.lane.b32.xlu1 %v3547_v2, %s3473_s10  ;;  %1140 = vrot.lane.b32.xlu0 %v3545_v1, %s3473_s10 }
  0x89   : > { %v3718_v32 = vpop.permute.xlu1 %461  ;;  %v3720_v33 = vpop.permute.xlu0 %361 }
  0x8a   : > { %v470_v36 = vsel %vm467_vm0, %v460_v26, %v3718_v32  ;;  %v370_v37 = vsel %vm367_vm1, %v360_v27, %v3720_v33 }
  0x8b   : > { %v496_v40 = vmul.f32 %v482_v28, %v470_v36  ;;  %v1322_v41 = vmul.f32 %v1305_v29, %v470_v36  ;;  %v396_v42 = vmul.f32 %v382_v30, %v370_v37  ;;  %v1248_v43 = vmul.f32 %v1231_v31, %v370_v37  ;;  %1000 = vrot.lane.b32.xlu1 %v3555_v3, %s3472_s29  ;;  %v3826_v36 = vld [vmem:[%s5055_s1 + $0x5] ss:$8 sm:$0xf] }
  0x8c   : > { %919 = vrot.lane.b32.xlu0 %v3547_v2, %s3471_s26  ;;  %v334_v28 = vrot.slane %v3741_v44, %v3641_v6  ;;  %v1212_v29 = vrot.slane %v3746_v45, %v3667_v14  ;;  %v486_v30 = vrot.slane %v3683_v21, %v3669_v15 }
  0x8d   : > { %v504_v46 = vrot.slane %v496_v40, 4  ;;  %v1330_v47 = vrot.slane %v1322_v41, 4  ;;  %v404_v48 = vrot.slane %v396_v42, 4  ;;  %v1256_v49 = vrot.slane %v1248_v43, 4  ;;  %v3751_v50 = vpop.permute.xlu1 %465  ;;  %v366_v51 = vpop.permute.xlu0 %365 }
  0x8e   : > { %v471_v52 = vsel %vm467_vm0, %v3751_v50, %v460_v26  ;;  %v371_v53 = vsel %vm367_vm1, %v366_v51, %v360_v27  ;;  %v1239_v27 = vrot.slane %v3702_v25, %v3669_v15  ;;  %v1313_v25 = vrot.slane %v3692_v22, %v3669_v15  ;;  %v3841_v43 = vld [vmem:[%s5055_s1 + $0x47] ss:$8 sm:$0xf] }
  0x8f   : > { %512 = vst [vmem:[#allocation2 + $0x28] sm:$0xf0] %v504_v46  ;;  %1338 = vst [vmem:[#allocation2 + $0x140] sm:$0xf0] %v1330_v47  ;;  %v495_v56 = vmul.f32 %v478_v34, %v471_v52  ;;  %v1325_v57 = vmul.f32 %v1317_v35, %v471_v52  ;;  %v395_v58 = vmul.f32 %v378_v38, %v371_v53  ;;  %1096 = vrot.lane.b32.xlu1 %v3545_v1, %s3474_s9 }
  0x90   : > { %412 = vst [vmem:[#allocation2 + $0x8] sm:$0xf0] %v404_v48  ;;  %1264 = vst [vmem:[#allocation2 + $0x120] sm:$0xf0] %v1256_v49  ;;  %v1251_v59 = vmul.f32 %v1243_v39, %v371_v53  ;;  %1138 = vrot.lane.b32.xlu0 %v3537_v0, %s3473_s10  ;;  %v434_v35 = vrot.slane %v3769_v60, %v3641_v6 }
  0x91   : > { %v503_v62 = vrot.slane %v495_v56, 4  ;;  %v1333_v63 = vrot.slane %v1325_v57, 4  ;;  %v403_v4 = vrot.slane %v395_v58, 4  ;;  %v3776_v8 = vpop.permute.xlu1 %316  ;;  %v315_v1 = vpop.permute.xlu0 %314  ;;  %v1379_v58 = vrot.slane %v3841_v43, %v3641_v6 }
  0x92   : > { %v1259_v5 = vrot.slane %v1251_v59, 4  ;;  %v327_v9 = vsel %vm324_vm2, %v315_v1, %v3776_v8 }
  0x93   : > { %511 = vst [vmem:[#allocation2 + $0x20] sm:$0xf0] %v503_v62  ;;  %1341 = vst [vmem:[#allocation2 + $0x158] sm:$0xf0] %v1333_v63  ;;  %v352_v10 = vmul.f32 %v338_v54, %v327_v9  ;;  %v1217_v11 = vmul.f32 %v1200_v55, %v327_v9  ;;  %1094 = vrot.lane.b32.xlu1 %v3537_v0, %s3474_s9  ;;  %v390_v0 = vrot.slane %v3697_v23, %v3667_v14 }
  0x94   : > { %411 = vst [vmem:[#allocation2] sm:$0xf0] %v403_v4  ;;  %1267 = vst [vmem:[#allocation2 + $0x138] sm:$0xf0] %v1259_v5  ;;  %1098 = vrot.lane.b32.xlu0 %v3547_v2, %s3474_s9  ;;  %v386_v2 = vrot.slane %v3697_v23, %v3669_v15  ;;  %v490_v23 = vrot.slane %v3683_v21, %v3667_v14 }
  0x95   : > { %356 = vst [vmem:[#allocation2 + $0x8] sm:$0xf] %v352_v10  ;;  %1221 = vst [vmem:[#allocation2 + $0x120] sm:$0xf] %v1217_v11  ;;  %v3790_v16 = vpop.permute.xlu1 %417  ;;  %v416_v17 = vpop.permute.xlu0 %415 }
  0x96   : > { %v426_v18 = vsel %vm423_vm3, %v416_v17, %v3790_v16  ;;  %v3867_v9 = vld [vmem:[%s5055_s1 + $0x61] ss:$8 sm:$0xf] }
  0x97   : > { %v452_v24 = vmul.f32 %v438_v12, %v426_v18  ;;  %v1291_v26 = vmul.f32 %v1274_v13, %v426_v18  ;;  %1100 = vrot.lane.b32.xlu1 %v3555_v3, %s3474_s9 }
  0x98   : > { %1144 = vrot.lane.b32.xlu0 %v3555_v3, %s3473_s10  ;;  %v1309_v3 = vrot.slane %v3692_v22, %v3643_v7  ;;  %v1286_v22 = vrot.slane %v3774_v61, %v3667_v14 }
  0x99   : > { %456 = vst [vmem:[#allocation2 + $0x28] sm:$0xf] %v452_v24  ;;  %1295 = vst [vmem:[#allocation2 + $0x140] sm:$0xf] %v1291_v26  ;;  %v364_v31 = vpop.permute.xlu1 %363  ;;  %v3813_v34 = vpop.permute.xlu0 %320 }
  0x9a   : > { %v368_v37 = vsel %vm367_vm1, %v364_v31, %v366_v51  ;;  %v369_v21 = vsel %vm367_vm1, %v3720_v33, %v364_v31  ;;  %v328_v38 = vsel %vm324_vm2, %v3813_v34, %v315_v1  ;;  %v582_v33 = vrot.slane %v3826_v36, %v3643_v7 }
  0x9b   : > { %v397_v39 = vmul.f32 %v386_v2, %v369_v21  ;;  %v398_v40 = vmul.f32 %v390_v0, %v368_v37  ;;  %v1249_v41 = vmul.f32 %v1235_v19, %v369_v21  ;;  %v1250_v42 = vmul.f32 %v1239_v27, %v368_v37 }
  0x9c   : > { %v351_v46 = vmul.f32 %v334_v28, %v328_v38  ;;  %v1220_v47 = vmul.f32 %v1212_v29, %v328_v38  ;;  %v1523_v0 = vld [vmem:[#allocation2 + $0x8] sm:$0xff]  ;;  %v3475_v19 = vmov 0.0   ;;  %v1453_v29 = vrot.slane %v3867_v9, %v3641_v6 }
  0x9d   : > { %v405_v48 = vrot.slane %v397_v39, 4  ;;  %v406_v49 = vrot.slane %v398_v40, 4  ;;  %v1257_v51 = vrot.slane %v1249_v41, 4  ;;  %v1258_v52 = vrot.slane %v1250_v42, 4  ;;  %v464_v53 = vpop.permute.xlu1 %463  ;;  %v3846_v54 = vpop.permute.xlu0 %421  ;;  %1659 = vmatprep.mubr.f32.mxu0 %v3475_v19  ;;  %1730 = vmatprep.mubr.f32.mxu1 %v3475_v19 }
  0x9e   : > { %355 = vst [vmem:[#allocation2] sm:$0xf] %v351_v46  ;;  %1224 = vst [vmem:[#allocation2 + $0x138] sm:$0xf] %v1220_v47  ;;  %v468_v55 = vsel %vm467_vm0, %v464_v53, %v3751_v50  ;;  %v469_v56 = vsel %vm467_vm0, %v3718_v32, %v464_v53  ;;  %v427_v57 = vsel %vm423_vm3, %v3846_v54, %v416_v17 }
  0x9f   : > { %413 = vst [vmem:[#allocation2 + $0x10] sm:$0xf0] %v405_v48  ;;  %414 = vst [vmem:[#allocation2 + $0x18] sm:$0xf0] %v406_v49  ;;  %v497_v59 = vmul.f32 %v486_v30, %v469_v56  ;;  %v498_v62 = vmul.f32 %v490_v23, %v468_v55  ;;  %v1323_v63 = vmul.f32 %v1309_v3, %v469_v56 }
  0xa0   : > { %1265 = vst [vmem:[#allocation2 + $0x128] sm:$0xf0] %v1257_v51  ;;  %1266 = vst [vmem:[#allocation2 + $0x130] sm:$0xf0] %v1258_v52  ;;  %v1324_v4 = vmul.f32 %v1313_v25, %v468_v55  ;;  %v451_v32 = vmul.f32 %v434_v35, %v427_v57  ;;  %v1294_v5 = vmul.f32 %v1286_v22, %v427_v57  ;;  %v1527_v1 = vld [vmem:[#allocation2 + $0x28] sm:$0xff] }
  0xa1   : > { %v3862_v50 = vld [vmem:[%s5055_s1 + $0x7] ss:$8 sm:$0xf]  ;;  %v505_v10 = vrot.slane %v497_v59, 4  ;;  %v506_v11 = vrot.slane %v498_v62, 4  ;;  %v1331_v12 = vrot.slane %v1323_v63, 4  ;;  %v3869_v17 = vpop.permute.xlu1 %561  ;;  %v3871_v18 = vpop.permute.xlu0 %559  ;;  %v3250_v26 = vpack.c.bf16 %v1527_v1, %v1523_v0 }
  0xa2   : > { %v1332_v13 = vrot.slane %v1324_v4, 4  ;;  %455 = vst [vmem:[#allocation2 + $0x20] sm:$0xf] %v451_v32  ;;  %1298 = vst [vmem:[#allocation2 + $0x158] sm:$0xf] %v1294_v5  ;;  %v570_v24 = vsel %vm567_vm4, %v3871_v18, %v3869_v17  ;;  %v682_v28 = vrot.slane %v3862_v50, %v3643_v7  ;;  %v442_v25 = vrot.slane %v3769_v60, %v3669_v15 }
  0xa3   : > { %513 = vst [vmem:[#allocation2 + $0x30] sm:$0xf0] %v505_v10  ;;  %514 = vst [vmem:[#allocation2 + $0x38] sm:$0xf0] %v506_v11  ;;  %v596_v2 = vmul.f32 %v582_v33, %v570_v24  ;;  %v1396_v27 = vmul.f32 %v1379_v58, %v570_v24  ;;  %3251 = vmatprep.subr.bf16.mxu0 %v3250_v26  ;;  %v446_v37 = vrot.slane %v3769_v60, %v3667_v14 }
  0xa4   : > { %1339 = vst [vmem:[#allocation2 + $0x148] sm:$0xf0] %v1331_v12  ;;  %1340 = vst [vmem:[#allocation2 + $0x150] sm:$0xf0] %v1332_v13  ;;  %v1278_v21 = vrot.slane %v3774_v61, %v3643_v7  ;;  %v1282_v38 = vrot.slane %v3774_v61, %v3669_v15  ;;  %v342_v40 = vrot.slane %v3741_v44, %v3669_v15 }
  0xa5   : > { %v604_v30 = vrot.slane %v596_v2, 4  ;;  %v1404_v31 = vrot.slane %v1396_v27, 4  ;;  %v3882_v23 = vpop.permute.xlu1 %661  ;;  %v660_v3 = vpop.permute.xlu0 %659  ;;  %v346_v41 = vrot.slane %v3741_v44, %v3667_v14  ;;  %v1204_v42 = vrot.slane %v3746_v45, %v3643_v7  ;;  %v1522_v32 = vld [vmem:[#allocation2] sm:$0xff] }
  0xa6   : > { %v670_v35 = vsel %vm667_vm5, %v660_v3, %v3882_v23  ;;  %v1208_v60 = vrot.slane %v3746_v45, %v3669_v15  ;;  %v678_v46 = vrot.slane %v3862_v50, %v3641_v6  ;;  %v1465_v61 = vrot.slane %v3867_v9, %v3667_v14  ;;  %v3952_v27 = vld [vmem:[%s5055_s1 + $0x6] ss:$8 sm:$0xf] }
  0xa7   : > { %612 = vst [vmem:[#allocation2 + $0x48] sm:$0xf0] %v604_v30  ;;  %1412 = vst [vmem:[#allocation2 + $0x160] sm:$0xf0] %v1404_v31  ;;  %v696_v22 = vmul.f32 %v682_v28, %v670_v35  ;;  %v1470_v39 = vmul.f32 %v1453_v29, %v670_v35  ;;  %v578_v51 = vrot.slane %v3826_v36, %v3641_v6 }
  0xa8   : > { %v1391_v44 = vrot.slane %v3841_v43, %v3667_v14 }
  0xa9   : > { %v704_v47 = vrot.slane %v696_v22, 4  ;;  %v1478_v33 = vrot.slane %v1470_v39, 4  ;;  %v420_v48 = vpop.permute.xlu1 %419  ;;  %v319_v49 = vpop.permute.xlu0 %318  ;;  %v1526_v56 = vld [vmem:[#allocation2 + $0x20] sm:$0xff] }
  0xaa   : > { %v424_v45 = vsel %vm423_vm3, %v420_v48, %v3846_v54  ;;  %v425_v52 = vsel %vm423_vm3, %v3790_v16, %v420_v48  ;;  %v325_v53 = vsel %vm324_vm2, %v319_v49, %v3813_v34  ;;  %v326_v55 = vsel %vm324_vm2, %v3776_v8, %v319_v49  ;;  %v3926_v54 = vld [vmem:[%s5055_s1 + $0x4] ss:$8 sm:$0xf]  ;;  %v3931_v16 = vld [vmem:[%s5055_s1 + $0x46] ss:$8 sm:$0xf] }
  0xab   : > { %712 = vst [vmem:[#allocation2 + $0x68] sm:$0xf0] %v704_v47  ;;  %1486 = vst [vmem:[#allocation2 + $0x180] sm:$0xf0] %v1478_v33  ;;  %v453_v57 = vmul.f32 %v442_v25, %v425_v52  ;;  %v454_v58 = vmul.f32 %v446_v37, %v424_v45  ;;  %v1292_v59 = vmul.f32 %v1278_v21, %v425_v52 }
  0xac   : > { %v1293_v62 = vmul.f32 %v1282_v38, %v424_v45  ;;  %v353_v34 = vmul.f32 %v342_v40, %v326_v55  ;;  %v354_v63 = vmul.f32 %v346_v41, %v325_v53  ;;  %v1218_v8 = vmul.f32 %v1204_v42, %v326_v55 }
  0xad   : > { %v1219_v4 = vmul.f32 %v1208_v60, %v325_v53  ;;  %457 = vst [vmem:[#allocation2 + $0x30] sm:$0xf] %v453_v57  ;;  %458 = vst [vmem:[#allocation2 + $0x38] sm:$0xf] %v454_v58  ;;  %v3252_v5 = vpack.c.bf16 %v1526_v56, %v1522_v32  ;;  %v3933_v1 = vpop.permute.xlu1 %665  ;;  %v3935_v10 = vpop.permute.xlu0 %565  ;;  %v538_v13 = vrot.slane %v3926_v54, %v3643_v7 }
  0xae   : > { %1296 = vst [vmem:[#allocation2 + $0x148] sm:$0xf] %v1292_v59  ;;  %1297 = vst [vmem:[#allocation2 + $0x150] sm:$0xf] %v1293_v62  ;;  %v671_v11 = vsel %vm667_vm5, %v3933_v1, %v660_v3  ;;  %v571_v12 = vsel %vm567_vm4, %v3935_v10, %v3871_v18  ;;  %v1348_v0 = vrot.slane %v3931_v16, %v3641_v6 }
  0xaf   : > { %357 = vst [vmem:[#allocation2 + $0x10] sm:$0xf] %v353_v34  ;;  %358 = vst [vmem:[#allocation2 + $0x18] sm:$0xf] %v354_v63  ;;  %3253 = vmatpush1.bf16.msra.mxu0 %v3252_v5  ;;  %v695_v19 = vmul.f32 %v678_v46, %v671_v11  ;;  %v1473_v24 = vmul.f32 %v1465_v61, %v671_v11  ;;  %v595_v26 = vmul.f32 %v578_v51, %v571_v12 }
  0xb0   : > { %1222 = vst [vmem:[#allocation2 + $0x128] sm:$0xf] %v1218_v8  ;;  %1223 = vst [vmem:[#allocation2 + $0x130] sm:$0xf] %v1219_v4  ;;  %v1399_v2 = vmul.f32 %v1391_v44, %v571_v12  ;;  %v638_v38 = vrot.slane %v3952_v27, %v3643_v7  ;;  %v586_v61 = vrot.slane %v3826_v36, %v3669_v15 }
  0xb1   : > { %v3957_v18 = vld [vmem:[%s5055_s1 + $0x60] ss:$8 sm:$0xf]  ;;  %v703_v28 = vrot.slane %v695_v19, 4  ;;  %v1481_v29 = vrot.slane %v1473_v24, 4  ;;  %v603_v30 = vrot.slane %v595_v26, 4  ;;  %v3959_v3 = vpop.permute.xlu1 %517  ;;  %v516_v25 = vpop.permute.xlu0 %515  ;;  %v590_v49 = vrot.slane %v3826_v36, %v3667_v14 }
  0xb2   : > { %v1407_v31 = vrot.slane %v1399_v2, 4  ;;  %v526_v35 = vsel %vm523_vm6, %v516_v25, %v3959_v3  ;;  %v1422_v22 = vrot.slane %v3957_v18, %v3641_v6  ;;  %v1383_v45 = vrot.slane %v3841_v43, %v3643_v7 }
  0xb3   : > { %711 = vst [vmem:[#allocation2 + $0x60] sm:$0xf0] %v703_v28  ;;  %1489 = vst [vmem:[#allocation2 + $0x198] sm:$0xf0] %v1481_v29  ;;  %v552_v37 = vmul.f32 %v538_v13, %v526_v35  ;;  %v1365_v21 = vmul.f32 %v1348_v0, %v526_v35  ;;  %v1387_v52 = vrot.slane %v3841_v43, %v3669_v15 }
  0xb4   : > { %611 = vst [vmem:[#allocation2 + $0x40] sm:$0xf0] %v603_v30  ;;  %1415 = vst [vmem:[#allocation2 + $0x178] sm:$0xf0] %v1407_v31  ;;  %v1529_v39 = vld [vmem:[#allocation2 + $0x38] sm:$0xff]  ;;  %v1528_v40 = vld [vmem:[#allocation2 + $0x30] sm:$0xff]  ;;  %v534_v53 = vrot.slane %v3926_v54, %v3641_v6  ;;  %v1360_v55 = vrot.slane %v3931_v16, %v3667_v14  ;;  %v686_v57 = vrot.slane %v3862_v50, %v3669_v15 }
  0xb5   : > { %556 = vst [vmem:[#allocation2 + $0x48] sm:$0xf] %v552_v37  ;;  %1369 = vst [vmem:[#allocation2 + $0x160] sm:$0xf] %v1365_v21  ;;  %v3969_v41 = vpop.permute.xlu1 %617  ;;  %v616_v42 = vpop.permute.xlu0 %615  ;;  %v690_v58 = vrot.slane %v3862_v50, %v3667_v14  ;;  %v1457_v43 = vrot.slane %v3867_v9, %v3643_v7  ;;  %v1461_v59 = vrot.slane %v3867_v9, %v3669_v15 }
  0xb6   : > { %v1525_v60 = vld [vmem:[#allocation2 + $0x18] sm:$0xff]  ;;  %v1524_v46 = vld [vmem:[#allocation2 + $0x10] sm:$0xff]  ;;  %v626_v47 = vsel %vm623_vm7, %v616_v42, %v3969_v41  ;;  %v634_v50 = vrot.slane %v3952_v27, %v3641_v6 }
  0xb7   : > { %v3280_v33 = vpack.c.bf16 %v1529_v39, %v1525_v60  ;;  %v3282_v48 = vpack.c.bf16 %v1528_v40, %v1524_v46  ;;  %v652_v51 = vmul.f32 %v638_v38, %v626_v47  ;;  %v1439_v44 = vmul.f32 %v1422_v22, %v626_v47  ;;  %v4010_v9 = vld [vmem:[%s5055_s1 + $0x21] ss:$8 sm:$0xf] }
  0xb8   : > { %v782_v30 = vrot.slane %v4010_v9, %v3643_v7 }
  0xb9   : > { %3281 = vmatprep.subr.bf16.mxu1 %v3280_v33  ;;  %656 = vst [vmem:[#allocation2 + $0x68] sm:$0xf] %v652_v51  ;;  %1443 = vst [vmem:[#allocation2 + $0x180] sm:$0xf] %v1439_v44  ;;  %v564_v56 = vpop.permute.xlu1 %563  ;;  %v3986_v36 = vpop.permute.xlu0 %521 }
  0xba   : > { %3283 = vmatpush1.bf16.msra.mxu1 %v3282_v48  ;;  %v568_v62 = vsel %vm567_vm4, %v564_v56, %v3935_v10  ;;  %v569_v34 = vsel %vm567_vm4, %v3869_v17, %v564_v56  ;;  %v527_v63 = vsel %vm523_vm6, %v3986_v36, %v516_v25  ;;  %v1434_v17 = vrot.slane %v3957_v18, %v3667_v14 }
  0xbb   : > { %v597_v8 = vmul.f32 %v586_v61, %v569_v34  ;;  %v598_v4 = vmul.f32 %v590_v49, %v568_v62  ;;  %v1397_v32 = vmul.f32 %v1383_v45, %v569_v34  ;;  %v1398_v5 = vmul.f32 %v1387_v52, %v568_v62 }
  0xbc   : > { %v551_v10 = vmul.f32 %v534_v53, %v527_v63  ;;  %v1368_v11 = vmul.f32 %v1360_v55, %v527_v63  ;;  %v1531_v61 = vld [vmem:[#allocation2 + $0x48] sm:$0xff]  ;;  %v642_v53 = vrot.slane %v3952_v27, %v3669_v15  ;;  %v646_v56 = vrot.slane %v3952_v27, %v3667_v14 }
  0xbd   : > { %v605_v12 = vrot.slane %v597_v8, 4  ;;  %v606_v13 = vrot.slane %v598_v4, 4  ;;  %v1405_v0 = vrot.slane %v1397_v32, 4  ;;  %v1406_v19 = vrot.slane %v1398_v5, 4  ;;  %v664_v24 = vpop.permute.xlu1 %663  ;;  %v622_v26 = vpop.permute.xlu0 %621 }
  0xbe   : > { %555 = vst [vmem:[#allocation2 + $0x40] sm:$0xf] %v551_v10  ;;  %1372 = vst [vmem:[#allocation2 + $0x178] sm:$0xf] %v1368_v11  ;;  %v668_v2 = vsel %vm667_vm5, %v664_v24, %v3933_v1  ;;  %v669_v28 = vsel %vm667_vm5, %v3882_v23, %v664_v24  ;;  %v627_v29 = vsel %vm623_vm7, %v622_v26, %v616_v42 }
  0xbf   : > { %613 = vst [vmem:[#allocation2 + $0x50] sm:$0xf0] %v605_v12  ;;  %614 = vst [vmem:[#allocation2 + $0x58] sm:$0xf0] %v606_v13  ;;  %v697_v31 = vmul.f32 %v686_v57, %v669_v28  ;;  %v698_v25 = vmul.f32 %v690_v58, %v668_v2  ;;  %v1471_v35 = vmul.f32 %v1457_v43, %v669_v28 }
  0xc0   : > { %1413 = vst [vmem:[#allocation2 + $0x168] sm:$0xf0] %v1405_v0  ;;  %1414 = vst [vmem:[#allocation2 + $0x170] sm:$0xf0] %v1406_v19  ;;  %v1472_v37 = vmul.f32 %v1461_v59, %v668_v2  ;;  %v651_v21 = vmul.f32 %v634_v50, %v627_v29  ;;  %v1442_v1 = vmul.f32 %v1434_v17, %v627_v29  ;;  %v1535_v38 = vld [vmem:[#allocation2 + $0x68] sm:$0xff] }
  0xc1   : > { %v4028_v23 = vld [vmem:[%s5055_s1 + $0x23] ss:$8 sm:$0xf]  ;;  %v705_v22 = vrot.slane %v697_v31, 4  ;;  %v706_v39 = vrot.slane %v698_v25, 4  ;;  %v1479_v40 = vrot.slane %v1471_v35, 4  ;;  %v4030_v60 = vpop.permute.xlu1 %761  ;;  %v4032_v46 = vpop.permute.xlu0 %759  ;;  %v3254_v33 = vpack.c.bf16 %v1535_v38, %v1531_v61 }
  0xc2   : > { %v1480_v42 = vrot.slane %v1472_v37, 4  ;;  %655 = vst [vmem:[#allocation2 + $0x60] sm:$0xf] %v651_v21  ;;  %1446 = vst [vmem:[#allocation2 + $0x198] sm:$0xf] %v1442_v1  ;;  %v770_v47 = vsel %vm767_vm8, %v4032_v46, %v4030_v60  ;;  %v882_v49 = vrot.slane %v4028_v23, %v3643_v7  ;;  %v1426_v57 = vrot.slane %v3957_v18, %v3643_v7 }
  0xc3   : > { %713 = vst [vmem:[#allocation2 + $0x70] sm:$0xf0] %v705_v22  ;;  %714 = vst [vmem:[#allocation2 + $0x78] sm:$0xf0] %v706_v39  ;;  %v796_v48 = vmul.f32 %v782_v30, %v770_v47  ;;  %3255 = vmatprep.subr.bf16.mxu0 %v3254_v33  ;;  %v1430_v58 = vrot.slane %v3957_v18, %v3669_v15  ;;  %v542_v43 = vrot.slane %v3926_v54, %v3669_v15 }
  0xc4   : > { %1487 = vst [vmem:[#allocation2 + $0x188] sm:$0xf0] %v1479_v40  ;;  %1488 = vst [vmem:[#allocation2 + $0x190] sm:$0xf0] %v1480_v42  ;;  %v546_v59 = vrot.slane %v3926_v54, %v3667_v14  ;;  %v1352_v62 = vrot.slane %v3931_v16, %v3643_v7  ;;  %v1356_v34 = vrot.slane %v3931_v16, %v3669_v15 }
  0xc5   : > { %v804_v51 = vrot.slane %v796_v48, 4  ;;  %v4041_v44 = vpop.permute.xlu1 %861  ;;  %v860_v45 = vpop.permute.xlu0 %859  ;;  %v878_v8 = vrot.slane %v4028_v23, %v3641_v6  ;;  %v778_v18 = vrot.slane %v4010_v9, %v3641_v6  ;;  %v4080_v13 = vld [vmem:[%s5055_s1 + $0x20] ss:$8 sm:$0xf] }
  0xc6   : > { %v870_v52 = vsel %vm867_vm9, %v860_v45, %v4041_v44  ;;  %v738_v35 = vrot.slane %v4080_v13, %v3643_v7  ;;  %v4103_v21 = vld [vmem:[%s5055_s1 + $0x22] ss:$8 sm:$0xf] }
  0xc7   : > { %812 = vst [vmem:[#allocation2 + $0x88] sm:$0xf0] %v804_v51  ;;  %v896_v55 = vmul.f32 %v882_v49, %v870_v52  ;;  %v838_v61 = vrot.slane %v4103_v21, %v3643_v7 }
  0xc9   : > { %v904_v63 = vrot.slane %v896_v55, 4  ;;  %v620_v27 = vpop.permute.xlu1 %619  ;;  %v520_v50 = vpop.permute.xlu0 %519  ;;  %v1534_v5 = vld [vmem:[#allocation2 + $0x60] sm:$0xff] }
  0xca   : > { %v624_v4 = vsel %vm623_vm7, %v620_v27, %v622_v26  ;;  %v625_v54 = vsel %vm623_vm7, %v3969_v41, %v620_v27  ;;  %v524_v16 = vsel %vm523_vm6, %v520_v50, %v3986_v36  ;;  %v525_v32 = vsel %vm523_vm6, %v3959_v3, %v520_v50  ;;  %v1530_v36 = vld [vmem:[#allocation2 + $0x40] sm:$0xff] }
  0xcb   : > { %912 = vst [vmem:[#allocation2 + $0xa8] sm:$0xf0] %v904_v63  ;;  %v653_v10 = vmul.f32 %v642_v53, %v625_v54  ;;  %v654_v11 = vmul.f32 %v646_v56, %v624_v4  ;;  %v1440_v17 = vmul.f32 %v1426_v57, %v625_v54  ;;  %v1441_v12 = vmul.f32 %v1430_v58, %v624_v4  ;;  %v4085_v3 = vld [vmem:[%s5055_s1 + $0x62] ss:$8 sm:$0xf] }
  0xcc   : > { %v553_v41 = vmul.f32 %v542_v43, %v525_v32  ;;  %v554_v0 = vmul.f32 %v546_v59, %v524_v16  ;;  %v1366_v19 = vmul.f32 %v1352_v62, %v525_v32  ;;  %v1367_v24 = vmul.f32 %v1356_v34, %v524_v16 }
  0xcd   : > { %657 = vst [vmem:[#allocation2 + $0x70] sm:$0xf] %v653_v10  ;;  %658 = vst [vmem:[#allocation2 + $0x78] sm:$0xf] %v654_v11  ;;  %v3256_v26 = vpack.c.bf16 %v1534_v5, %v1530_v36  ;;  %v4087_v2 = vpop.permute.xlu1 %865  ;;  %v766_v28 = vpop.permute.xlu0 %765  ;;  %v1496_v37 = vrot.slane %v4085_v3, %v3641_v6  ;;  %v786_v56 = vrot.slane %v4010_v9, %v3669_v15 }
  0xce   : > { %1444 = vst [vmem:[#allocation2 + $0x188] sm:$0xf] %v1440_v17  ;;  %1445 = vst [vmem:[#allocation2 + $0x190] sm:$0xf] %v1441_v12  ;;  %v871_v29 = vsel %vm867_vm9, %v4087_v2, %v860_v45  ;;  %v771_v30 = vsel %vm767_vm8, %v766_v28, %v4032_v46  ;;  %v790_v58 = vrot.slane %v4010_v9, %v3667_v14 }
  0xcf   : > { %557 = vst [vmem:[#allocation2 + $0x50] sm:$0xf] %v553_v41  ;;  %558 = vst [vmem:[#allocation2 + $0x58] sm:$0xf] %v554_v0  ;;  %3257 = vmatpush1.bf16.msra.mxu0 %v3256_v26  ;;  %v895_v31 = vmul.f32 %v878_v8, %v871_v29  ;;  %v795_v25 = vmul.f32 %v778_v18, %v771_v30  ;;  %v734_v43 = vrot.slane %v4080_v13, %v3641_v6 }
  0xd0   : > { %1370 = vst [vmem:[#allocation2 + $0x168] sm:$0xf] %v1366_v19  ;;  %1371 = vst [vmem:[#allocation2 + $0x170] sm:$0xf] %v1367_v24  ;;  %v1508_v59 = vrot.slane %v4085_v3, %v3667_v14  ;;  %v886_v63 = vrot.slane %v4028_v23, %v3669_v15  ;;  %v890_v27 = vrot.slane %v4028_v23, %v3667_v14 }
  0xd1   : > { %v903_v1 = vrot.slane %v895_v31, 4  ;;  %v803_v38 = vrot.slane %v795_v25, 4  ;;  %v4105_v22 = vpop.permute.xlu1 %717  ;;  %v716_v39 = vpop.permute.xlu0 %715  ;;  %v834_v18 = vrot.slane %v4103_v21, %v3641_v6  ;;  %v4142_v23 = vld [vmem:[%s5055_s1 + $0x27] ss:$8 sm:$0xf] }
  0xd2   : > { %v726_v40 = vsel %vm723_vm10, %v716_v39, %v4105_v22  ;;  %v1061_v36 = vrot.slane %v4142_v23, %v3643_v7 }
  0xd3   : > { %911 = vst [vmem:[#allocation2 + $0xa0] sm:$0xf0] %v903_v1  ;;  %811 = vst [vmem:[#allocation2 + $0x80] sm:$0xf0] %v803_v38  ;;  %v752_v42 = vmul.f32 %v738_v35, %v726_v40  ;;  %v1513_v46 = vmul.f32 %v1496_v37, %v726_v40  ;;  %v842_v35 = vrot.slane %v4103_v21, %v3669_v15 }
  0xd4   : > { %v1537_v47 = vld [vmem:[#allocation2 + $0x78] sm:$0xff]  ;;  %v1536_v33 = vld [vmem:[#allocation2 + $0x70] sm:$0xff]  ;;  %v846_v1 = vrot.slane %v4103_v21, %v3667_v14  ;;  %v742_v38 = vrot.slane %v4080_v13, %v3669_v15  ;;  %v1500_v40 = vrot.slane %v4085_v3, %v3643_v7 }
  0xd5   : > { %756 = vst [vmem:[#allocation2 + $0x88] sm:$0xf] %v752_v42  ;;  %1517 = vst [vmem:[#allocation2 + $0x1a0] sm:$0xf] %v1513_v46  ;;  %v4113_v48 = vpop.permute.xlu1 %817  ;;  %v816_v49 = vpop.permute.xlu0 %815  ;;  %v1504_v42 = vrot.slane %v4085_v3, %v3669_v15 }
  0xd6   : > { %v1533_v51 = vld [vmem:[#allocation2 + $0x58] sm:$0xff]  ;;  %v1532_v45 = vld [vmem:[#allocation2 + $0x50] sm:$0xff]  ;;  %v826_v52 = vsel %vm823_vm11, %v816_v49, %v4113_v48 }
  0xd7   : > { %v3284_v53 = vpack.c.bf16 %v1537_v47, %v1533_v51  ;;  %v3286_v55 = vpack.c.bf16 %v1536_v33, %v1532_v45  ;;  %v852_v57 = vmul.f32 %v838_v61, %v826_v52  ;;  %v1057_v33 = vrot.slane %v4142_v23, %v3641_v6 }
  0xd9   : > { %3285 = vmatprep.subr.bf16.mxu1 %v3284_v53  ;;  %856 = vst [vmem:[#allocation2 + $0xa8] sm:$0xf] %v852_v57  ;;  %v764_v62 = vpop.permute.xlu1 %763  ;;  %v722_v34 = vpop.permute.xlu0 %721 }
  0xda   : > { %3287 = vmatpush1.bf16.msra.mxu1 %v3286_v55  ;;  %v768_v9 = vsel %vm767_vm8, %v764_v62, %v766_v28  ;;  %v769_v50 = vsel %vm767_vm8, %v4030_v60, %v764_v62  ;;  %v727_v8 = vsel %vm723_vm10, %v722_v34, %v716_v39  ;;  %v746_v39 = vrot.slane %v4080_v13, %v3667_v14 }
  0xdb   : > { %v797_v4 = vmul.f32 %v786_v56, %v769_v50  ;;  %v798_v54 = vmul.f32 %v790_v58, %v768_v9  ;;  %v751_v16 = vmul.f32 %v734_v43, %v727_v8  ;;  %v1516_v32 = vmul.f32 %v1508_v59, %v727_v8 }
  0xdc   : > { %v1539_v26 = vld [vmem:[#allocation2 + $0x88] sm:$0xff] }
  0xdd   : > { %v805_v5 = vrot.slane %v797_v4, 4  ;;  %v806_v10 = vrot.slane %v798_v54, 4  ;;  %755 = vst [vmem:[#allocation2 + $0x80] sm:$0xf] %v751_v16  ;;  %1520 = vst [vmem:[#allocation2 + $0x1b8] sm:$0xf] %v1516_v32  ;;  %v864_v60 = vpop.permute.xlu1 %863  ;;  %v822_v11 = vpop.permute.xlu0 %821 }
  0xde   : > { %v868_v17 = vsel %vm867_vm9, %v864_v60, %v4087_v2  ;;  %v869_v12 = vsel %vm867_vm9, %v4041_v44, %v864_v60  ;;  %v827_v41 = vsel %vm823_vm11, %v822_v11, %v816_v49 }
  0xdf   : > { %813 = vst [vmem:[#allocation2 + $0x90] sm:$0xf0] %v805_v5  ;;  %814 = vst [vmem:[#allocation2 + $0x98] sm:$0xf0] %v806_v10  ;;  %v897_v0 = vmul.f32 %v886_v63, %v869_v12  ;;  %v898_v19 = vmul.f32 %v890_v27, %v868_v17  ;;  %v851_v24 = vmul.f32 %v834_v18, %v827_v41 }
  0xe0   : > { %v1543_v28 = vld [vmem:[#allocation2 + $0xa8] sm:$0xff] }
  0xe1   : > { %v905_v2 = vrot.slane %v897_v0, 4  ;;  %v906_v29 = vrot.slane %v898_v19, 4  ;;  %855 = vst [vmem:[#allocation2 + $0xa0] sm:$0xf] %v851_v24  ;;  %v4155_v30 = vpop.permute.xlu1 %1042  ;;  %v1041_v44 = vpop.permute.xlu0 %1040  ;;  %v3258_v31 = vpack.c.bf16 %v1543_v28, %v1539_v26  ;;  %v1065_v24 = vrot.slane %v4142_v23, %v3669_v15 }
  0xe2   : > { %v1048_v25 = vsel %vm5065_vm12, %v1041_v44, %v4155_v30  ;;  %v4197_v27 = vld [vmem:[%s5055_s1 + $0x26] ss:$8 sm:$0xf]  ;;  %v1069_v28 = vrot.slane %v4142_v23, %v3667_v14 }
  0xe3   : > { %913 = vst [vmem:[#allocation2 + $0xb0] sm:$0xf0] %v905_v2  ;;  %914 = vst [vmem:[#allocation2 + $0xb8] sm:$0xf0] %v906_v29  ;;  %v1075_v37 = vmul.f32 %v1061_v36, %v1048_v25  ;;  %3259 = vmatprep.subr.bf16.mxu0 %v3258_v31  ;;  %v1017_v16 = vrot.slane %v4197_v27, %v3643_v7  ;;  %v1013_v2 = vrot.slane %v4197_v27, %v3641_v6 }
  0xe4   : > { %v1538_v57 = vld [vmem:[#allocation2 + $0x80] sm:$0xff] }
  0xe5   : > { %v1083_v46 = vrot.slane %v1075_v37, 4  ;;  %v820_v61 = vpop.permute.xlu1 %819  ;;  %v720_v47 = vpop.permute.xlu0 %719  ;;  %v4222_v29 = vld [vmem:[%s5055_s1 + $0x41] ss:$8 sm:$0xf] }
  0xe6   : > { %v824_v21 = vsel %vm823_vm11, %v820_v61, %v822_v11  ;;  %v825_v49 = vsel %vm823_vm11, %v4113_v48, %v820_v61  ;;  %v724_v13 = vsel %vm723_vm10, %v720_v47, %v722_v34  ;;  %v725_v3 = vsel %vm723_vm10, %v4105_v22, %v720_v47  ;;  %v4187_v48 = vld [vmem:[%s5055_s1 + $0x24] ss:$8 sm:$0xf] }
  0xe7   : > { %1091 = vst [vmem:[#allocation2 + $0xe8] sm:$0xf0] %v1083_v46  ;;  %v853_v51 = vmul.f32 %v842_v35, %v825_v49  ;;  %v854_v45 = vmul.f32 %v846_v1, %v824_v21  ;;  %v753_v52 = vmul.f32 %v742_v38, %v725_v3  ;;  %v754_v53 = vmul.f32 %v746_v39, %v724_v13 }
  0xe8   : > { %v1514_v55 = vmul.f32 %v1500_v40, %v725_v3  ;;  %v1515_v56 = vmul.f32 %v1504_v42, %v724_v13  ;;  %v1542_v58 = vld [vmem:[#allocation2 + $0xa0] sm:$0xff]  ;;  %v938_v63 = vrot.slane %v4187_v48, %v3643_v7  ;;  %v934_v54 = vrot.slane %v4187_v48, %v3641_v6 }
  0xe9   : > { %857 = vst [vmem:[#allocation2 + $0xb0] sm:$0xf] %v853_v51  ;;  %858 = vst [vmem:[#allocation2 + $0xb8] sm:$0xf] %v854_v45  ;;  %v916_v43 = vpop.permute.xlu1 %915  ;;  %v1039_v22 = vpop.permute.xlu0 %1038  ;;  %v3260_v59 = vpack.c.bf16 %v1542_v58, %v1538_v57  ;;  %v1161_v39 = vrot.slane %v4222_v29, %v3643_v7  ;;  %v1025_v21 = vrot.slane %v4197_v27, %v3667_v14 }
  0xea   : > { %757 = vst [vmem:[#allocation2 + $0x90] sm:$0xf] %v753_v52  ;;  %758 = vst [vmem:[#allocation2 + $0x98] sm:$0xf] %v754_v53  ;;  %v1049_v62 = vsel %vm5065_vm12, %v1039_v22, %v1041_v44  ;;  %v942_v49 = vrot.slane %v4187_v48, %v3669_v15  ;;  %v946_v13 = vrot.slane %v4187_v48, %v3667_v14 }
  0xeb   : > { %1518 = vst [vmem:[#allocation2 + $0x1a8] sm:$0xf] %v1514_v55  ;;  %1519 = vst [vmem:[#allocation2 + $0x1b0] sm:$0xf] %v1515_v56  ;;  %v1074_v34 = vmul.f32 %v1057_v33, %v1049_v62  ;;  %3261 = vmatpush1.bf16.msra.mxu0 %v3260_v59  ;;  %v1021_v33 = vrot.slane %v4197_v27, %v3669_v15 }
  0xed   : > { %v1082_v9 = vrot.slane %v1074_v34, 4  ;;  %v997_v50 = vpop.permute.xlu1 %996  ;;  %v4199_v8 = vpop.permute.xlu0 %917  ;;  %v1157_v34 = vrot.slane %v4222_v29, %v3641_v6 }
  0xee   : > { %v926_v18 = vsel %vm923_vm13, %v916_v43, %v4199_v8 }
  0xef   : > { %1090 = vst [vmem:[#allocation2 + $0xe0] sm:$0xf0] %v1082_v9  ;;  %v952_v4 = vmul.f32 %v938_v63, %v926_v18  ;;  %v3201_v9 = vld [vmem:[%s5055_s1 + $0x40] ss:$8 sm:$0xf] }
  0xf0   : > { %v1545_v5 = vld [vmem:[#allocation2 + $0xb8] sm:$0xff]  ;;  %v1544_v12 = vld [vmem:[#allocation2 + $0xb0] sm:$0xff] }
  0xf1   : > { %v1541_v32 = vld [vmem:[#allocation2 + $0x98] sm:$0xff]  ;;  %v1540_v10 = vld [vmem:[#allocation2 + $0x90] sm:$0xff]  ;;  %956 = vst [vmem:[#allocation2 + $0xc8] sm:$0xf] %v952_v4  ;;  %v922_v60 = vpop.permute.xlu1 %921  ;;  %v999_v11 = vpop.permute.xlu0 %998 }
  0xf2   : > { %v3288_v17 = vpack.c.bf16 %v1545_v5, %v1541_v32  ;;  %v927_v41 = vsel %vm923_vm13, %v922_v60, %v916_v43  ;;  %v1004_v0 = vsel %vm5068_vm14, %v997_v50, %v999_v11  ;;  %v3290_v19 = vpack.c.bf16 %v1544_v12, %v1540_v10 }
  0xf3   : > { %v951_v36 = vmul.f32 %v934_v54, %v927_v41  ;;  %v1031_v26 = vmul.f32 %v1017_v16, %v1004_v0  ;;  %v1113_v54 = vrot.slane %v3201_v9, %v3641_v6  ;;  %v1117_v32 = vrot.slane %v3201_v9, %v3643_v7 }
  0xf4   : > { %3289 = vmatprep.subr.bf16.mxu1 %v3288_v17  ;;  %v1121_v41 = vrot.slane %v3201_v9, %v3669_v15  ;;  %v1125_v0 = vrot.slane %v3201_v9, %v3667_v14 }
  0xf5   : > { %3291 = vmatpush1.bf16.msra.mxu1 %v3290_v19  ;;  %955 = vst [vmem:[#allocation2 + $0xc0] sm:$0xf] %v951_v36  ;;  %1035 = vst [vmem:[#allocation2 + $0xe8] sm:$0xf] %v1031_v26  ;;  %v1045_v44 = vpop.permute.xlu1 %1044  ;;  %v995_v31 = vpop.permute.xlu0 %994  ;;  %v1169_v36 = vrot.slane %v4222_v29, %v3667_v14 }
  0xf6   : > { %v1047_v25 = vsel %vm5065_vm12, %v4155_v30, %v1045_v44  ;;  %v1050_v23 = vsel %vm5065_vm12, %v1045_v44, %v1039_v22  ;;  %v1005_v35 = vsel %vm5068_vm14, %v995_v31, %v997_v50  ;;  %vm5066_vm12 = vcmp.lt.s32.totalorder %v3678_v20, 120 }
  0xf7   : > { %v1076_v37 = vmul.f32 %v1065_v24, %v1047_v25  ;;  %v1077_v1 = vmul.f32 %v1069_v28, %v1050_v23  ;;  %v1030_v38 = vmul.f32 %v1013_v2, %v1005_v35  ;;  %v1165_v24 = vrot.slane %v4222_v29, %v3669_v15 }
  0xf8   : > { %v1547_v3 = vld [vmem:[#allocation2 + $0xc8] sm:$0xff] }
  0xf9   : > { %v1084_v40 = vrot.slane %v1076_v37, 4  ;;  %v1085_v42 = vrot.slane %v1077_v1, 4  ;;  %1034 = vst [vmem:[#allocation2 + $0xe0] sm:$0xf] %v1030_v38  ;;  %v4234_v46 = vpop.permute.xlu1 %1142  ;;  %v1141_v30 = vpop.permute.xlu0 %1140 }
  0xfa   : > { %v1148_v61 = vsel %vm5067_vm15, %v1141_v30, %v4234_v46 }
  0xfb   : > { %1092 = vst [vmem:[#allocation2 + $0xf0] sm:$0xf0] %v1084_v40  ;;  %1093 = vst [vmem:[#allocation2 + $0xf8] sm:$0xf0] %v1085_v42  ;;  %v1175_v47 = vmul.f32 %v1161_v39, %v1148_v61 }
  0xfc   : > { %v1551_v51 = vld [vmem:[#allocation2 + $0xe8] sm:$0xff]  ;;  %v1546_v63 = vld [vmem:[#allocation2 + $0xc0] sm:$0xff] }
  0xfd   : > { %v1183_v45 = vrot.slane %v1175_v47, 4  ;;  %v1001_v52 = vpop.permute.xlu1 %1000  ;;  %v3262_v53 = vpack.c.bf16 %v1551_v51, %v1547_v3  ;;  %v1567_v51 = vld [vmem:[#allocation2 + $0x168] sm:$0xff] }
  0xfe   : > { %v1003_v55 = vsel %vm5068_vm14, %v999_v11, %v1001_v52  ;;  %v1006_v56 = vsel %vm5068_vm14, %v1001_v52, %v995_v31  ;;  %v920_v57 = vpop.permute.xlu0 %919 }
  0xff   : > { %1191 = vst [vmem:[#allocation2 + $0x108] sm:$0xf0] %v1183_v45  ;;  %v1032_v58 = vmul.f32 %v1021_v33, %v1003_v55  ;;  %v1033_v43 = vmul.f32 %v1025_v21, %v1006_v56  ;;  %v924_v22 = vsel %vm923_vm13, %v920_v57, %v922_v60  ;;  %v925_v48 = vsel %vm923_vm13, %v4199_v8, %v920_v57  ;;  %v1558_v21 = vld [vmem:[#allocation2 + $0x120] sm:$0xff]  ;;  %v1563_v45 = vld [vmem:[#allocation2 + $0x148] sm:$0xff] }
 0x100   : > { %3263 = vmatprep.subr.bf16.mxu0 %v3262_v53  ;;  %v953_v59 = vmul.f32 %v942_v49, %v925_v48  ;;  %v954_v62 = vmul.f32 %v946_v13, %v924_v22  ;;  %v1550_v27 = vld [vmem:[#allocation2 + $0xe0] sm:$0xff]  ;;  %v1559_v13 = vld [vmem:[#allocation2 + $0x128] sm:$0xff]  ;;  %v3270_v52 = vpack.c.bf16 %v1567_v51, %v1563_v45  ;;  %v1569_v22 = vld [vmem:[#allocation2 + $0x178] sm:$0xff] }
 0x101   : > { %1036 = vst [vmem:[#allocation2 + $0xf0] sm:$0xf] %v1032_v58  ;;  %1037 = vst [vmem:[#allocation2 + $0xf8] sm:$0xf] %v1033_v43  ;;  %v1097_v50 = vpop.permute.xlu1 %1096  ;;  %v3264_v18 = vpack.c.bf16 %v1550_v27, %v1546_v63  ;;  %v1566_v53 = vld [vmem:[#allocation2 + $0x160] sm:$0xff]  ;;  %v1561_v58 = vld [vmem:[#allocation2 + $0x138] sm:$0xff] }
 0x102   : > { %957 = vst [vmem:[#allocation2 + $0xd0] sm:$0xf] %v953_v59  ;;  %958 = vst [vmem:[#allocation2 + $0xd8] sm:$0xf] %v954_v62  ;;  %v1139_v4 = vpop.permute.xlu0 %1138  ;;  %v1562_v55 = vld [vmem:[#allocation2 + $0x140] sm:$0xff]  ;;  %v1560_v43 = vld [vmem:[#allocation2 + $0x130] sm:$0xff] }
 0x103   : > { %v1149_v8 = vsel %vm5067_vm15, %v1139_v4, %v1141_v30  ;;  %3265 = vmatpush1.bf16.msra.mxu0 %v3264_v18  ;;  %v1575_v56 = vld [vmem:[#allocation2 + $0x1a8] sm:$0xf]  ;;  %v3272_v48 = vpack.c.bf16 %v1566_v53, %v1562_v55  ;;  %v1565_v18 = vld [vmem:[#allocation2 + $0x158] sm:$0xff] }
 0x104   : > { %v1174_v16 = vmul.f32 %v1157_v34, %v1149_v8  ;;  %v1571_v59 = vld [vmem:[#allocation2 + $0x188] sm:$0xff]  ;;  %v1570_v8 = vld [vmem:[#allocation2 + $0x180] sm:$0xff] }
 0x105   : > { %v1095_v5 = vpop.permute.xlu1 %1094  ;;  %v3274_v63 = vpack.c.bf16 %v1575_v56, %v1571_v59 }
 0x106   : > { %v1182_v10 = vrot.slane %v1174_v16, 4  ;;  %v1105_v60 = vsel %vm5066_vm12, %v1095_v5, %v1097_v50  ;;  %v1099_v11 = vpop.permute.xlu0 %1098 }
 0x107   : > { %v1130_v17 = vmul.f32 %v1113_v54, %v1105_v60  ;;  %v1104_v12 = vsel %vm5066_vm12, %v1097_v50, %v1099_v11  ;;  %v1574_v50 = vld [vmem:[#allocation2 + $0x1a0] sm:$0xf]  ;;  %v1568_v54 = vld [vmem:[#allocation2 + $0x170] sm:$0xff]  ;;  %v1573_v60 = vld [vmem:[#allocation2 + $0x198] sm:$0xff] }
 0x108   : > { %1190 = vst [vmem:[#allocation2 + $0x100] sm:$0xf0] %v1182_v10  ;;  %v1131_v19 = vmul.f32 %v1117_v32, %v1104_v12  ;;  %v1553_v26 = vld [vmem:[#allocation2 + $0xf8] sm:$0xff]  ;;  %v1552_v28 = vld [vmem:[#allocation2 + $0xf0] sm:$0xff]  ;;  %v3277_v16 = vpack.c.bf16 %v1574_v50, %v1570_v8 }
 0x109   : > { %1134 = vst [vmem:[#allocation2 + $0x100] sm:$0xf] %v1130_v17  ;;  %v1101_v2 = vpop.permute.xlu1 %1100  ;;  %v1549_v44 = vld [vmem:[#allocation2 + $0xd8] sm:$0xff]  ;;  %v1548_v31 = vld [vmem:[#allocation2 + $0xd0] sm:$0xff] }
 0x10a   : > { %1135 = vst [vmem:[#allocation2 + $0x108] sm:$0xf] %v1131_v19  ;;  %v1103_v25 = vsel %vm5066_vm12, %v1099_v11, %v1101_v2  ;;  %v1106_v23 = vsel %vm5066_vm12, %v1101_v2, %v1095_v5  ;;  %v1145_v35 = vpop.permute.xlu0 %1144  ;;  %v3292_v37 = vpack.c.bf16 %v1553_v26, %v1549_v44  ;;  %v3294_v1 = vpack.c.bf16 %v1552_v28, %v1548_v31  ;;  %v1577_v32 = vld [vmem:[#allocation2 + $0x1b8] sm:$0xf]  ;;  %v1564_v5 = vld [vmem:[#allocation2 + $0x150] sm:$0xff]  ;;  %v1521_v11 = vld [vmem:[%s5056_s2] sm:$0xff] }
 0x10b   : > { %v1132_v38 = vmul.f32 %v1121_v41, %v1103_v25  ;;  %v1133_v39 = vmul.f32 %v1125_v0, %v1106_v23  ;;  %v1147_v29 = vsel %vm5067_vm15, %v4234_v46, %v1145_v35  ;;  %v1150_v40 = vsel %vm5067_vm15, %v1145_v35, %v1139_v4  ;;  %v1576_v12 = vld [vmem:[#allocation2 + $0x1b0] sm:$0xf] }
 0x10c   : > { %v1176_v42 = vmul.f32 %v1165_v24, %v1147_v29  ;;  %v1177_v30 = vmul.f32 %v1169_v36, %v1150_v40  ;;  %3293 = vmatprep.subr.bf16.mxu1 %v3292_v37  ;;  %vm1582_vm12 = vcmask 1043456   ;;  %vm3476_vm15 = vmmov 1   ;;  %v1572_v41 = vld [vmem:[#allocation2 + $0x190] sm:$0xff] }
 0x10d   : > { %1136 = vst [vmem:[#allocation2 + $0x110] sm:$0xf] %v1132_v38  ;;  %1137 = vst [vmem:[#allocation2 + $0x118] sm:$0xf] %v1133_v39  ;;  %3295 = vmatpush1.bf16.msra.mxu1 %v3294_v1  ;;  %v3300_v4 = vpack.c.bf16 %v1569_v22, %v1565_v18  ;;  %v3302_v10 = vpack.c.bf16 %v1568_v54, %v1564_v5  ;;  %v3304_v17 = vpack.c.bf16 %v1577_v32, %v1573_v60 }
 0x10e   : > { %v1184_v61 = vrot.slane %v1176_v42, 4  ;;  %v1185_v47 = vrot.slane %v1177_v30, 4  ;;  %vm4285_vm14 = vmpackc.low %vm1582_vm12, %vm3476_vm15  ;;  %vm1578_vm12 = vcmask 883712   ;;  %v3307_v0 = vpack.c.bf16 %v1576_v12, %v1572_v41  ;;  %v1805_v32 = vld [vmem:[%s5055_s1] ss:$8 sm:$0xf] }
 0x10f   : > { %v3235_v5 = vld [vmem:[%s5055_s1 + $0x42] ss:$8 sm:$0xf]  ;;  %v3236_v60 = vld [vmem:[%s5055_s1 + $0x43] ss:$8 sm:$0xf]  ;;  %v1814_v12 = vrot.slane %v1805_v32, %v3643_v7 }
 0x110   : > { %1192 = vst [vmem:[#allocation2 + $0x110] sm:$0xf0] %v1184_v61  ;;  %1193 = vst [vmem:[#allocation2 + $0x118] sm:$0xf0] %v1185_v47  ;;  %v1554_v33 = vld [vmem:[#allocation2 + $0x100] sm:$0xff]  ;;  %v3477_v47 = vmov 0   ;;  %v2542_v41 = vrot.slane %v3235_v5, %v3641_v6 }
 0x111   : > { %v1555_v49 = vld [vmem:[#allocation2 + $0x108] sm:$0xff]  ;;  %v3268_v3 = vpack.c.bf16 %v1558_v21, %v1554_v33  ;;  %3443 = vset.pattern.permute.xlu0 %v3477_v47  ;;  %3442 = vset.pattern.permute.xlu1 %v3477_v47  ;;  %v1771_v33 = vld [vmem:[%s5058_s4] sm:$0xff] }
 0x112   : > { %v3266_v46 = vpack.c.bf16 %v1559_v13, %v1555_v49 }
 0x114   : > { %3267 = vmatprep.subr.bf16.mxu0 %v3266_v46 }
 0x115   : > { %3269 = vmatpush1.bf16.msra.mxu0 %v3268_v3  ;;  %v1758_v3 = vld [vmem:[%s5057_s3] sm:$0xff] }
 0x116   : > { %3271 = vmatprep.subr.bf16.mxu0 %v3270_v52 }
 0x117   : > { %v1557_v62 = vld [vmem:[#allocation2 + $0x118] sm:$0xff]  ;;  %v1556_v34 = vld [vmem:[#allocation2 + $0x110] sm:$0xff] }
 0x118   : > { %v3296_v27 = vpack.c.bf16 %v1561_v58, %v1557_v62  ;;  %v3298_v9 = vpack.c.bf16 %v1560_v43, %v1556_v34 }
 0x119   : > { %3273 = vmatpush1.bf16.msra.mxu0 %v3272_v48 }
 0x11a   : > { %3276 = vmatprep.subr.msk.bf16.mxu0 %vm4285_vm14, %v3274_v63  ;;  %3297 = vmatprep.subr.bf16.mxu1 %v3296_v27 }
 0x11b   : > { %3299 = vmatpush1.bf16.msra.mxu1 %v3298_v9 }
 0x11c   : > { %3301 = vmatprep.subr.bf16.mxu1 %v3300_v4 }
 0x11d   : > { %3279 = vmatpush1.bf16.msk.msra.mxu0 %vm4285_vm14, %v3277_v16 }
 0x11f   : > { %3303 = vmatpush1.bf16.msra.mxu1 %v3302_v10  ;;  %v3218_v10 = vld [vmem:[%s5055_s1 + $0x1] ss:$8 sm:$0xf] }
 0x120   : > { %3306 = vmatprep.subr.msk.bf16.mxu1 %vm4285_vm14, %v3304_v17  ;;  %3214 = vmatmul.mubr.msk.f32.vlgmr.msra.gmra.mrb[0].mxu0 %vm1578_vm12, %v1521_v11 }
 0x123   : > { %3309 = vmatpush1.bf16.msk.msra.mxu1 %vm4285_vm14, %v3307_v0  ;;  %v1856_v0 = vrot.slane %v3218_v10, %v3643_v7 }
 0x126   : > { %3217 = vmatmul.mubr.msk.f32.vlgmr.msra.gmra.mrb[0].mxu1 %vm1578_vm12, %v1521_v11 }
 0x1f3   : > { %v1661_v19 = vpop.f32.mrb[0].mxu0 }
 0x1f4   : > { %v1663_v24 = vpop.f32.mrb[1].mxu0 }
 0x1f5   : > { %v1737_v36 = vadd.f32 %v1663_v24, %v1661_v19 }
 0x1f9   : > { %v1732_v26 = vpop.f32.mrb[0].mxu1 }
 0x1fa   : > { %v1738_v28 = vadd.f32 %v1737_v36, %v1732_v26  ;;  %v1734_v2 = vpop.f32.mrb[1].mxu1 }
 0x1fc   : > { %v1739_v44 = vadd.f32 %v1738_v28, %v1734_v2 }
 0x1fe   : > { %1740 = vadd.xlane.f32.xlu0 %v1739_v44 }
 0x28b   : > { %v1741_v31 = vpop.xlane.xlu0 %1740 }
 0x28c   : > { %v1743_v25 = vmul.f32 0.001953125, %v1741_v31 }
 0x28e   : > { %v1744_v23 = vsub.f32 %v1661_v19, %v1743_v25  ;;  %v1745_v35 = vsub.f32 %v1663_v24, %v1743_v25  ;;  %v1746_v37 = vsub.f32 %v1732_v26, %v1743_v25  ;;  %v1747_v1 = vsub.f32 %v1734_v2, %v1743_v25 }
 0x28f   : > { %v2572_v19 = vrot.slane %v3236_v60, %v3641_v6 }
 0x290   : > { %v1748_v38 = vmul.f32 %v1744_v23, %v1744_v23  ;;  %v1749_v39 = vmul.f32 %v1745_v35, %v1745_v35  ;;  %v1750_v29 = vmul.f32 %v1746_v37, %v1746_v37  ;;  %v1751_v42 = vmul.f32 %v1747_v1, %v1747_v1 }
 0x292   : > { %v1752_v40 = vadd.f32 %v1749_v39, %v1748_v38  ;;  %v1810_v38 = vrot.slane %v1805_v32, %v3641_v6  ;;  %v2554_v39 = vrot.slane %v3235_v5, %v3667_v14 }
 0x294   : > { %v1753_v30 = vadd.f32 %v1752_v40, %v1750_v29  ;;  %v1852_v29 = vrot.slane %v3218_v10, %v3641_v6  ;;  %v2584_v40 = vrot.slane %v3236_v60, %v3667_v14 }
 0x296   : > { %v1754_v61 = vadd.f32 %v1753_v30, %v1751_v42  ;;  %v1818_v42 = vrot.slane %v1805_v32, %v3669_v15  ;;  %v2546_v30 = vrot.slane %v3235_v5, %v3643_v7 }
 0x298   : > { %1755 = vadd.xlane.f32.xlu1 %v1754_v61  ;;  %v1822_v61 = vrot.slane %v1805_v32, %v3667_v14 }
 0x2a9   : > { %1774 = vperm.xlu1 %3442, %v1771_v33   ;;  %v2550_v33 = vrot.slane %v3235_v5, %v3669_v15 }
 0x325   : > { %v1756_v21 = vpop.xlane.xlu1 %1755 }
 0x326   : > { %v1757_v49 = vmul.f32 0.001953125, %v1756_v21 }
 0x328   : > { %v1759_v13 = vadd.f32 1e-05, %v1757_v49 }
 0x329   : > { %v1775_v52 = vpop.permute.xlu1 %1774 }
 0x32a   : > { %3446 = vrsqrt.f32 %v1759_v13  ;;  %v1860_v13 = vrot.slane %v3218_v10, %v3669_v15 }
 0x334   : > { %v3447_v51 = vpop.eup %3446 }
 0x335   : > { %v1761_v46 = vmul.f32 %v3447_v51, %v1758_v3  ;;  %v1864_v3 = vrot.slane %v3218_v10, %v3667_v14  ;;  %v2576_v51 = vrot.slane %v3236_v60, %v3643_v7 }
 0x337   : > { %1764 = vperm.xlu0 %3443, %v1761_v46  }
 0x3b6   : > { %v1765_v45 = vpop.permute.xlu0 %1764 }
 0x3b7   : > { %v1767_v53 = vmul.f32 %v1765_v45, %v1744_v23  ;;  %v1768_v55 = vmul.f32 %v1765_v45, %v1745_v35  ;;  %v1769_v56 = vmul.f32 %v1765_v45, %v1746_v37  ;;  %v1770_v59 = vmul.f32 %v1765_v45, %v1747_v1 }
 0x3b9   : > { %v1777_v57 = vadd.f32 %v1775_v52, %v1767_v53  ;;  %v1779_v58 = vadd.f32 %v1775_v52, %v1769_v56  ;;  %v1778_v43 = vadd.f32 %v1775_v52, %v1768_v55  ;;  %v1780_v27 = vadd.f32 %v1775_v52, %v1770_v59 }
 0x3ba   : > { %v2580_v53 = vrot.slane %v3236_v60, %v3669_v15 }
 0x3bb   : > { %vm1781_vm14 = vcmp.ge.f32.partialorder %v1777_v57, 0.0  ;;  %vm1783_vm15 = vcmp.ge.f32.partialorder %v1779_v58, 0.0  ;;  %v1785_v22 = vmul.f32 0.01, %v1777_v57  ;;  %v1787_v48 = vmul.f32 0.01, %v1779_v58 }
 0x3bc   : > { %v1786_v62 = vmul.f32 0.01, %v1778_v43  ;;  %vm1782_vm12 = vcmp.ge.f32.partialorder %v1778_v43, 0.0  ;;  %v1788_v50 = vmul.f32 0.01, %v1780_v27 }
 0x3bd   : > { %v4306_v34 = vsel %vm1781_vm14, %v1777_v57, %v1785_v22  ;;  %v4308_v63 = vsel %vm1783_vm15, %v1779_v58, %v1787_v48  ;;  %vm1784_vm14 = vcmp.ge.f32.partialorder %v1780_v27, 0.0 }
 0x3be   : > { %1797 = vrot.lane.b32.xlu0 %v4308_v63, %s3460_s13  ;;  %1793 = vrot.lane.b32.xlu1 %v4306_v34, %s3460_s13  ;;  %v4314_v9 = vsel %vm1782_vm12, %v1778_v43, %v1786_v62  ;;  %v4324_v18 = vsel %vm1784_vm14, %v1780_v27, %v1788_v50 }
 0x3c2   : > { %1877 = vrot.lane.b32.xlu0 %v4306_v34, %s3461_s14  ;;  %1795 = vrot.lane.b32.xlu1 %v4314_v9, %s3460_s13 }
 0x3c6   : > { %1919 = vrot.lane.b32.xlu0 %v4306_v34, %s3458_s11  ;;  %1835 = vrot.lane.b32.xlu1 %v4306_v34, %s3459_s12 }
 0x3ca   : > { %1883 = vrot.lane.b32.xlu0 %v4324_v18, %s3461_s14  ;;  %1837 = vrot.lane.b32.xlu1 %v4314_v9, %s3459_s12 }
 0x3ce   : > { %1881 = vrot.lane.b32.xlu0 %v4308_v63, %s3461_s14  ;;  %1799 = vrot.lane.b32.xlu1 %v4324_v18, %s3460_s13 }
 0x3d2   : > { %1961 = vrot.lane.b32.xlu0 %v4306_v34, %s3464_s17  ;;  %1841 = vrot.lane.b32.xlu1 %v4324_v18, %s3459_s12 }
 0x3d6   : > { %2003 = vrot.lane.b32.xlu0 %v4306_v34, %s3462_s15  ;;  %1839 = vrot.lane.b32.xlu1 %v4308_v63, %s3459_s12 }
 0x3da   : > { %1967 = vrot.lane.b32.xlu0 %v4324_v18, %s3464_s17  ;;  %1879 = vrot.lane.b32.xlu1 %v4314_v9, %s3461_s14  ;;  %s3249_s14 = sshll.u32 %s5138_s28, 5 }
 0x3de   : > { %1965 = vrot.lane.b32.xlu0 %v4308_v63, %s3464_s17  ;;  %1921 = vrot.lane.b32.xlu1 %v4314_v9, %s3458_s11 }
 0x3e2   : > { %2045 = vrot.lane.b32.xlu0 %v4306_v34, %s3465_s18  ;;  %1925 = vrot.lane.b32.xlu1 %v4324_v18, %s3458_s11 }
 0x3e6   : > { %2087 = vrot.lane.b32.xlu0 %v4306_v34, %s3463_s16  ;;  %1923 = vrot.lane.b32.xlu1 %v4308_v63, %s3458_s11  ;;  %s5082_s11 = smov 7  }
 0x3ea   : > { %2051 = vrot.lane.b32.xlu0 %v4324_v18, %s3465_s18  ;;  %1963 = vrot.lane.b32.xlu1 %v4314_v9, %s3464_s17  ;;  %s305_s17 = scalar_lea.vmem %s5062_s8, %s3249_s14 }
 0x3ee   : > { %2049 = vrot.lane.b32.xlu0 %v4308_v63, %s3465_s18  ;;  %2005 = vrot.lane.b32.xlu1 %v4314_v9, %s3462_s15 }
 0x3f2   : > { %2129 = vrot.lane.b32.xlu0 %v4306_v34, %s3468_s21  ;;  %2009 = vrot.lane.b32.xlu1 %v4324_v18, %s3462_s15 }
 0x3f6   : > { %2171 = vrot.lane.b32.xlu0 %v4306_v34, %s3466_s19  ;;  %2007 = vrot.lane.b32.xlu1 %v4308_v63, %s3462_s15 }
 0x3fa   : > { %2135 = vrot.lane.b32.xlu0 %v4324_v18, %s3468_s21  ;;  %2047 = vrot.lane.b32.xlu1 %v4314_v9, %s3465_s18 }
 0x3fe   : > { %2133 = vrot.lane.b32.xlu0 %v4308_v63, %s3468_s21  ;;  %2089 = vrot.lane.b32.xlu1 %v4314_v9, %s3463_s16 }
 0x402   : > { %2213 = vrot.lane.b32.xlu0 %v4306_v34, %s3469_s22  ;;  %2093 = vrot.lane.b32.xlu1 %v4324_v18, %s3463_s16 }
 0x406   : > { %2255 = vrot.lane.b32.xlu0 %v4306_v34, %s5082_s11  ;;  %2091 = vrot.lane.b32.xlu1 %v4308_v63, %s3463_s16 }
 0x40a   : > { %2219 = vrot.lane.b32.xlu0 %v4324_v18, %s3469_s22  ;;  %2131 = vrot.lane.b32.xlu1 %v4314_v9, %s3468_s21 }
 0x40e   : > { %2217 = vrot.lane.b32.xlu0 %v4308_v63, %s3469_s22  ;;  %2173 = vrot.lane.b32.xlu1 %v4314_v9, %s3466_s19 }
 0x412   : > { %2297 = vrot.lane.b32.xlu0 %v4306_v34, %s3471_s26  ;;  %2177 = vrot.lane.b32.xlu1 %v4324_v18, %s3466_s19 }
 0x416   : > { %2303 = vrot.lane.b32.xlu0 %v4324_v18, %s3471_s26  ;;  %2175 = vrot.lane.b32.xlu1 %v4308_v63, %s3466_s19 }
 0x41a   : > { %2371 = vrot.lane.b32.xlu0 %v4314_v9, %s3472_s29  ;;  %2215 = vrot.lane.b32.xlu1 %v4314_v9, %s3469_s22 }
 0x41e   : > { %2413 = vrot.lane.b32.xlu0 %v4314_v9, %s3470_s25  ;;  %2257 = vrot.lane.b32.xlu1 %v4314_v9, %s5082_s11 }
 0x422   : > { %2369 = vrot.lane.b32.xlu0 %v4306_v34, %s3472_s29  ;;  %2261 = vrot.lane.b32.xlu1 %v4324_v18, %s5082_s11 }
 0x426   : > { %2375 = vrot.lane.b32.xlu0 %v4324_v18, %s3472_s29  ;;  %2259 = vrot.lane.b32.xlu1 %v4308_v63, %s5082_s11 }
 0x42a   : > { %2455 = vrot.lane.b32.xlu0 %v4314_v9, %s3474_s9  ;;  %2299 = vrot.lane.b32.xlu1 %v4314_v9, %s3471_s26 }
 0x42e   : > { %2497 = vrot.lane.b32.xlu0 %v4314_v9, %s3473_s10  ;;  %2301 = vrot.lane.b32.xlu1 %v4308_v63, %s3471_s26 }
 0x430   : > { %v1798_v4 = vpop.permute.xlu0 %1797  ;;  %v1794_v8 = vpop.permute.xlu1 %1793 }
 0x432   : > { %2453 = vrot.lane.b32.xlu0 %v4306_v34, %s3474_s9  ;;  %2373 = vrot.lane.b32.xlu1 %v4308_v63, %s3472_s29 }
 0x434   : > { %v4434_v54 = vpop.permute.xlu0 %1877  ;;  %v1796_v16 = vpop.permute.xlu1 %1795 }
 0x435   : > { %v1803_v24 = vsel %vm324_vm2, %v1794_v8, %v1796_v16  ;;  %v1802_v46 = vsel %vm324_vm2, %v1796_v16, %v1798_v4 }
 0x436   : > { %2459 = vrot.lane.b32.xlu0 %v4324_v18, %s3474_s9  ;;  %2415 = vrot.lane.b32.xlu1 %v4308_v63, %s3470_s25  ;;  %v1828_v2 = vmul.f32 %v1814_v12, %v1803_v24  ;;  %v4466_v44 = vmul.f32 %v2542_v41, %v1803_v24  ;;  %v1829_v43 = vmul.f32 %v1818_v42, %v1802_v46  ;;  %v4532_v12 = vld [vmem:[%s5055_s1 + $0x45] ss:$8 sm:$0xf] }
 0x437   : > { %v4506_v22 = vmul.f32 %v2546_v30, %v1802_v46 }
 0x438   : > { %v4452_v11 = vpop.permute.xlu0 %1919  ;;  %v1836_v17 = vpop.permute.xlu1 %1835 }
 0x43a   : > { %2411 = vrot.lane.b32.xlu1 %v4306_v34, %s3470_s25 }
 0x43c   : > { %v4462_v36 = vpop.permute.xlu0 %1883  ;;  %v1838_v26 = vpop.permute.xlu1 %1837 }
 0x43d   : > { %v1845_v28 = vsel %vm367_vm1, %v1836_v17, %v1838_v26 }
 0x43e   : > { %v1870_v31 = vmul.f32 %v1856_v0, %v1845_v28  ;;  %v4468_v25 = vmul.f32 %v2572_v19, %v1845_v28  ;;  %2417 = vrot.lane.b32.xlu1 %v4324_v18, %s3470_s25 }
 0x440   : > { %v4474_v35 = vpop.permute.xlu0 %1881  ;;  %v1800_v37 = vpop.permute.xlu1 %1799  ;;  %v3310_v1 = vpack.c.bf16 %v1870_v31, %v1828_v2  ;;  %v3219_v2 = vld [vmem:[%s5055_s1 + $0x2] ss:$8 sm:$0xf]  ;;  %v3237_v31 = vld [vmem:[%s5055_s1 + $0x44] ss:$8 sm:$0xf] }
 0x441   : > { %v1804_v47 = vsel %vm324_vm2, %v1800_v37, %v1794_v8  ;;  %v1801_v45 = vsel %vm324_vm2, %v1798_v4, %v1800_v37  ;;  %v1898_v37 = vrot.slane %v3219_v2, %v3643_v7  ;;  %v2614_v42 = vrot.slane %v3237_v31, %v3667_v14 }
 0x442   : > { %3311 = vmatprep.subr.bf16.mxu0 %v3310_v1  ;;  %2457 = vrot.lane.b32.xlu1 %v4308_v63, %s3474_s9  ;;  %v1827_v55 = vmul.f32 %v1810_v38, %v1804_v47  ;;  %v4500_v56 = vmul.f32 %v2554_v39, %v1804_v47  ;;  %v1830_v50 = vmul.f32 %v1822_v61, %v1801_v45  ;;  %vm5095_vm2 = vcmp.lt.s32.totalorder %v3678_v20, 121 }
 0x443   : > { %v4512_v4 = vmul.f32 %v2550_v33, %v1801_v45  ;;  %v2602_v1 = vrot.slane %v3237_v31, %v3641_v6  ;;  %v2632_v39 = vrot.slane %v4532_v12, %v3641_v6  ;;  %v1906_v30 = vrot.slane %v3219_v2, %v3667_v14 }
 0x444   : > { %v4488_v21 = vpop.permute.xlu0 %1961  ;;  %v1842_v49 = vpop.permute.xlu1 %1841  ;;  %v1888_v33 = vsel %vm423_vm3, %v4462_v36, %v4434_v54 }
 0x445   : > { %v1846_v52 = vsel %vm367_vm1, %v1842_v49, %v1836_v17  ;;  %v4527_v17 = vld [vmem:[%s5055_s1 + $0x3] ss:$8 sm:$0xf] }
 0x446   : > { %v1869_v57 = vmul.f32 %v1852_v29, %v1846_v52  ;;  %v4502_v58 = vmul.f32 %v2584_v40, %v1846_v52  ;;  %2499 = vrot.lane.b32.xlu1 %v4308_v63, %s3473_s10  ;;  %v1940_v38 = vrot.slane %v4527_v17, %v3643_v7  ;;  %v1894_v40 = vrot.slane %v3219_v2, %v3641_v6 }
 0x448   : > { %v3312_v48 = vpack.c.bf16 %v1869_v57, %v1827_v55  ;;  %v4508_v59 = vpop.permute.xlu0 %2003  ;;  %v1840_v62 = vpop.permute.xlu1 %1839  ;;  %v2606_v55 = vrot.slane %v3237_v31, %v3643_v7  ;;  %v1944_v57 = vrot.slane %v4527_v17, %v3669_v15 }
 0x449   : > { %v1843_v8 = vsel %vm367_vm1, %v1840_v62, %v1842_v49  ;;  %v1844_v16 = vsel %vm367_vm1, %v1838_v26, %v1840_v62  ;;  %vm2917_vm1 = vcmask 719872  }
 0x44a   : > { %v1871_v32 = vmul.f32 %v1860_v13, %v1844_v16  ;;  %v1872_v5 = vmul.f32 %v1864_v3, %v1843_v8  ;;  %v4518_v10 = vmul.f32 %v2576_v51, %v1844_v16  ;;  %v4520_v60 = vmul.f32 %v2580_v53, %v1843_v8  ;;  %3313 = vmatpush1.bf16.msra.mxu0 %v3312_v48 }
 0x44b   : > { %2495 = vrot.lane.b32.xlu1 %v4306_v34, %s3473_s10  ;;  %v1936_v13 = vrot.slane %v4527_v17, %v3641_v6  ;;  %v2644_v3 = vrot.slane %v4532_v12, %v3667_v14  ;;  %v2610_v53 = vrot.slane %v3237_v31, %v3669_v15  ;;  %v1948_v16 = vrot.slane %v4527_v17, %v3667_v14 }
 0x44c   : > { %v3364_v41 = vpack.c.bf16 %v1871_v32, %v1829_v43  ;;  %v4536_v19 = vpop.permute.xlu0 %1967  ;;  %v1880_v24 = vpop.permute.xlu1 %1879  ;;  %v3362_v26 = vpack.c.bf16 %v1872_v5, %v1830_v50  ;;  %v1885_v43 = vsel %vm423_vm3, %v4474_v35, %v4462_v36  ;;  %v1911_v32 = vmul.f32 %v1894_v40, %v1888_v33 }
 0x44d   : > { %v1887_v29 = vsel %vm423_vm3, %v4434_v54, %v1880_v24  ;;  %v1902_v54 = vrot.slane %v3219_v2, %v3669_v15  ;;  %v2640_v36 = vrot.slane %v4532_v12, %v3669_v15  ;;  %v1886_v2 = vsel %vm423_vm3, %v1880_v24, %v4474_v35 }
 0x44e   : > { %3363 = vmatprep.subr.bf16.mxu1 %v3362_v26  ;;  %v1912_v51 = vmul.f32 %v1898_v37, %v1887_v29  ;;  %v4573_v46 = vmul.f32 %v2602_v1, %v1887_v29  ;;  %v4599_v26 = vmul.f32 %v2614_v42, %v1888_v33  ;;  %v1914_v17 = vmul.f32 %v1906_v30, %v1885_v43 }
 0x44f   : > { %2501 = vrot.lane.b32.xlu1 %v4324_v18, %s3473_s10  ;;  %3365 = vmatpush1.bf16.msra.mxu1 %v3364_v41  ;;  %v2636_v41 = vrot.slane %v4532_v12, %v3643_v7  ;;  %v4609_v1 = vmul.f32 %v2610_v53, %v1885_v43  ;;  %v1913_v35 = vmul.f32 %v1902_v54, %v1886_v2  ;;  %v3221_v43 = vld [vmem:[%s5055_s1 + $0x4] ss:$8 sm:$0xf] }
 0x450   : > { %v4560_v61 = vpop.permute.xlu0 %1965  ;;  %v1922_v47 = vpop.permute.xlu1 %1921  ;;  %v4615_v24 = vmul.f32 %v2606_v55, %v1886_v2  ;;  %v1986_v53 = vrot.slane %v3221_v43, %v3669_v15 }
 0x451   : > { %v1929_v49 = vsel %vm467_vm0, %v4452_v11, %v1922_v47  ;;  %5083 = vst [vmem:[#allocation4_spill] sm:$0xff] %v4609_v1 }
 0x452   : > { %v1954_v45 = vmul.f32 %v1940_v38, %v1929_v49  ;;  %v4575_v52 = vmul.f32 %v2632_v39, %v1929_v49 }
 0x454   : > { %v4588_v62 = vpop.permute.xlu0 %2045  ;;  %v1926_v50 = vpop.permute.xlu1 %1925  ;;  %v3314_v8 = vpack.c.bf16 %v1954_v45, %v1912_v51  ;;  %v3240_v51 = vld [vmem:[%s5055_s1 + $0x47] ss:$8 sm:$0xf] }
 0x455   : > { %v1930_v5 = vsel %vm467_vm0, %v1926_v50, %v4452_v11  ;;  %v2808_v11 = vld [vmem:[%s5059_s5 + $0x8] sm:$0xff] }
 0x456   : > { %v1953_v31 = vmul.f32 %v1936_v13, %v1930_v5  ;;  %v4604_v37 = vmul.f32 %v2644_v3, %v1930_v5  ;;  %3315 = vmatprep.subr.bf16.mxu0 %v3314_v8  ;;  %3244 = vmatprep.mubr.msk.f32.mxu0 %vm2917_vm1, %v2808_v11  ;;  %v3222_v3 = vld [vmem:[%s5055_s1 + $0x5] ss:$8 sm:$0xf]  ;;  %v1982_v8 = vrot.slane %v3221_v43, %v3643_v7 }
 0x457   : > { %3245 = vmatprep.mubr.msk.f32.mxu1 %vm2917_vm1, %v2808_v11  ;;  %v2692_v5 = vrot.slane %v3240_v51, %v3641_v6  ;;  %v2028_v29 = vrot.slane %v3222_v3, %v3669_v15 }
 0x458   : > { %v3316_v38 = vpack.c.bf16 %v1953_v31, %v1911_v32  ;;  %v4611_v12 = vpop.permute.xlu0 %2087  ;;  %v1924_v39 = vpop.permute.xlu1 %1923  ;;  %v2024_v32 = vrot.slane %v3222_v3, %v3643_v7  ;;  %v1990_v31 = vrot.slane %v3221_v43, %v3667_v14 }
 0x459   : > { %v1927_v40 = vsel %vm467_vm0, %v1924_v39, %v1926_v50  ;;  %v1928_v42 = vsel %vm467_vm0, %v1922_v47, %v1924_v39  ;;  %v3239_v50 = vld [vmem:[%s5055_s1 + $0x46] ss:$8 sm:$0xf]  ;;  %vm5094_vm0 = vcmp.lt.s32.totalorder %v3678_v20, 127 }
 0x45a   : > { %v1955_v30 = vmul.f32 %v1944_v57, %v1928_v42  ;;  %v1956_v33 = vmul.f32 %v1948_v16, %v1927_v40  ;;  %v4621_v49 = vmul.f32 %v2636_v41, %v1928_v42  ;;  %v4623_v13 = vmul.f32 %v2640_v36, %v1927_v40  ;;  %3317 = vmatpush1.bf16.msra.mxu0 %v3316_v38  ;;  %vm5096_vm3 = vmmov %vm5094_vm0 }
 0x45b   : > { %v2662_v16 = vrot.slane %v3239_v50, %v3641_v6  ;;  %v1978_v36 = vrot.slane %v3221_v43, %v3641_v6  ;;  %v2674_v2 = vrot.slane %v3239_v50, %v3667_v14  ;;  %v1972_v38 = vsel %vm523_vm6, %v4536_v19, %v4488_v21 }
 0x45c   : > { %v3368_v45 = vpack.c.bf16 %v1955_v30, %v1913_v35  ;;  %v4633_v47 = vpop.permute.xlu0 %2051  ;;  %v1964_v54 = vpop.permute.xlu1 %1963  ;;  %v3366_v55 = vpack.c.bf16 %v1956_v33, %v1914_v17  ;;  %v2020_v35 = vrot.slane %v3222_v3, %v3641_v6  ;;  %v2704_v40 = vrot.slane %v3240_v51, %v3667_v14 }
 0x45d   : > { %v1971_v41 = vsel %vm523_vm6, %v4488_v21, %v1964_v54  ;;  %v2666_v21 = vrot.slane %v3239_v50, %v3643_v7  ;;  %v1969_v43 = vsel %vm523_vm6, %v4560_v61, %v4536_v19 }
 0x45e   : > { %3367 = vmatprep.subr.bf16.mxu1 %v3366_v55  ;;  %v1996_v42 = vmul.f32 %v1982_v8, %v1971_v41  ;;  %v4664_v30 = vmul.f32 %v2662_v16, %v1971_v41  ;;  %v2670_v55 = vrot.slane %v3239_v50, %v3669_v15  ;;  %v2032_v16 = vrot.slane %v3222_v3, %v3667_v14 }
 0x45f   : > { %3369 = vmatpush1.bf16.msra.mxu1 %v3368_v45  ;;  %v2700_v41 = vrot.slane %v3240_v51, %v3669_v15  ;;  %v1970_v3 = vsel %vm523_vm6, %v1964_v54, %v4560_v61  ;;  %vm5099_vm6 = vmmov %vm5094_vm0 }
 0x460   : > { %v4653_v17 = vpop.permute.xlu0 %2049  ;;  %v2006_v11 = vpop.permute.xlu1 %2005  ;;  %v4693_v0 = vmul.f32 %v2670_v55, %v1969_v43  ;;  %v3224_v55 = vld [vmem:[%s5055_s1 + $0x7] ss:$8 sm:$0xf] }
 0x461   : > { %v2013_v39 = vsel %vm567_vm4, %v4508_v59, %v2006_v11 }
 0x462   : > { %v2038_v33 = vmul.f32 %v2024_v32, %v2013_v39  ;;  %v4666_v45 = vmul.f32 %v2692_v5, %v2013_v39  ;;  %v2696_v32 = vrot.slane %v3240_v51, %v3643_v7  ;;  %v1995_v5 = vmul.f32 %v1978_v36, %v1972_v38  ;;  %5086 = vst [vmem:[#allocation7_spill] sm:$0xff] %v4693_v0 }
 0x463   : > { %v4686_v39 = vmul.f32 %v2674_v2, %v1972_v38  ;;  %v1998_v36 = vmul.f32 %v1990_v31, %v1969_v43  ;;  %v1997_v51 = vmul.f32 %v1986_v53, %v1970_v3  ;;  %v4699_v2 = vmul.f32 %v2666_v21, %v1970_v3  ;;  %v3242_v53 = vld [vmem:[%s5055_s1 + $0x61] ss:$8 sm:$0xf] }
 0x464   : > { %v4674_v48 = vpop.permute.xlu0 %2129  ;;  %v2010_v27 = vpop.permute.xlu1 %2009  ;;  %v3318_v8 = vpack.c.bf16 %v2038_v33, %v1996_v42 }
 0x465   : > { %v2014_v50 = vsel %vm567_vm4, %v2010_v27, %v4508_v59  ;;  %5084 = vst [vmem:[#allocation5_spill] sm:$0xff] %v4686_v39 }
 0x466   : > { %v2037_v42 = vmul.f32 %v2020_v35, %v2014_v50  ;;  %v4691_v33 = vmul.f32 %v2704_v40, %v2014_v50  ;;  %3319 = vmatprep.subr.bf16.mxu0 %v3318_v8  ;;  %v2108_v50 = vrot.slane %v3224_v55, %v3643_v7 }
 0x468   : > { %5085 = vst [vmem:[#allocation6_spill] sm:$0xff] %v4691_v33  ;;  %v3320_v19 = vpack.c.bf16 %v2037_v42, %v1995_v5  ;;  %v4695_v57 = vpop.permute.xlu0 %2171  ;;  %v2008_v23 = vpop.permute.xlu1 %2007 }
 0x469   : > { %v2011_v61 = vsel %vm567_vm4, %v2008_v23, %v2010_v27  ;;  %v2012_v54 = vsel %vm567_vm4, %v2006_v11, %v2008_v23  ;;  %vm5097_vm4 = vmmov %vm5095_vm2 }
 0x46a   : > { %v2039_v38 = vmul.f32 %v2028_v29, %v2012_v54  ;;  %v2040_v31 = vmul.f32 %v2032_v16, %v2011_v61  ;;  %v4705_v35 = vmul.f32 %v2696_v32, %v2012_v54  ;;  %v4707_v40 = vmul.f32 %v2700_v41, %v2011_v61  ;;  %3321 = vmatpush1.bf16.msra.mxu0 %v3320_v19  ;;  %v3223_v16 = vld [vmem:[%s5055_s1 + $0x6] ss:$8 sm:$0xf]  ;;  %v3241_v32 = vld [vmem:[%s5055_s1 + $0x60] ss:$8 sm:$0xf] }
 0x46b   : > { %v2066_v5 = vrot.slane %v3223_v16, %v3643_v7  ;;  %v2722_v43 = vrot.slane %v3241_v32, %v3641_v6  ;;  %v2752_v41 = vrot.slane %v3242_v53, %v3641_v6  ;;  %v2062_v42 = vrot.slane %v3223_v16, %v3641_v6 }
 0x46c   : > { %5087 = vst [vmem:[#allocation8_spill] sm:$0xff] %v4707_v40  ;;  %v3372_v21 = vpack.c.bf16 %v2039_v38, %v1997_v51  ;;  %v4717_v23 = vpop.permute.xlu0 %2135  ;;  %v2048_v29 = vpop.permute.xlu1 %2047  ;;  %v3370_v11 = vpack.c.bf16 %v2040_v31, %v1998_v36  ;;  %v2734_v36 = vrot.slane %v3241_v32, %v3667_v14  ;;  %v2074_v19 = vrot.slane %v3223_v16, %v3667_v14 }
 0x46d   : > { %v2055_v3 = vsel %vm623_vm7, %v4588_v62, %v2048_v29  ;;  %v2056_v54 = vsel %vm623_vm7, %v4633_v47, %v4588_v62  ;;  %v2104_v31 = vrot.slane %v3224_v55, %v3641_v6  ;;  %v2730_v28 = vrot.slane %v3241_v32, %v3669_v15 }
 0x46e   : > { %3371 = vmatprep.subr.bf16.mxu1 %v3370_v11  ;;  %v2080_v11 = vmul.f32 %v2066_v5, %v2055_v3  ;;  %v4748_v27 = vmul.f32 %v2722_v43, %v2055_v3  ;;  %v2070_v0 = vrot.slane %v3223_v16, %v3669_v15  ;;  %v2726_v62 = vrot.slane %v3241_v32, %v3643_v7 }
 0x46f   : > { %3373 = vmatpush1.bf16.msra.mxu1 %v3372_v21  ;;  %v2764_v21 = vrot.slane %v3242_v53, %v3667_v14  ;;  %v2112_v40 = vrot.slane %v3224_v55, %v3669_v15  ;;  %v2116_v43 = vrot.slane %v3224_v55, %v3667_v14  ;;  %v2053_v16 = vsel %vm623_vm7, %v4653_v17, %v4633_v47 }
 0x470   : > { %v4737_v51 = vpop.permute.xlu0 %2133  ;;  %v2090_v61 = vpop.permute.xlu1 %2089  ;;  %5088 = vst [vmem:[#allocation9_spill] sm:$0xff] %v4748_v27  ;;  %v2760_v3 = vrot.slane %v3242_v53, %v3669_v15  ;;  %v4777_v39 = vmul.f32 %v2730_v28, %v2053_v16 }
 0x471   : > { %v2097_v38 = vsel %vm667_vm5, %v4611_v12, %v2090_v61 }
 0x472   : > { %v2122_v59 = vmul.f32 %v2108_v50, %v2097_v38  ;;  %v4750_v8 = vmul.f32 %v2752_v41, %v2097_v38  ;;  %v2756_v50 = vrot.slane %v3242_v53, %v3643_v7  ;;  %v2079_v41 = vmul.f32 %v2062_v42, %v2056_v54  ;;  %5090 = vst [vmem:[#allocation11_spill] sm:$0xff] %v4777_v39 }
 0x473   : > { %v4770_v38 = vmul.f32 %v2734_v36, %v2056_v54  ;;  %v2082_v42 = vmul.f32 %v2074_v19, %v2053_v16 }
 0x474   : > { %5089 = vst [vmem:[#allocation10_spill] sm:$0xff] %v4750_v8  ;;  %v4758_v33 = vpop.permute.xlu0 %2213  ;;  %v2094_v1 = vpop.permute.xlu1 %2093  ;;  %v3322_v5 = vpack.c.bf16 %v2122_v59, %v2080_v11  ;;  %v2054_v59 = vsel %vm623_vm7, %v2048_v29, %v4653_v17  ;;  %vm5100_vm7 = vmmov %vm5095_vm2 }
 0x475   : > { %v2098_v32 = vsel %vm667_vm5, %v2094_v1, %v4611_v12  ;;  %v2081_v53 = vmul.f32 %v2070_v0, %v2054_v59  ;;  %v4783_v36 = vmul.f32 %v2726_v62, %v2054_v59 }
 0x476   : > { %v2121_v55 = vmul.f32 %v2104_v31, %v2098_v32  ;;  %v4775_v11 = vmul.f32 %v2764_v21, %v2098_v32  ;;  %3323 = vmatprep.subr.bf16.mxu0 %v3322_v5  ;;  %v3226_v21 = vld [vmem:[%s5055_s1 + $0x21] ss:$8 sm:$0xf] }
 0x478   : > { %v3324_v47 = vpack.c.bf16 %v2121_v55, %v2079_v41  ;;  %v4779_v27 = vpop.permute.xlu0 %2255  ;;  %v2092_v8 = vpop.permute.xlu1 %2091 }
 0x479   : > { %v2095_v17 = vsel %vm667_vm5, %v2092_v8, %v2094_v1  ;;  %v2096_v29 = vsel %vm667_vm5, %v2090_v61, %v2092_v8  ;;  %v3225_v8 = vld [vmem:[%s5055_s1 + $0x20] ss:$8 sm:$0xf]  ;;  %vm5098_vm5 = vmmov %vm5094_vm0 }
 0x47a   : > { %v2123_v54 = vmul.f32 %v2112_v40, %v2096_v29  ;;  %v2124_v19 = vmul.f32 %v2116_v43, %v2095_v17  ;;  %v4789_v28 = vmul.f32 %v2756_v50, %v2096_v29  ;;  %v4791_v31 = vmul.f32 %v2760_v3, %v2095_v17  ;;  %3325 = vmatpush1.bf16.msra.mxu0 %v3324_v47 }
 0x47b   : > { %v2150_v61 = vrot.slane %v3225_v8, %v3643_v7  ;;  %v2192_v43 = vrot.slane %v3226_v21, %v3643_v7  ;;  %v2146_v59 = vrot.slane %v3225_v8, %v3641_v6  ;;  %v2188_v47 = vrot.slane %v3226_v21, %v3641_v6 }
 0x47c   : > { %5091 = vst [vmem:[#allocation12_spill] sm:$0xff] %v4791_v31  ;;  %v3376_v0 = vpack.c.bf16 %v2123_v54, %v2081_v53  ;;  %v4798_v5 = vpop.permute.xlu0 %2219  ;;  %v2132_v1 = vpop.permute.xlu1 %2131  ;;  %v3374_v41 = vpack.c.bf16 %v2124_v19, %v2082_v42  ;;  %v4822_v53 = vsel %vm723_vm10, %v4717_v23, %v4674_v48  ;;  %v2158_v54 = vrot.slane %v3225_v8, %v3667_v14 }
 0x47d   : > { %v4810_v50 = vsel %vm723_vm10, %v4674_v48, %v2132_v1  ;;  %5092 = vst [vmem:[#allocation13_spill] sm:$0xff] %v4822_v53  ;;  %v2154_v19 = vrot.slane %v3225_v8, %v3669_v15  ;;  %v4836_v48 = vsel %vm723_vm10, %v4737_v51, %v4717_v23  ;;  %v4841_v8 = vsel %vm723_vm10, %v2132_v1, %v4737_v51  ;;  %v3228_v51 = vld [vmem:[%s5055_s1 + $0x23] ss:$8 sm:$0xf] }
 0x47e   : > { %3375 = vmatprep.subr.bf16.mxu1 %v3374_v41  ;;  %v2164_v55 = vmul.f32 %v2150_v61, %v4810_v50  ;;  %v2163_v41 = vmul.f32 %v2146_v59, %v4822_v53  ;;  %5093 = vst [vmem:[#allocation14_spill] sm:$0xff] %v4836_v48  ;;  %v2284_v12 = vrot.slane %v3228_v51, %v3667_v14  ;;  %vm5103_vm10 = vcmp.lt.s32.totalorder %v3678_v20, 119 }
 0x47f   : > { %3377 = vmatpush1.bf16.msra.mxu1 %v3376_v0  ;;  %v2165_v23 = vmul.f32 %v2154_v19, %v4841_v8  ;;  %vm5108_vm14 = vmmov %vm5103_vm10 }
 0x480   : > { %v2174_v16 = vpop.permute.xlu1 %2173  ;;  %v2218_v32 = vpop.permute.xlu0 %2217  ;;  %vm5109_vm1 = vmmov %vm5103_vm10 }
 0x481   : > { %v2181_v3 = vsel %vm767_vm8, %v4695_v57, %v2174_v16 }
 0x482   : > { %v2206_v42 = vmul.f32 %v2192_v43, %v2181_v3  ;;  %v2196_v43 = vrot.slane %v3226_v21, %v3669_v15  ;;  %v2200_v3 = vrot.slane %v3226_v21, %v3667_v14 }
 0x484   : > { %v2178_v17 = vpop.permute.xlu1 %2177  ;;  %v3326_v29 = vpack.c.bf16 %v2206_v42, %v2164_v55 }
 0x485   : > { %v2182_v0 = vsel %vm767_vm8, %v2178_v17, %v4695_v57  ;;  %v4843_v57 = vpop.permute.xlu0 %2297 }
 0x486   : > { %v2205_v61 = vmul.f32 %v2188_v47, %v2182_v0  ;;  %3327 = vmatprep.subr.bf16.mxu0 %v3326_v29  ;;  %v2166_v47 = vmul.f32 %v2158_v54, %v4836_v48  ;;  %v2276_v54 = vrot.slane %v3228_v51, %v3643_v7 }
 0x488   : > { %v3328_v59 = vpack.c.bf16 %v2205_v61, %v2163_v41  ;;  %v2176_v55 = vpop.permute.xlu1 %2175 }
 0x489   : > { %v2179_v42 = vsel %vm767_vm8, %v2176_v55, %v2178_v17  ;;  %v2180_v21 = vsel %vm767_vm8, %v2174_v16, %v2176_v55  ;;  %v3227_v17 = vld [vmem:[%s5055_s1 + $0x22] ss:$8 sm:$0xf]  ;;  %v2304_v62 = vpop.permute.xlu0 %2303  ;;  %vm5101_vm8 = vmmov %vm5095_vm2 }
 0x48a   : > { %v2207_v29 = vmul.f32 %v2196_v43, %v2180_v21  ;;  %v2208_v0 = vmul.f32 %v2200_v3, %v2179_v42  ;;  %3329 = vmatpush1.bf16.msra.mxu0 %v3328_v59  ;;  %v2234_v16 = vrot.slane %v3227_v17, %v3643_v7  ;;  %v2230_v59 = vrot.slane %v3227_v17, %v3641_v6 }
 0x48b   : > { %v2272_v21 = vrot.slane %v3228_v51, %v3641_v6 }
 0x48c   : > { %v3380_v1 = vpack.c.bf16 %v2207_v29, %v2165_v23  ;;  %v2216_v41 = vpop.permute.xlu1 %2215  ;;  %v3378_v61 = vpack.c.bf16 %v2208_v0, %v2166_v47  ;;  %v2224_v47 = vsel %vm823_vm11, %v4798_v5, %v4758_v33 }
 0x48d   : > { %v2223_v19 = vsel %vm823_vm11, %v4758_v33, %v2216_v41  ;;  %v4871_v23 = vpop.permute.xlu0 %2371  ;;  %v2222_v40 = vsel %vm823_vm11, %v2216_v41, %v2218_v32 }
 0x48e   : > { %3379 = vmatprep.subr.bf16.mxu1 %v3378_v61  ;;  %v2248_v55 = vmul.f32 %v2234_v16, %v2223_v19  ;;  %v3229_v61 = vld [vmem:[%s5055_s1 + $0x24] ss:$8 sm:$0xf]  ;;  %v3230_v16 = vld [vmem:[%s5055_s1 + $0x25] ss:$8 sm:$0xf]  ;;  %v2280_v19 = vrot.slane %v3228_v51, %v3669_v15 }
 0x48f   : > { %3381 = vmatpush1.bf16.msra.mxu1 %v3380_v1  ;;  %v2242_v1 = vrot.slane %v3227_v17, %v3667_v14 }
 0x490   : > { %v2258_v43 = vpop.permute.xlu1 %2257 }
 0x491   : > { %v2265_v3 = vsel %vm867_vm9, %v4779_v27, %v2258_v43  ;;  %v2414_v53 = vpop.permute.xlu0 %2413 }
 0x492   : > { %v2290_v42 = vmul.f32 %v2276_v54, %v2265_v3  ;;  %v2238_v54 = vrot.slane %v3227_v17, %v3669_v15  ;;  %v2247_v3 = vmul.f32 %v2230_v59, %v2224_v47  ;;  %v2314_v17 = vrot.slane %v3229_v61, %v3641_v6 }
 0x494   : > { %v2262_v29 = vpop.permute.xlu1 %2261  ;;  %v3330_v0 = vpack.c.bf16 %v2290_v42, %v2248_v55  ;;  %v2221_v55 = vsel %vm823_vm11, %v2218_v32, %v4798_v5  ;;  %v2308_v32 = vsel %vm923_vm13, %v2304_v62, %v4843_v57  ;;  %v2249_v51 = vmul.f32 %v2238_v54, %v2222_v40 }
 0x495   : > { %v2266_v33 = vsel %vm867_vm9, %v2262_v29, %v4779_v27  ;;  %v2348_v27 = vrot.slane %v3230_v16, %v3643_v7  ;;  %v2250_v31 = vmul.f32 %v2242_v1, %v2221_v55  ;;  %v2331_v55 = vmul.f32 %v2314_v17, %v2308_v32 }
 0x496   : > { %v2289_v42 = vmul.f32 %v2272_v21, %v2266_v33  ;;  %3331 = vmatprep.subr.bf16.mxu0 %v3330_v0  ;;  %v2318_v21 = vrot.slane %v3229_v61, %v3643_v7  ;;  %v2344_v0 = vrot.slane %v3230_v16, %v3641_v6  ;;  %v2322_v40 = vrot.slane %v3229_v61, %v3669_v15 }
 0x498   : > { %v3332_v48 = vpack.c.bf16 %v2289_v42, %v2247_v3  ;;  %v2260_v39 = vpop.permute.xlu1 %2259  ;;  %v2361_v54 = vmul.f32 %v2344_v0, %v4306_v34 }
 0x499   : > { %v2263_v59 = vsel %vm867_vm9, %v2260_v39, %v2262_v29  ;;  %v2264_v5 = vsel %vm867_vm9, %v2258_v43, %v2260_v39  ;;  %v2352_v43 = vrot.slane %v3230_v16, %v3669_v15  ;;  %v2356_v29 = vrot.slane %v3230_v16, %v3667_v14 }
 0x49a   : > { %v2291_v41 = vmul.f32 %v2280_v19, %v2264_v5  ;;  %v2292_v47 = vmul.f32 %v2284_v12, %v2263_v59  ;;  %3333 = vmatpush1.bf16.msra.mxu0 %v3332_v48  ;;  %v2326_v12 = vrot.slane %v3229_v61, %v3667_v14  ;;  %v2362_v48 = vmul.f32 %v2348_v27, %v4314_v9 }
 0x49b   : > { %v3336_v59 = vpack.c.bf16 %v2361_v54, %v2331_v55  ;;  %v2363_v5 = vmul.f32 %v2352_v43, %v4308_v63  ;;  %v2364_v9 = vmul.f32 %v2356_v29, %v4324_v18  ;;  %vm5102_vm9 = vcmp.lt.s32.totalorder %v3678_v20, 120 }
 0x49c   : > { %v3384_v1 = vpack.c.bf16 %v2291_v41, %v2249_v51  ;;  %v2300_v33 = vpop.permute.xlu1 %2299  ;;  %v3382_v3 = vpack.c.bf16 %v2292_v47, %v2250_v31  ;;  %v2370_v31 = vpop.permute.xlu0 %2369  ;;  %v3232_v51 = vld [vmem:[%s5055_s1 + $0x27] ss:$8 sm:$0xf]  ;;  %vm5104_vm11 = vmmov %vm5102_vm9  ;;  %v5112_v20 = vpack.c.bf16 %v4621_v49, %v4615_v24 }
 0x49d   : > { %v2307_v39 = vsel %vm923_vm13, %v4843_v57, %v2300_v33  ;;  %v2432_v47 = vrot.slane %v3232_v51, %v3643_v7  ;;  %v2428_v43 = vrot.slane %v3232_v51, %v3641_v6  ;;  %v2379_v29 = vsel %vm5096_vm3, %v2370_v31, %v4871_v23  ;;  %vm5106_vm15 = vmmov %vm5102_vm9  ;;  %v5122_v49 = vld [vmem:[#allocation6_spill] sm:$0xff] }
 0x49e   : > { %v2332_v42 = vmul.f32 %v2318_v21, %v2307_v39  ;;  %3383 = vmatprep.subr.bf16.mxu1 %v3382_v3  ;;  %vm5107_vm12 = vmmov %vm5102_vm9 }
 0x49f   : > { %3385 = vmatpush1.bf16.msra.mxu1 %v3384_v1 }
 0x4a0   : > { %v2302_v19 = vpop.permute.xlu1 %2301  ;;  %v3334_v17 = vpack.c.bf16 %v2362_v48, %v2332_v42  ;;  %v2376_v41 = vpop.permute.xlu0 %2375 }
 0x4a1   : > { %v2305_v57 = vsel %vm923_vm13, %v2302_v19, %v2304_v62  ;;  %v2306_v16 = vsel %vm923_vm13, %v2300_v33, %v2302_v19  ;;  %v3231_v62 = vld [vmem:[%s5055_s1 + $0x26] ss:$8 sm:$0xf]  ;;  %vm5105_vm13 = vmmov %vm5103_vm10 }
 0x4a2   : > { %v2333_v21 = vmul.f32 %v2322_v40, %v2306_v16  ;;  %v2334_v32 = vmul.f32 %v2326_v12, %v2305_v57  ;;  %3335 = vmatprep.subr.bf16.mxu0 %v3334_v17  ;;  %v2390_v63 = vrot.slane %v3231_v62, %v3643_v7  ;;  %v2386_v33 = vrot.slane %v3231_v62, %v3641_v6 }
 0x4a3   : > { %3337 = vmatpush1.bf16.msra.mxu0 %v3336_v59  ;;  %v2398_v12 = vrot.slane %v3231_v62, %v3667_v14  ;;  %v2394_v48 = vrot.slane %v3231_v62, %v3669_v15  ;;  %v2436_v59 = vrot.slane %v3232_v51, %v3669_v15  ;;  %v2440_v57 = vrot.slane %v3232_v51, %v3667_v14 }
 0x4a4   : > { %v3388_v34 = vpack.c.bf16 %v2363_v5, %v2333_v21  ;;  %v2374_v61 = vpop.permute.xlu1 %2373  ;;  %v3386_v27 = vpack.c.bf16 %v2364_v9, %v2334_v32  ;;  %v2456_v3 = vpop.permute.xlu0 %2455  ;;  %v2403_v19 = vmul.f32 %v2386_v33, %v2379_v29  ;;  %v2380_v16 = vsel %vm5098_vm5, %v2376_v41, %v2370_v31  ;;  %v3234_v31 = vld [vmem:[%s5055_s1 + $0x41] ss:$8 sm:$0xf] }
 0x4a5   : > { %v2378_v18 = vsel %vm5094_vm0, %v4871_v23, %v2374_v61  ;;  %v2377_v23 = vsel %vm5099_vm6, %v2374_v61, %v2376_v41 }
 0x4a6   : > { %3387 = vmatprep.subr.bf16.mxu1 %v3386_v27  ;;  %v2404_v55 = vmul.f32 %v2390_v63, %v2378_v18  ;;  %v2405_v27 = vmul.f32 %v2394_v48, %v2377_v23 }
 0x4a7   : > { %3389 = vmatpush1.bf16.msra.mxu1 %v3388_v34  ;;  %v2406_v34 = vmul.f32 %v2398_v12, %v2380_v16 }
 0x4a8   : > { %v2416_v0 = vpop.permute.xlu1 %2415  ;;  %v2498_v5 = vpop.permute.xlu0 %2497 }
 0x4a9   : > { %v2420_v1 = vsel %vm5095_vm2, %v2414_v53, %v2416_v0 }
 0x4aa   : > { %v2446_v39 = vmul.f32 %v2432_v47, %v2420_v1  ;;  %v3233_v47 = vld [vmem:[%s5055_s1 + $0x40] ss:$8 sm:$0xf]  ;;  %v2516_v1 = vrot.slane %v3234_v31, %v3643_v7 }
 0x4ac   : > { %v2412_v42 = vpop.permute.xlu1 %2411  ;;  %v3338_v40 = vpack.c.bf16 %v2446_v39, %v2404_v55  ;;  %v2454_v18 = vpop.permute.xlu0 %2453 }
 0x4ad   : > { %v2421_v54 = vsel %vm5097_vm4, %v2412_v42, %v2414_v53  ;;  %v2463_v12 = vsel %vm5104_vm11, %v2454_v18, %v2456_v3 }
 0x4ae   : > { %v2445_v17 = vmul.f32 %v2428_v43, %v2421_v54  ;;  %3339 = vmatprep.subr.bf16.mxu0 %v3338_v40  ;;  %v2470_v43 = vrot.slane %v3233_v47, %v3641_v6  ;;  %v2512_v40 = vrot.slane %v3234_v31, %v3641_v6 }
 0x4b0   : > { %v3340_v21 = vpack.c.bf16 %v2445_v17, %v2403_v19  ;;  %v2418_v32 = vpop.permute.xlu1 %2417  ;;  %v2460_v48 = vpop.permute.xlu0 %2459  ;;  %v2482_v17 = vrot.slane %v3233_v47, %v3667_v14  ;;  %v2487_v16 = vmul.f32 %v2470_v43, %v2463_v12  ;;  %v5134_v43 = vld [vmem:[#allocation11_spill] sm:$0xff] }
 0x4b1   : > { %v2419_v9 = vsel %vm5100_vm7, %v2416_v0, %v2418_v32  ;;  %v2422_v53 = vsel %vm5101_vm8, %v2418_v32, %v2412_v42  ;;  %v2474_v0 = vrot.slane %v3233_v47, %v3643_v7  ;;  %v2524_v32 = vrot.slane %v3234_v31, %v3667_v14 }
 0x4b2   : > { %v2447_v62 = vmul.f32 %v2436_v59, %v2419_v9  ;;  %v2448_v63 = vmul.f32 %v2440_v57, %v2422_v53  ;;  %3341 = vmatpush1.bf16.msra.mxu0 %v3340_v21  ;;  %v2478_v59 = vrot.slane %v3233_v47, %v3669_v15  ;;  %v2520_v21 = vrot.slane %v3234_v31, %v3669_v15 }
 0x4b3   : > { %v5110_v31 = vpack.c.bf16 %v4518_v10, %v4506_v22  ;;  %v5114_v22 = vpack.c.bf16 %v4575_v52, %v4573_v46  ;;  %v5115_v10 = vpack.c.bf16 %v4705_v35, %v4699_v2  ;;  %v5118_v46 = vpack.c.bf16 %v4666_v45, %v4664_v30  ;;  %v5123_v2 = vld [vmem:[#allocation5_spill] sm:$0xff]  ;;  %v5125_v30 = vld [vmem:[#allocation10_spill] sm:$0xff] }
 0x4b4   : > { %v3392_v51 = vpack.c.bf16 %v2447_v62, %v2405_v27  ;;  %v2458_v61 = vpop.permute.xlu1 %2457  ;;  %v3390_v41 = vpack.c.bf16 %v2448_v63, %v2406_v34  ;;  %v5119_v52 = vpack.c.bf16 %v4789_v28, %v4783_v36  ;;  %v5126_v45 = vld [vmem:[#allocation9_spill] sm:$0xff]  ;;  %v5128_v36 = vld [vmem:[#allocation8_spill] sm:$0xff]  ;;  %v5129_v28 = vld [vmem:[#allocation7_spill] sm:$0xff] }
 0x4b5   : > { %v2462_v33 = vsel %vm5102_vm9, %v2456_v3, %v2458_v61  ;;  %v2464_v3 = vsel %vm5106_vm15, %v2460_v48, %v2454_v18  ;;  %v2461_v9 = vsel %vm5107_vm12, %v2458_v61, %v2460_v48  ;;  %v5111_v61 = vpack.c.bf16 %v4468_v25, %v4466_v44  ;;  %v3243_v25 = vld [vmem:[%s5055_s1 + $0x62] ss:$8 sm:$0xf] }
 0x4b6   : > { %3391 = vmatprep.subr.bf16.mxu1 %v3390_v41  ;;  %v2488_v29 = vmul.f32 %v2474_v0, %v2462_v33  ;;  %v2490_v62 = vmul.f32 %v2482_v17, %v2464_v3  ;;  %v2489_v63 = vmul.f32 %v2478_v59, %v2461_v9  ;;  %v5113_v0 = vpack.c.bf16 %v4502_v58, %v4500_v56  ;;  %v5132_v33 = vld [vmem:[#allocation13_spill] sm:$0xff] }
 0x4b7   : > { %3393 = vmatpush1.bf16.msra.mxu1 %v3392_v51  ;;  %v5116_v44 = vpack.c.bf16 %v4520_v60, %v4512_v4  ;;  %v5117_v56 = vpack.c.bf16 %v4604_v37, %v4599_v26  ;;  %v2786_v58 = vrot.slane %v3243_v25, %v3643_v7  ;;  %v5120_v4 = vld [vmem:[#allocation4_spill] sm:$0xff]  ;;  %v2782_v24 = vrot.slane %v3243_v25, %v3641_v6 }
 0x4b8   : > { %v2500_v55 = vpop.permute.xlu1 %2499  ;;  %v5121_v60 = vpack.c.bf16 %v4623_v13, %v5120_v4  ;;  %v5124_v26 = vpack.c.bf16 %v5122_v49, %v5123_v2  ;;  %v2794_v37 = vrot.slane %v3243_v25, %v3667_v14  ;;  %v5127_v35 = vpack.c.bf16 %v5125_v30, %v5126_v45 }
 0x4b9   : > { %v2504_v39 = vsel %vm5103_vm10, %v2498_v5, %v2500_v55  ;;  %v2800_v7 = vmul.f32 %v2786_v58, %v4841_v8  ;;  %v2799_v13 = vmul.f32 %v2782_v24, %v4810_v50  ;;  %v5131_v6 = vpack.c.bf16 %v4775_v11, %v4770_v38  ;;  %v2807_v8 = vld [vmem:[%s5059_s5] sm:$0xff]  ;;  %v5136_v50 = vld [vmem:[#allocation14_spill] sm:$0xff] }
 0x4ba   : > { %v2530_v42 = vmul.f32 %v2516_v1, %v2504_v39  ;;  %v5130_v1 = vpack.c.bf16 %v5128_v36, %v5129_v28  ;;  %v2790_v14 = vrot.slane %v3243_v25, %v3669_v15  ;;  %v5133_v39 = vld [vmem:[#allocation12_spill] sm:$0xff] }
 0x4bc   : > { %v3342_v19 = vpack.c.bf16 %v2530_v42, %v2488_v29  ;;  %v5135_v29 = vpack.c.bf16 %v5133_v39, %v5134_v43  ;;  %v2801_v42 = vmul.f32 %v2790_v14, %v5136_v50 }
 0x4bd   : > { %v2496_v54 = vpop.permute.xlu1 %2495 }
 0x4be   : > { %v2505_v57 = vsel %vm5105_vm13, %v2496_v54, %v2498_v5  ;;  %3343 = vmatprep.subr.bf16.mxu0 %v3342_v19 }
 0x4bf   : > { %v2529_v23 = vmul.f32 %v2512_v40, %v2505_v57 }
 0x4c1   : > { %v3344_v53 = vpack.c.bf16 %v2529_v23, %v2487_v16  ;;  %v2502_v34 = vpop.permute.xlu1 %2501 }
 0x4c2   : > { %v2503_v27 = vsel %vm5108_vm14, %v2500_v55, %v2502_v34  ;;  %v2506_v5 = vsel %vm5109_vm1, %v2502_v34, %v2496_v54  ;;  %v2802_v55 = vmul.f32 %v2794_v37, %v5132_v33 }
 0x4c3   : > { %v2531_v51 = vmul.f32 %v2520_v21, %v2503_v27  ;;  %v2532_v41 = vmul.f32 %v2524_v32, %v2506_v5  ;;  %3345 = vmatpush1.bf16.msra.mxu0 %v3344_v53  ;;  %v3096_v5 = vld [vmem:[%s5061_s7] sm:$0xff] }
 0x4c4   : > { %3347 = vmatprep.subr.bf16.mxu0 %v5110_v31 }
 0x4c5   : > { %v3396_v47 = vpack.c.bf16 %v2531_v51, %v2489_v63  ;;  %v3394_v18 = vpack.c.bf16 %v2532_v41, %v2490_v62  ;;  %v3083_v41 = vld [vmem:[%s5060_s6] sm:$0xff] }
 0x4c7   : > { %3349 = vmatpush1.bf16.msra.mxu0 %v5111_v61  ;;  %3395 = vmatprep.subr.bf16.mxu1 %v3394_v18 }
 0x4c8   : > { %3351 = vmatprep.subr.bf16.mxu0 %v5112_v20  ;;  %3397 = vmatpush1.bf16.msra.mxu1 %v3396_v47 }
 0x4c9   : > { %3399 = vmatprep.subr.bf16.mxu1 %v5113_v0 }
 0x4cb   : > { %3353 = vmatpush1.bf16.msra.mxu0 %v5114_v22 }
 0x4cc   : > { %3355 = vmatprep.subr.bf16.mxu0 %v5115_v10  ;;  %3401 = vmatpush1.bf16.msra.mxu1 %v5116_v44 }
 0x4cd   : > { %3403 = vmatprep.subr.bf16.mxu1 %v5117_v56 }
 0x4cf   : > { %3357 = vmatpush1.bf16.msra.mxu0 %v5118_v46 }
 0x4d0   : > { %3359 = vmatprep.subr.bf16.mxu0 %v5119_v52  ;;  %3405 = vmatpush1.bf16.msra.mxu1 %v5121_v60 }
 0x4d1   : > { %3407 = vmatprep.subr.bf16.mxu1 %v5124_v26 }
 0x4d3   : > { %3361 = vmatpush1.bf16.msra.mxu0 %v5127_v35 }
 0x4d4   : > { %2973 = vmatprep.subr.mxu0 %v2800_v7  ;;  %3409 = vmatpush1.bf16.msra.mxu1 %v5130_v1 }
 0x4d5   : > { %3411 = vmatprep.subr.bf16.mxu1 %v5131_v6 }
 0x4d7   : > { %2974 = vmatpush1.msra.mxu0 %v2799_v13 }
 0x4d8   : > { %3413 = vmatpush1.bf16.msra.mxu1 %v5135_v29  ;;  %2986 = vmatmul.mubr.f32.vlgmr.msra.gmra.mrb[2].mxu0 %v2807_v8 }
 0x4d9   : > { %3044 = vmatprep.subr.mxu1 %v2802_v55 }
 0x4dc   : > { %3045 = vmatpush1.msra.mxu1 %v2801_v42 }
 0x4dd   : > { %3057 = vmatmul.mubr.f32.vlgmr.msra.gmra.mrb[2].mxu1 %v2807_v8 }
 0x5ab   : > { %v2987_v38 = vpop.f32.mrb[2].mxu0 }
 0x5ac   : > { %v2989_v11 = vpop.f32.mrb[3].mxu0 }
 0x5ad   : > { %v3063_v40 = vadd.f32 %v2989_v11, %v2987_v38 }
 0x5b0   : > { %v3058_v12 = vpop.f32.mrb[2].mxu1 }
 0x5b1   : > { %v3064_v48 = vadd.f32 %v3063_v40, %v3058_v12  ;;  %v3060_v54 = vpop.f32.mrb[3].mxu1 }
 0x5b3   : > { %v3065_v15 = vadd.f32 %v3064_v48, %v3060_v54 }
 0x5b5   : > { %3066 = vadd.xlane.f32.xlu0 %v3065_v15 }
 0x642   : > { %v3067_v19 = vpop.xlane.xlu0 %3066 }
 0x643   : > { %v3068_v17 = vmul.f32 0.001953125, %v3067_v19 }
 0x645   : > { %v3069_v59 = vsub.f32 %v2987_v38, %v3068_v17  ;;  %v3070_v57 = vsub.f32 %v2989_v11, %v3068_v17  ;;  %v3071_v16 = vsub.f32 %v3058_v12, %v3068_v17  ;;  %v3072_v23 = vsub.f32 %v3060_v54, %v3068_v17 }
 0x647   : > { %v3073_v21 = vmul.f32 %v3069_v59, %v3069_v59  ;;  %v3074_v32 = vmul.f32 %v3070_v57, %v3070_v57  ;;  %v3075_v3 = vmul.f32 %v3071_v16, %v3071_v16  ;;  %v3076_v53 = vmul.f32 %v3072_v23, %v3072_v23 }
 0x649   : > { %v3077_v9 = vadd.f32 %v3074_v32, %v3073_v21 }
 0x64b   : > { %v3078_v34 = vadd.f32 %v3077_v9, %v3075_v3 }
 0x64d   : > { %v3079_v27 = vadd.f32 %v3078_v34, %v3076_v53 }
 0x64f   : > { %3080 = vadd.xlane.f32.xlu1 %v3079_v27 }
 0x660   : > { %3099 = vperm.xlu1 %3442, %v3096_v5  }
 0x6dc   : > { %v3081_v62 = vpop.xlane.xlu1 %3080 }
 0x6dd   : > { %v3082_v63 = vmul.f32 0.001953125, %v3081_v62 }
 0x6df   : > { %v3084_v51 = vadd.f32 1e-05, %v3082_v63 }
 0x6e0   : > { %v3100_v10 = vpop.permute.xlu1 %3099 }
 0x6e1   : > { %3448 = vrsqrt.f32 %v3084_v51 }
 0x6eb   : > { %v3449_v31 = vpop.eup %3448 }
 0x6ec   : > { %v3086_v47 = vmul.f32 %v3449_v31, %v3083_v41 }
 0x6ee   : > { %3089 = vperm.xlu0 %3443, %v3086_v47  }
 0x76d   : > { %v3090_v18 = vpop.permute.xlu0 %3089 }
 0x76e   : > { %v3092_v61 = vmul.f32 %v3090_v18, %v3069_v59  ;;  %v3093_v20 = vmul.f32 %v3090_v18, %v3070_v57  ;;  %v3094_v0 = vmul.f32 %v3090_v18, %v3071_v16  ;;  %v3095_v22 = vmul.f32 %v3090_v18, %v3072_v23 }
 0x770   : > { %v3102_v44 = vadd.f32 %v3100_v10, %v3092_v61  ;;  %v3103_v25 = vadd.f32 %v3100_v10, %v3093_v20  ;;  %v3104_v56 = vadd.f32 %v3100_v10, %v3094_v0  ;;  %v3105_v58 = vadd.f32 %v3100_v10, %v3095_v22 }
 0x772   : > { %vm3106_vm0 = vcmp.ge.f32.partialorder %v3102_v44, 0.0  ;;  %vm3107_vm2 = vcmp.ge.f32.partialorder %v3103_v25, 0.0  ;;  %vm3108_vm3 = vcmp.ge.f32.partialorder %v3104_v56, 0.0  ;;  %vm3109_vm4 = vcmp.ge.f32.partialorder %v3105_v58, 0.0 }
 0x773   : > { %v3110_v46 = vmul.f32 0.01, %v3102_v44  ;;  %v3111_v52 = vmul.f32 0.01, %v3103_v25  ;;  %v3112_v4 = vmul.f32 0.01, %v3104_v56 }
 0x774   : > { %v3113_v60 = vmul.f32 0.01, %v3105_v58 }
 0x775   : > { %v3114_v24 = vsel %vm3106_vm0, %v3102_v44, %v3110_v46  ;;  %v3115_v49 = vsel %vm3107_vm2, %v3103_v25, %v3111_v52  ;;  %v3116_v2 = vsel %vm3108_vm3, %v3104_v56, %v3112_v4 }
 0x776   : > { %v3117_v26 = vsel %vm3109_vm4, %v3105_v58, %v3113_v60  ;;  %3118 = vst [vmem:[%s305_s17] sm:$0xff] %v3114_v24  ;;  %3119 = vst [vmem:[%s305_s17 + $0x8] sm:$0xff] %v3115_v49 }
 0x777   : > { %3120 = vst [vmem:[%s305_s17 + $0x10] sm:$0xff] %v3116_v2  ;;  %3121 = vst [vmem:[%s305_s17 + $0x18] sm:$0xff] %v3117_v26 }
 0x778 PF: > { %s18_s27 = sadd.s32 1, %s3456_s27  }
 0x779   : > { %p15_p4 = scmp.ge.s32.totalorder %s18_s27, 4  }
 0x77b   :  { %17 = sbr.rel (!%p15_p4) target bundleno = 1 (0x1), region = 108 }

</bundles_post_ra>
